<compile_context>
chip_gen: v7x
topology: tpu7x:2x2x1
jax: 0.10.0
libtpu: 0.0.40
codegen_flags: <defaults>
</compile_context>

<pallas_src>
import numpy as np
import jax
import jax.numpy as jnp
from jax import lax
from jax.experimental import pallas as pl
from jax.experimental.pallas import tpu as pltpu

INPUT_SIZE = 27
HIDDEN_SIZE = 127
NUM_LAYERS = 3
OUTPUT_SIZE = 1
HP = 128      # hidden size padded to one lane group
DP = 128      # layer-0 input features padded to one lane group
OUTP = 128    # fc output padded to one lane group (sliced back to 1 outside)


# ----------------------------- Pallas kernel --------------------------------
def lstm_kernel(x_ref,
                wih0_ref, whh0_ref, b0_ref,
                wih1_hbm, whh1_hbm, b1_ref,
                wih2_hbm, whh2_hbm, b2_ref,
                fcw_ref, fcb_ref,
                out_ref,
                gx_ref, seq_ref,
                wih1_v, whh1_v, wih2_v, whh2_v, dma_sem):
    T, BP, hp = seq_ref.shape

    # ---- start layer-1/2 weight prefetch; overlaps layer-0/1 compute -------
    cp_wih1 = pltpu.make_async_copy(wih1_hbm, wih1_v, dma_sem.at[0])
    cp_whh1 = pltpu.make_async_copy(whh1_hbm, whh1_v, dma_sem.at[1])
    cp_wih2 = pltpu.make_async_copy(wih2_hbm, wih2_v, dma_sem.at[2])
    cp_whh2 = pltpu.make_async_copy(whh2_hbm, whh2_v, dma_sem.at[3])
    cp_wih1.start()
    cp_whh1.start()
    cp_wih2.start()
    cp_whh2.start()

    def run_layer(x_all, wih_ref, whh_ref, bias_ref, write_seq):
        # Hoisted input projection: one (T*BP, K) @ (K, 4*HP) bf16 MXU matmul
        # (f32 accumulate) + f32 bias for all timesteps, stored to VMEM once.
        gx = (jnp.dot(x_all, wih_ref[...], preferred_element_type=jnp.float32)
              + bias_ref[...])
        gx_ref[...] = gx.reshape(T, BP, 4 * hp)

        whh = whh_ref[...]                      # (HP, 4*HP) bf16, loaded once
        whh_g = whh[:, :hp]                     # g-gate columns first
        whh_ifo = whh[:, hp:]                   # i, f, o columns

        # ---- peeled step t = 0: h0 = c0 = 0 -> skip h@whh and f*c ----------
        gx0 = gx_ref[0]
        g0 = jnp.tanh(gx0[:, :hp])
        sig0 = jax.nn.sigmoid(gx0[:, hp:])
        i0 = sig0[:, 0 * hp:1 * hp]
        o0 = sig0[:, 2 * hp:3 * hp]
        c = i0 * g0
        h = o0 * jnp.tanh(c)
        if write_seq:
            seq_ref[0] = h

        def step(t, carry):
            h, c = carry
            h_b = h.astype(jnp.bfloat16)
            gxt = gx_ref[t]
            # g-gate columns are produced first so tanh(g) can issue on the
            # EUP while the i/f/o matmul is still draining.
            g_pre = gxt[:, :hp] + jnp.dot(h_b, whh_g,
                                          preferred_element_type=jnp.float32)
            g_g = jnp.tanh(g_pre)
            ifo_pre = gxt[:, hp:] + jnp.dot(h_b, whh_ifo,
                                            preferred_element_type=jnp.float32)
            sig = jax.nn.sigmoid(ifo_pre)
            i_g = sig[:, 0 * hp:1 * hp]
            f_g = sig[:, 1 * hp:2 * hp]
            o_g = sig[:, 2 * hp:3 * hp]
            c_new = f_g * c + i_g * g_g
            h_new = o_g * jnp.tanh(c_new)
            if write_seq:
                seq_ref[t] = h_new
            return (h_new, c_new)

        h_last, _ = lax.fori_loop(1, T, step, (h, c), unroll=True)
        return h_last

    # layer 0: x is already (T*BP, DP) bf16; weights resident via BlockSpec
    run_layer(x_ref[...], wih0_ref, whh0_ref, b0_ref, write_seq=True)

    # layer 1: wait for its prefetched weights; read seq_ref fully BEFORE the
    # recurrence overwrites it in place (load happens inside run_layer's
    # hoisted projection, ahead of any seq_ref store for this layer).
    cp_wih1.wait()
    cp_whh1.wait()
    x1 = seq_ref[...].reshape(T * BP, hp).astype(jnp.bfloat16)
    run_layer(x1, wih1_v, whh1_v, b1_ref, write_seq=True)

    # layer 2: only its last hidden state matters -> skip sequence stores
    cp_wih2.wait()
    cp_whh2.wait()
    x2 = seq_ref[...].reshape(T * BP, hp).astype(jnp.bfloat16)
    h_last = run_layer(x2, wih2_v, whh2_v, b2_ref, write_seq=False)

    # fc on last timestep: (BP, HP) @ (HP, OUTP) + (1, OUTP)  (lane-dense out)
    out_ref[...] = (jnp.dot(h_last.astype(jnp.bfloat16), fcw_ref[...],
                            preferred_element_type=jnp.float32)
                    + fcb_ref[...])


# ------------------------- parameter packing (once) -------------------------
def _pack_gates(w_t, h, hp):
    # w_t: (D, 4*h) with PyTorch gate order (i, f, g, o) along the columns.
    # -> (D, 4*hp) in kernel gate order (g, i, f, o); each gate block is
    #    zero-padded on the lane dim so pad lanes stay exactly zero through
    #    the recurrence (g pad -> tanh(0)=0, i/f/o pad -> 0.5, c/h pad -> 0).
    d = w_t.shape[0]
    blocks = (w_t[:, 2 * h:3 * h],   # g
              w_t[:, 0 * h:1 * h],   # i
              w_t[:, 1 * h:2 * h],   # f
              w_t[:, 3 * h:4 * h])   # o
    out = jnp.zeros((d, 4 * hp), jnp.float32)
    for gi, blk in enumerate(blocks):
        out = out.at[:, gi * hp:gi * hp + h].set(blk)
    return out


def _pad_rows(w, rows):
    return jnp.zeros((rows, w.shape[1]), w.dtype).at[:w.shape[0], :].set(w)


def pack_params(params):
    """Run once at init; the jitted forward only consumes the packed arrays."""
    h, hp = HIDDEN_SIZE, HP
    packed = []
    for l in range(NUM_LAYERS):
        wih, whh, bih, bhh = params["lstm"][l]
        in_rows = DP if l == 0 else hp
        wih_p = _pad_rows(_pack_gates(wih.T.astype(jnp.float32), h, hp),
                          in_rows).astype(jnp.bfloat16)
        whh_p = _pad_rows(_pack_gates(whh.T.astype(jnp.float32), h, hp),
                          hp).astype(jnp.bfloat16)
        bias_p = _pack_gates((bih + bhh)[None, :].astype(jnp.float32), h, hp)
        packed += [wih_p, whh_p, bias_p]
    fcw = (jnp.zeros((hp, OUTP), jnp.float32)
           .at[:h, :OUTPUT_SIZE].set(params["fc_w"].T.astype(jnp.float32))
           .astype(jnp.bfloat16))
    fcb = (jnp.zeros((1, OUTP), jnp.float32)
           .at[:, :OUTPUT_SIZE].set(params["fc_b"][None, :].astype(jnp.float32)))
    return tuple(packed) + (fcw, fcb)


@jax.jit
def lstm_forward(x, packed):
    # x: (B, T, INPUT_SIZE), batch_first like the PyTorch module.
    B, T, D = x.shape
    BP = ((B + 7) // 8) * 8                      # pad batch to full sublanes
    x_tbd = jnp.transpose(x, (1, 0, 2)).astype(jnp.float32)   # time-major
    x_pad = jnp.pad(x_tbd, ((0, 0), (0, BP - B), (0, DP - D)))
    x2d = x_pad.reshape(T * BP, DP).astype(jnp.bfloat16)      # bf16 MXU lhs

    vmem = pl.BlockSpec(memory_space=pltpu.MemorySpace.VMEM)
    hbm = pl.BlockSpec(memory_space=pl.ANY)      # prefetched manually in-kernel
    in_specs = [vmem,                            # x
                vmem, vmem, vmem,                # layer 0: wih, whh, bias
                hbm, hbm, vmem,                  # layer 1: wih, whh (HBM), bias
                hbm, hbm, vmem,                  # layer 2: wih, whh (HBM), bias
                vmem, vmem]                      # fc: w, b

    out_full = pl.pallas_call(
        lstm_kernel,
        out_shape=jax.ShapeDtypeStruct((BP, OUTP), jnp.float32),
        in_specs=in_specs,
        out_specs=pl.BlockSpec(memory_space=pltpu.MemorySpace.VMEM),
        scratch_shapes=[
            pltpu.VMEM((T, BP, 4 * HP), jnp.float32),   # hoisted gate inputs
            pltpu.VMEM((T, BP, HP), jnp.float32),       # hidden sequence
            pltpu.VMEM((HP, 4 * HP), jnp.bfloat16),     # wih1 (prefetched)
            pltpu.VMEM((HP, 4 * HP), jnp.bfloat16),     # whh1 (prefetched)
            pltpu.VMEM((HP, 4 * HP), jnp.bfloat16),     # wih2 (prefetched)
            pltpu.VMEM((HP, 4 * HP), jnp.bfloat16),     # whh2 (prefetched)
            pltpu.SemaphoreType.DMA((4,)),
        ],
    )(x2d, *packed)
    return out_full[:B, :OUTPUT_SIZE]


# --------------------- deterministic init + pure-JAX ref --------------------
def init_params(key):
    k = 1.0 / np.sqrt(HIDDEN_SIZE)
    params = {"lstm": []}
    for l in range(NUM_LAYERS):
        d_in = INPUT_SIZE if l == 0 else HIDDEN_SIZE
        key, k1, k2, k3, k4 = jax.random.split(key, 5)
        wih = jax.random.uniform(k1, (4 * HIDDEN_SIZE, d_in), jnp.float32, -k, k)
        whh = jax.random.uniform(k2, (4 * HIDDEN_SIZE, HIDDEN_SIZE), jnp.float32, -k, k)
        bih = jax.random.uniform(k3, (4 * HIDDEN_SIZE,), jnp.float32, -k, k)
        bhh = jax.random.uniform(k4, (4 * HIDDEN_SIZE,), jnp.float32, -k, k)
        params["lstm"].append((wih, whh, bih, bhh))
    key, k1, k2 = jax.random.split(key, 3)
    params["fc_w"] = jax.random.uniform(k1, (OUTPUT_SIZE, HIDDEN_SIZE), jnp.float32, -k, k)
    params["fc_b"] = jax.random.uniform(k2, (OUTPUT_SIZE,), jnp.float32, -k, k)
    return params


def lstm_reference(x, params):
    B, T, _ = x.shape
    H = HIDDEN_SIZE
    layer_in = x
    for l in range(NUM_LAYERS):
        wih, whh, bih, bhh = params["lstm"][l]
        h = jnp.zeros((B, H), jnp.float32)
        c = jnp.zeros((B, H), jnp.float32)
        outs = []
        for t in range(T):
            xt = layer_in[:, t, :]
            gates = xt @ wih.T + h @ whh.T + bih + bhh
            i = jax.nn.sigmoid(gates[:, :H])
            f = jax.nn.sigmoid(gates[:, H:2 * H])
            g = jnp.tanh(gates[:, 2 * H:3 * H])
            o = jax.nn.sigmoid(gates[:, 3 * H:])
            c = f * c + i * g
            h = o * jnp.tanh(c)
            outs.append(h)
        layer_in = jnp.stack(outs, axis=1)
    return layer_in[:, -1, :] @ params["fc_w"].T + params["fc_b"]


if __name__ == "__main__":
    key = jax.random.PRNGKey(0)
    kp, kx = jax.random.split(key)
    params = init_params(kp)
    packed = pack_params(params)          # pack once, outside the jitted path

    B, T = 2, 8
    x = jax.random.normal(kx, (B, T, INPUT_SIZE), jnp.float32)

    out = lstm_forward(x, packed)
    jax.block_until_ready(out)
    assert out.shape == (B, OUTPUT_SIZE)

    ref = lstm_reference(x, params)
    err = np.max(np.abs(np.asarray(out) - np.asarray(ref)))
    if not np.allclose(np.asarray(out), np.asarray(ref), atol=5e-3, rtol=5e-3):
        raise AssertionError(f"kernel/reference mismatch, max abs diff = {err}")

    print("KERNEL_OK")
</pallas_src>

<mosaic_0001>
module attributes {stable_mosaic.version = 11 : i64} {
  func.func @lstm_kernel(%arg0: memref<64x128xbf16, #tpu.memory_space<vmem>>, %arg1: memref<128x512xbf16, #tpu.memory_space<vmem>>, %arg2: memref<128x512xbf16, #tpu.memory_space<vmem>>, %arg3: memref<1x512xf32, #tpu.memory_space<vmem>>, %arg4: memref<128x512xbf16, #tpu.memory_space<any>>, %arg5: memref<128x512xbf16, #tpu.memory_space<any>>, %arg6: memref<1x512xf32, #tpu.memory_space<vmem>>, %arg7: memref<128x512xbf16, #tpu.memory_space<any>>, %arg8: memref<128x512xbf16, #tpu.memory_space<any>>, %arg9: memref<1x512xf32, #tpu.memory_space<vmem>>, %arg10: memref<128x128xbf16, #tpu.memory_space<vmem>>, %arg11: memref<1x128xf32, #tpu.memory_space<vmem>>, %arg12: memref<8x128xf32, #tpu.memory_space<vmem>>, %arg13: memref<8x8x512xf32, #tpu.memory_space<vmem>>, %arg14: memref<8x8x128xf32, #tpu.memory_space<vmem>>, %arg15: memref<128x512xbf16, #tpu.memory_space<vmem>>, %arg16: memref<128x512xbf16, #tpu.memory_space<vmem>>, %arg17: memref<128x512xbf16, #tpu.memory_space<vmem>>, %arg18: memref<128x512xbf16, #tpu.memory_space<vmem>>, %arg19: memref<4x!tpu.dma_semaphore, #tpu.memory_space<semaphore_mem>>) attributes {dimension_semantics = [], scalar_prefetch = 0 : i64, scratch_operands = 7 : i64, tpu.core_type = #tpu.core_type<tc>} {
    %c0_i32 = arith.constant 0 : i32
    %0 = tpu.memref_slice %arg19[%c0_i32] : memref<4x!tpu.dma_semaphore, #tpu.memory_space<semaphore_mem>> -> memref<1x!tpu.dma_semaphore, #tpu.memory_space<semaphore_mem>>
    %1 = tpu.memref_squeeze %0 : memref<1x!tpu.dma_semaphore, #tpu.memory_space<semaphore_mem>> -> memref<!tpu.dma_semaphore, #tpu.memory_space<semaphore_mem>>
    tpu.enqueue_dma source(%arg4 : memref<128x512xbf16, #tpu.memory_space<any>>) target(%arg15 : memref<128x512xbf16, #tpu.memory_space<vmem>>) target_semaphore(%1 : memref<!tpu.dma_semaphore, #tpu.memory_space<semaphore_mem>>)
    %c1_i32 = arith.constant 1 : i32
    %2 = tpu.memref_slice %arg19[%c1_i32] : memref<4x!tpu.dma_semaphore, #tpu.memory_space<semaphore_mem>> -> memref<1x!tpu.dma_semaphore, #tpu.memory_space<semaphore_mem>>
    %3 = tpu.memref_squeeze %2 : memref<1x!tpu.dma_semaphore, #tpu.memory_space<semaphore_mem>> -> memref<!tpu.dma_semaphore, #tpu.memory_space<semaphore_mem>>
    tpu.enqueue_dma source(%arg5 : memref<128x512xbf16, #tpu.memory_space<any>>) target(%arg16 : memref<128x512xbf16, #tpu.memory_space<vmem>>) target_semaphore(%3 : memref<!tpu.dma_semaphore, #tpu.memory_space<semaphore_mem>>)
    %c2_i32 = arith.constant 2 : i32
    %4 = tpu.memref_slice %arg19[%c2_i32] : memref<4x!tpu.dma_semaphore, #tpu.memory_space<semaphore_mem>> -> memref<1x!tpu.dma_semaphore, #tpu.memory_space<semaphore_mem>>
    %5 = tpu.memref_squeeze %4 : memref<1x!tpu.dma_semaphore, #tpu.memory_space<semaphore_mem>> -> memref<!tpu.dma_semaphore, #tpu.memory_space<semaphore_mem>>
    tpu.enqueue_dma source(%arg7 : memref<128x512xbf16, #tpu.memory_space<any>>) target(%arg17 : memref<128x512xbf16, #tpu.memory_space<vmem>>) target_semaphore(%5 : memref<!tpu.dma_semaphore, #tpu.memory_space<semaphore_mem>>)
    %c3_i32 = arith.constant 3 : i32
    %6 = tpu.memref_slice %arg19[%c3_i32] : memref<4x!tpu.dma_semaphore, #tpu.memory_space<semaphore_mem>> -> memref<1x!tpu.dma_semaphore, #tpu.memory_space<semaphore_mem>>
    %7 = tpu.memref_squeeze %6 : memref<1x!tpu.dma_semaphore, #tpu.memory_space<semaphore_mem>> -> memref<!tpu.dma_semaphore, #tpu.memory_space<semaphore_mem>>
    tpu.enqueue_dma source(%arg8 : memref<128x512xbf16, #tpu.memory_space<any>>) target(%arg18 : memref<128x512xbf16, #tpu.memory_space<vmem>>) target_semaphore(%7 : memref<!tpu.dma_semaphore, #tpu.memory_space<semaphore_mem>>)
    %c0 = arith.constant 0 : index
    %c0_0 = arith.constant 0 : index
    %8 = vector.load %arg0[%c0, %c0_0] : memref<64x128xbf16, #tpu.memory_space<vmem>>, vector<64x128xbf16>
    %c0_1 = arith.constant 0 : index
    %c0_2 = arith.constant 0 : index
    %9 = vector.load %arg1[%c0_1, %c0_2] : memref<128x512xbf16, #tpu.memory_space<vmem>>, vector<128x512xbf16>
    %cst = arith.constant dense<0.000000e+00> : vector<64x512xf32>
    %10 = tpu.matmul %8, %9, %cst {dimension_numbers = #tpu.dot_dimension_numbers<[1], [0], [0], [1], [0, 0, 1, 1], [], []>} : vector<64x128xbf16>, vector<128x512xbf16>, vector<64x512xf32> -> vector<64x512xf32>
    %c0_3 = arith.constant 0 : index
    %c0_4 = arith.constant 0 : index
    %11 = vector.load %arg3[%c0_3, %c0_4] : memref<1x512xf32, #tpu.memory_space<vmem>>, vector<1x512xf32>
    %12 = vector.broadcast %11 : vector<1x512xf32> to vector<64x512xf32>
    %13 = arith.addf %10, %12 : vector<64x512xf32>
    %14 = vector.shape_cast %13 : vector<64x512xf32> to vector<8x8x512xf32>
    %c0_5 = arith.constant 0 : index
    %c0_6 = arith.constant 0 : index
    %c0_7 = arith.constant 0 : index
    %15 = vector.load %arg13[%c0_5, %c0_6, %c0_7] : memref<8x8x512xf32, #tpu.memory_space<vmem>>, vector<8x8x512xf32>
    tpu.vector_store %arg13[%c0_5, %c0_6, %c0_7], %14 {strides = array<i32>} : memref<8x8x512xf32, #tpu.memory_space<vmem>>, vector<8x8x512xf32>,
    %c0_8 = arith.constant 0 : index
    %c0_9 = arith.constant 0 : index
    %16 = vector.load %arg2[%c0_8, %c0_9] : memref<128x512xbf16, #tpu.memory_space<vmem>>, vector<128x512xbf16>
    %17 = vector.extract_strided_slice %16 {offsets = [0, 0], sizes = [128, 128], strides = [1, 1]} : vector<128x512xbf16> to vector<128x128xbf16>
    %18 = vector.extract_strided_slice %16 {offsets = [0, 128], sizes = [128, 384], strides = [1, 1]} : vector<128x512xbf16> to vector<128x384xbf16>
    %c0_10 = arith.constant 0 : index
    %c0_11 = arith.constant 0 : index
    %c0_12 = arith.constant 0 : index
    %19 = vector.load %arg13[%c0_10, %c0_11, %c0_12] : memref<8x8x512xf32, #tpu.memory_space<vmem>>, vector<1x8x512xf32>
    %20 = vector.shape_cast %19 : vector<1x8x512xf32> to vector<8x512xf32>
    %21 = vector.extract_strided_slice %20 {offsets = [0, 0], sizes = [8, 128], strides = [1, 1]} : vector<8x512xf32> to vector<8x128xf32>
    %22 = math.tanh %21 : vector<8x128xf32>
    %23 = vector.extract_strided_slice %20 {offsets = [0, 128], sizes = [8, 384], strides = [1, 1]} : vector<8x512xf32> to vector<8x384xf32>
    %24 = arith.negf %23 : vector<8x384xf32>
    %25 = math.exp %24 : vector<8x384xf32>
    %cst_13 = arith.constant 1.000000e+00 : f32
    %26 = vector.broadcast %cst_13 : f32 to vector<8x384xf32>
    %27 = arith.addf %26, %25 : vector<8x384xf32>
    %28 = arith.divf %26, %27 : vector<8x384xf32>
    %29 = vector.extract_strided_slice %28 {offsets = [0, 0], sizes = [8, 128], strides = [1, 1]} : vector<8x384xf32> to vector<8x128xf32>
    %30 = vector.extract_strided_slice %28 {offsets = [0, 256], sizes = [8, 128], strides = [1, 1]} : vector<8x384xf32> to vector<8x128xf32>
    %31 = arith.mulf %29, %22 : vector<8x128xf32>
    %32 = math.tanh %31 : vector<8x128xf32>
    %33 = arith.mulf %30, %32 : vector<8x128xf32>
    %c0_14 = arith.constant 0 : index
    %c0_15 = arith.constant 0 : index
    %c0_16 = arith.constant 0 : index
    %34 = vector.load %arg14[%c0_14, %c0_15, %c0_16] : memref<8x8x128xf32, #tpu.memory_space<vmem>>, vector<1x8x128xf32>
    %35 = vector.shape_cast %34 : vector<1x8x128xf32> to vector<8x128xf32>
    %36 = vector.shape_cast %33 : vector<8x128xf32> to vector<1x8x128xf32>
    tpu.vector_store %arg14[%c0_14, %c0_15, %c0_16], %36 {strides = array<i32>} : memref<8x8x128xf32, #tpu.memory_space<vmem>>, vector<1x8x128xf32>,
    %c1_i32_17 = arith.constant 1 : i32
    %37 = arith.truncf %33 : vector<8x128xf32> to vector<8x128xbf16>
    %38 = arith.index_cast %c1_i32_17 : i32 to index
    %c0_18 = arith.constant 0 : index
    %c0_19 = arith.constant 0 : index
    %39 = vector.load %arg13[%38, %c0_18, %c0_19] : memref<8x8x512xf32, #tpu.memory_space<vmem>>, vector<1x8x512xf32>
    %40 = vector.shape_cast %39 : vector<1x8x512xf32> to vector<8x512xf32>
    %41 = vector.extract_strided_slice %40 {offsets = [0, 0], sizes = [8, 128], strides = [1, 1]} : vector<8x512xf32> to vector<8x128xf32>
    %cst_20 = arith.constant dense<0.000000e+00> : vector<8x128xf32>
    %42 = tpu.matmul %37, %17, %cst_20 {dimension_numbers = #tpu.dot_dimension_numbers<[1], [0], [0], [1], [0, 0, 1, 1], [], []>} : vector<8x128xbf16>, vector<128x128xbf16>, vector<8x128xf32> -> vector<8x128xf32>
    %43 = arith.addf %41, %42 : vector<8x128xf32>
    %44 = math.tanh %43 : vector<8x128xf32>
    %45 = vector.extract_strided_slice %40 {offsets = [0, 128], sizes = [8, 384], strides = [1, 1]} : vector<8x512xf32> to vector<8x384xf32>
    %cst_21 = arith.constant dense<0.000000e+00> : vector<8x384xf32>
    %46 = tpu.matmul %37, %18, %cst_21 {dimension_numbers = #tpu.dot_dimension_numbers<[1], [0], [0], [1], [0, 0, 1, 1], [], []>} : vector<8x128xbf16>, vector<128x384xbf16>, vector<8x384xf32> -> vector<8x384xf32>
    %47 = arith.addf %45, %46 : vector<8x384xf32>
    %48 = arith.negf %47 : vector<8x384xf32>
    %49 = math.exp %48 : vector<8x384xf32>
    %cst_22 = arith.constant 1.000000e+00 : f32
    %50 = vector.broadcast %cst_22 : f32 to vector<8x384xf32>
    %51 = arith.addf %50, %49 : vector<8x384xf32>
    %52 = arith.divf %50, %51 : vector<8x384xf32>
    %53 = vector.extract_strided_slice %52 {offsets = [0, 0], sizes = [8, 128], strides = [1, 1]} : vector<8x384xf32> to vector<8x128xf32>
    %54 = vector.extract_strided_slice %52 {offsets = [0, 128], sizes = [8, 128], strides = [1, 1]} : vector<8x384xf32> to vector<8x128xf32>
    %55 = vector.extract_strided_slice %52 {offsets = [0, 256], sizes = [8, 128], strides = [1, 1]} : vector<8x384xf32> to vector<8x128xf32>
    %56 = arith.mulf %54, %31 : vector<8x128xf32>
    %57 = arith.mulf %53, %44 : vector<8x128xf32>
    %58 = arith.addf %56, %57 : vector<8x128xf32>
    %59 = math.tanh %58 : vector<8x128xf32>
    %60 = arith.mulf %55, %59 : vector<8x128xf32>
    %61 = arith.index_cast %c1_i32_17 : i32 to index
    %c0_23 = arith.constant 0 : index
    %c0_24 = arith.constant 0 : index
    %62 = vector.load %arg14[%61, %c0_23, %c0_24] : memref<8x8x128xf32, #tpu.memory_space<vmem>>, vector<1x8x128xf32>
    %63 = vector.shape_cast %62 : vector<1x8x128xf32> to vector<8x128xf32>
    %64 = vector.shape_cast %60 : vector<8x128xf32> to vector<1x8x128xf32>
    tpu.vector_store %arg14[%61, %c0_23, %c0_24], %64 {strides = array<i32>} : memref<8x8x128xf32, #tpu.memory_space<vmem>>, vector<1x8x128xf32>,
    %c2_i32_25 = arith.constant 2 : i32
    %65 = arith.truncf %60 : vector<8x128xf32> to vector<8x128xbf16>
    %66 = arith.index_cast %c2_i32_25 : i32 to index
    %c0_26 = arith.constant 0 : index
    %c0_27 = arith.constant 0 : index
    %67 = vector.load %arg13[%66, %c0_26, %c0_27] : memref<8x8x512xf32, #tpu.memory_space<vmem>>, vector<1x8x512xf32>
    %68 = vector.shape_cast %67 : vector<1x8x512xf32> to vector<8x512xf32>
    %69 = vector.extract_strided_slice %68 {offsets = [0, 0], sizes = [8, 128], strides = [1, 1]} : vector<8x512xf32> to vector<8x128xf32>
    %cst_28 = arith.constant dense<0.000000e+00> : vector<8x128xf32>
    %70 = tpu.matmul %65, %17, %cst_28 {dimension_numbers = #tpu.dot_dimension_numbers<[1], [0], [0], [1], [0, 0, 1, 1], [], []>} : vector<8x128xbf16>, vector<128x128xbf16>, vector<8x128xf32> -> vector<8x128xf32>
    %71 = arith.addf %69, %70 : vector<8x128xf32>
    %72 = math.tanh %71 : vector<8x128xf32>
    %73 = vector.extract_strided_slice %68 {offsets = [0, 128], sizes = [8, 384], strides = [1, 1]} : vector<8x512xf32> to vector<8x384xf32>
    %cst_29 = arith.constant dense<0.000000e+00> : vector<8x384xf32>
    %74 = tpu.matmul %65, %18, %cst_29 {dimension_numbers = #tpu.dot_dimension_numbers<[1], [0], [0], [1], [0, 0, 1, 1], [], []>} : vector<8x128xbf16>, vector<128x384xbf16>, vector<8x384xf32> -> vector<8x384xf32>
    %75 = arith.addf %73, %74 : vector<8x384xf32>
    %76 = arith.negf %75 : vector<8x384xf32>
    %77 = math.exp %76 : vector<8x384xf32>
    %cst_30 = arith.constant 1.000000e+00 : f32
    %78 = vector.broadcast %cst_30 : f32 to vector<8x384xf32>
    %79 = arith.addf %78, %77 : vector<8x384xf32>
    %80 = arith.divf %78, %79 : vector<8x384xf32>
    %81 = vector.extract_strided_slice %80 {offsets = [0, 0], sizes = [8, 128], strides = [1, 1]} : vector<8x384xf32> to vector<8x128xf32>
    %82 = vector.extract_strided_slice %80 {offsets = [0, 128], sizes = [8, 128], strides = [1, 1]} : vector<8x384xf32> to vector<8x128xf32>
    %83 = vector.extract_strided_slice %80 {offsets = [0, 256], sizes = [8, 128], strides = [1, 1]} : vector<8x384xf32> to vector<8x128xf32>
    %84 = arith.mulf %82, %58 : vector<8x128xf32>
    %85 = arith.mulf %81, %72 : vector<8x128xf32>
    %86 = arith.addf %84, %85 : vector<8x128xf32>
    %87 = math.tanh %86 : vector<8x128xf32>
    %88 = arith.mulf %83, %87 : vector<8x128xf32>
    %89 = arith.index_cast %c2_i32_25 : i32 to index
    %c0_31 = arith.constant 0 : index
    %c0_32 = arith.constant 0 : index
    %90 = vector.load %arg14[%89, %c0_31, %c0_32] : memref<8x8x128xf32, #tpu.memory_space<vmem>>, vector<1x8x128xf32>
    %91 = vector.shape_cast %90 : vector<1x8x128xf32> to vector<8x128xf32>
    %92 = vector.shape_cast %88 : vector<8x128xf32> to vector<1x8x128xf32>
    tpu.vector_store %arg14[%89, %c0_31, %c0_32], %92 {strides = array<i32>} : memref<8x8x128xf32, #tpu.memory_space<vmem>>, vector<1x8x128xf32>,
    %c3_i32_33 = arith.constant 3 : i32
    %93 = arith.truncf %88 : vector<8x128xf32> to vector<8x128xbf16>
    %94 = arith.index_cast %c3_i32_33 : i32 to index
    %c0_34 = arith.constant 0 : index
    %c0_35 = arith.constant 0 : index
    %95 = vector.load %arg13[%94, %c0_34, %c0_35] : memref<8x8x512xf32, #tpu.memory_space<vmem>>, vector<1x8x512xf32>
    %96 = vector.shape_cast %95 : vector<1x8x512xf32> to vector<8x512xf32>
    %97 = vector.extract_strided_slice %96 {offsets = [0, 0], sizes = [8, 128], strides = [1, 1]} : vector<8x512xf32> to vector<8x128xf32>
    %cst_36 = arith.constant dense<0.000000e+00> : vector<8x128xf32>
    %98 = tpu.matmul %93, %17, %cst_36 {dimension_numbers = #tpu.dot_dimension_numbers<[1], [0], [0], [1], [0, 0, 1, 1], [], []>} : vector<8x128xbf16>, vector<128x128xbf16>, vector<8x128xf32> -> vector<8x128xf32>
    %99 = arith.addf %97, %98 : vector<8x128xf32>
    %100 = math.tanh %99 : vector<8x128xf32>
    %101 = vector.extract_strided_slice %96 {offsets = [0, 128], sizes = [8, 384], strides = [1, 1]} : vector<8x512xf32> to vector<8x384xf32>
    %cst_37 = arith.constant dense<0.000000e+00> : vector<8x384xf32>
    %102 = tpu.matmul %93, %18, %cst_37 {dimension_numbers = #tpu.dot_dimension_numbers<[1], [0], [0], [1], [0, 0, 1, 1], [], []>} : vector<8x128xbf16>, vector<128x384xbf16>, vector<8x384xf32> -> vector<8x384xf32>
    %103 = arith.addf %101, %102 : vector<8x384xf32>
    %104 = arith.negf %103 : vector<8x384xf32>
    %105 = math.exp %104 : vector<8x384xf32>
    %cst_38 = arith.constant 1.000000e+00 : f32
    %106 = vector.broadcast %cst_38 : f32 to vector<8x384xf32>
    %107 = arith.addf %106, %105 : vector<8x384xf32>
    %108 = arith.divf %106, %107 : vector<8x384xf32>
    %109 = vector.extract_strided_slice %108 {offsets = [0, 0], sizes = [8, 128], strides = [1, 1]} : vector<8x384xf32> to vector<8x128xf32>
    %110 = vector.extract_strided_slice %108 {offsets = [0, 128], sizes = [8, 128], strides = [1, 1]} : vector<8x384xf32> to vector<8x128xf32>
    %111 = vector.extract_strided_slice %108 {offsets = [0, 256], sizes = [8, 128], strides = [1, 1]} : vector<8x384xf32> to vector<8x128xf32>
    %112 = arith.mulf %110, %86 : vector<8x128xf32>
    %113 = arith.mulf %109, %100 : vector<8x128xf32>
    %114 = arith.addf %112, %113 : vector<8x128xf32>
    %115 = math.tanh %114 : vector<8x128xf32>
    %116 = arith.mulf %111, %115 : vector<8x128xf32>
    %117 = arith.index_cast %c3_i32_33 : i32 to index
    %c0_39 = arith.constant 0 : index
    %c0_40 = arith.constant 0 : index
    %118 = vector.load %arg14[%117, %c0_39, %c0_40] : memref<8x8x128xf32, #tpu.memory_space<vmem>>, vector<1x8x128xf32>
    %119 = vector.shape_cast %118 : vector<1x8x128xf32> to vector<8x128xf32>
    %120 = vector.shape_cast %116 : vector<8x128xf32> to vector<1x8x128xf32>
    tpu.vector_store %arg14[%117, %c0_39, %c0_40], %120 {strides = array<i32>} : memref<8x8x128xf32, #tpu.memory_space<vmem>>, vector<1x8x128xf32>,
    %c4_i32 = arith.constant 4 : i32
    %121 = arith.truncf %116 : vector<8x128xf32> to vector<8x128xbf16>
    %122 = arith.index_cast %c4_i32 : i32 to index
    %c0_41 = arith.constant 0 : index
    %c0_42 = arith.constant 0 : index
    %123 = vector.load %arg13[%122, %c0_41, %c0_42] : memref<8x8x512xf32, #tpu.memory_space<vmem>>, vector<1x8x512xf32>
    %124 = vector.shape_cast %123 : vector<1x8x512xf32> to vector<8x512xf32>
    %125 = vector.extract_strided_slice %124 {offsets = [0, 0], sizes = [8, 128], strides = [1, 1]} : vector<8x512xf32> to vector<8x128xf32>
    %cst_43 = arith.constant dense<0.000000e+00> : vector<8x128xf32>
    %126 = tpu.matmul %121, %17, %cst_43 {dimension_numbers = #tpu.dot_dimension_numbers<[1], [0], [0], [1], [0, 0, 1, 1], [], []>} : vector<8x128xbf16>, vector<128x128xbf16>, vector<8x128xf32> -> vector<8x128xf32>
    %127 = arith.addf %125, %126 : vector<8x128xf32>
    %128 = math.tanh %127 : vector<8x128xf32>
    %129 = vector.extract_strided_slice %124 {offsets = [0, 128], sizes = [8, 384], strides = [1, 1]} : vector<8x512xf32> to vector<8x384xf32>
    %cst_44 = arith.constant dense<0.000000e+00> : vector<8x384xf32>
    %130 = tpu.matmul %121, %18, %cst_44 {dimension_numbers = #tpu.dot_dimension_numbers<[1], [0], [0], [1], [0, 0, 1, 1], [], []>} : vector<8x128xbf16>, vector<128x384xbf16>, vector<8x384xf32> -> vector<8x384xf32>
    %131 = arith.addf %129, %130 : vector<8x384xf32>
    %132 = arith.negf %131 : vector<8x384xf32>
    %133 = math.exp %132 : vector<8x384xf32>
    %cst_45 = arith.constant 1.000000e+00 : f32
    %134 = vector.broadcast %cst_45 : f32 to vector<8x384xf32>
    %135 = arith.addf %134, %133 : vector<8x384xf32>
    %136 = arith.divf %134, %135 : vector<8x384xf32>
    %137 = vector.extract_strided_slice %136 {offsets = [0, 0], sizes = [8, 128], strides = [1, 1]} : vector<8x384xf32> to vector<8x128xf32>
    %138 = vector.extract_strided_slice %136 {offsets = [0, 128], sizes = [8, 128], strides = [1, 1]} : vector<8x384xf32> to vector<8x128xf32>
    %139 = vector.extract_strided_slice %136 {offsets = [0, 256], sizes = [8, 128], strides = [1, 1]} : vector<8x384xf32> to vector<8x128xf32>
    %140 = arith.mulf %138, %114 : vector<8x128xf32>
    %141 = arith.mulf %137, %128 : vector<8x128xf32>
    %142 = arith.addf %140, %141 : vector<8x128xf32>
    %143 = math.tanh %142 : vector<8x128xf32>
    %144 = arith.mulf %139, %143 : vector<8x128xf32>
    %145 = arith.index_cast %c4_i32 : i32 to index
    %c0_46 = arith.constant 0 : index
    %c0_47 = arith.constant 0 : index
    %146 = vector.load %arg14[%145, %c0_46, %c0_47] : memref<8x8x128xf32, #tpu.memory_space<vmem>>, vector<1x8x128xf32>
    %147 = vector.shape_cast %146 : vector<1x8x128xf32> to vector<8x128xf32>
    %148 = vector.shape_cast %144 : vector<8x128xf32> to vector<1x8x128xf32>
    tpu.vector_store %arg14[%145, %c0_46, %c0_47], %148 {strides = array<i32>} : memref<8x8x128xf32, #tpu.memory_space<vmem>>, vector<1x8x128xf32>,
    %c5_i32 = arith.constant 5 : i32
    %149 = arith.truncf %144 : vector<8x128xf32> to vector<8x128xbf16>
    %150 = arith.index_cast %c5_i32 : i32 to index
    %c0_48 = arith.constant 0 : index
    %c0_49 = arith.constant 0 : index
    %151 = vector.load %arg13[%150, %c0_48, %c0_49] : memref<8x8x512xf32, #tpu.memory_space<vmem>>, vector<1x8x512xf32>
    %152 = vector.shape_cast %151 : vector<1x8x512xf32> to vector<8x512xf32>
    %153 = vector.extract_strided_slice %152 {offsets = [0, 0], sizes = [8, 128], strides = [1, 1]} : vector<8x512xf32> to vector<8x128xf32>
    %cst_50 = arith.constant dense<0.000000e+00> : vector<8x128xf32>
    %154 = tpu.matmul %149, %17, %cst_50 {dimension_numbers = #tpu.dot_dimension_numbers<[1], [0], [0], [1], [0, 0, 1, 1], [], []>} : vector<8x128xbf16>, vector<128x128xbf16>, vector<8x128xf32> -> vector<8x128xf32>
    %155 = arith.addf %153, %154 : vector<8x128xf32>
    %156 = math.tanh %155 : vector<8x128xf32>
    %157 = vector.extract_strided_slice %152 {offsets = [0, 128], sizes = [8, 384], strides = [1, 1]} : vector<8x512xf32> to vector<8x384xf32>
    %cst_51 = arith.constant dense<0.000000e+00> : vector<8x384xf32>
    %158 = tpu.matmul %149, %18, %cst_51 {dimension_numbers = #tpu.dot_dimension_numbers<[1], [0], [0], [1], [0, 0, 1, 1], [], []>} : vector<8x128xbf16>, vector<128x384xbf16>, vector<8x384xf32> -> vector<8x384xf32>
    %159 = arith.addf %157, %158 : vector<8x384xf32>
    %160 = arith.negf %159 : vector<8x384xf32>
    %161 = math.exp %160 : vector<8x384xf32>
    %cst_52 = arith.constant 1.000000e+00 : f32
    %162 = vector.broadcast %cst_52 : f32 to vector<8x384xf32>
    %163 = arith.addf %162, %161 : vector<8x384xf32>
    %164 = arith.divf %162, %163 : vector<8x384xf32>
    %165 = vector.extract_strided_slice %164 {offsets = [0, 0], sizes = [8, 128], strides = [1, 1]} : vector<8x384xf32> to vector<8x128xf32>
    %166 = vector.extract_strided_slice %164 {offsets = [0, 128], sizes = [8, 128], strides = [1, 1]} : vector<8x384xf32> to vector<8x128xf32>
    %167 = vector.extract_strided_slice %164 {offsets = [0, 256], sizes = [8, 128], strides = [1, 1]} : vector<8x384xf32> to vector<8x128xf32>
    %168 = arith.mulf %166, %142 : vector<8x128xf32>
    %169 = arith.mulf %165, %156 : vector<8x128xf32>
    %170 = arith.addf %168, %169 : vector<8x128xf32>
    %171 = math.tanh %170 : vector<8x128xf32>
    %172 = arith.mulf %167, %171 : vector<8x128xf32>
    %173 = arith.index_cast %c5_i32 : i32 to index
    %c0_53 = arith.constant 0 : index
    %c0_54 = arith.constant 0 : index
    %174 = vector.load %arg14[%173, %c0_53, %c0_54] : memref<8x8x128xf32, #tpu.memory_space<vmem>>, vector<1x8x128xf32>
    %175 = vector.shape_cast %174 : vector<1x8x128xf32> to vector<8x128xf32>
    %176 = vector.shape_cast %172 : vector<8x128xf32> to vector<1x8x128xf32>
    tpu.vector_store %arg14[%173, %c0_53, %c0_54], %176 {strides = array<i32>} : memref<8x8x128xf32, #tpu.memory_space<vmem>>, vector<1x8x128xf32>,
    %c6_i32 = arith.constant 6 : i32
    %177 = arith.truncf %172 : vector<8x128xf32> to vector<8x128xbf16>
    %178 = arith.index_cast %c6_i32 : i32 to index
    %c0_55 = arith.constant 0 : index
    %c0_56 = arith.constant 0 : index
    %179 = vector.load %arg13[%178, %c0_55, %c0_56] : memref<8x8x512xf32, #tpu.memory_space<vmem>>, vector<1x8x512xf32>
    %180 = vector.shape_cast %179 : vector<1x8x512xf32> to vector<8x512xf32>
    %181 = vector.extract_strided_slice %180 {offsets = [0, 0], sizes = [8, 128], strides = [1, 1]} : vector<8x512xf32> to vector<8x128xf32>
    %cst_57 = arith.constant dense<0.000000e+00> : vector<8x128xf32>
    %182 = tpu.matmul %177, %17, %cst_57 {dimension_numbers = #tpu.dot_dimension_numbers<[1], [0], [0], [1], [0, 0, 1, 1], [], []>} : vector<8x128xbf16>, vector<128x128xbf16>, vector<8x128xf32> -> vector<8x128xf32>
    %183 = arith.addf %181, %182 : vector<8x128xf32>
    %184 = math.tanh %183 : vector<8x128xf32>
    %185 = vector.extract_strided_slice %180 {offsets = [0, 128], sizes = [8, 384], strides = [1, 1]} : vector<8x512xf32> to vector<8x384xf32>
    %cst_58 = arith.constant dense<0.000000e+00> : vector<8x384xf32>
    %186 = tpu.matmul %177, %18, %cst_58 {dimension_numbers = #tpu.dot_dimension_numbers<[1], [0], [0], [1], [0, 0, 1, 1], [], []>} : vector<8x128xbf16>, vector<128x384xbf16>, vector<8x384xf32> -> vector<8x384xf32>
    %187 = arith.addf %185, %186 : vector<8x384xf32>
    %188 = arith.negf %187 : vector<8x384xf32>
    %189 = math.exp %188 : vector<8x384xf32>
    %cst_59 = arith.constant 1.000000e+00 : f32
    %190 = vector.broadcast %cst_59 : f32 to vector<8x384xf32>
    %191 = arith.addf %190, %189 : vector<8x384xf32>
    %192 = arith.divf %190, %191 : vector<8x384xf32>
    %193 = vector.extract_strided_slice %192 {offsets = [0, 0], sizes = [8, 128], strides = [1, 1]} : vector<8x384xf32> to vector<8x128xf32>
    %194 = vector.extract_strided_slice %192 {offsets = [0, 128], sizes = [8, 128], strides = [1, 1]} : vector<8x384xf32> to vector<8x128xf32>
    %195 = vector.extract_strided_slice %192 {offsets = [0, 256], sizes = [8, 128], strides = [1, 1]} : vector<8x384xf32> to vector<8x128xf32>
    %196 = arith.mulf %194, %170 : vector<8x128xf32>
    %197 = arith.mulf %193, %184 : vector<8x128xf32>
    %198 = arith.addf %196, %197 : vector<8x128xf32>
    %199 = math.tanh %198 : vector<8x128xf32>
    %200 = arith.mulf %195, %199 : vector<8x128xf32>
    %201 = arith.index_cast %c6_i32 : i32 to index
    %c0_60 = arith.constant 0 : index
    %c0_61 = arith.constant 0 : index
    %202 = vector.load %arg14[%201, %c0_60, %c0_61] : memref<8x8x128xf32, #tpu.memory_space<vmem>>, vector<1x8x128xf32>
    %203 = vector.shape_cast %202 : vector<1x8x128xf32> to vector<8x128xf32>
    %204 = vector.shape_cast %200 : vector<8x128xf32> to vector<1x8x128xf32>
    tpu.vector_store %arg14[%201, %c0_60, %c0_61], %204 {strides = array<i32>} : memref<8x8x128xf32, #tpu.memory_space<vmem>>, vector<1x8x128xf32>,
    %c7_i32 = arith.constant 7 : i32
    %205 = arith.truncf %200 : vector<8x128xf32> to vector<8x128xbf16>
    %206 = arith.index_cast %c7_i32 : i32 to index
    %c0_62 = arith.constant 0 : index
    %c0_63 = arith.constant 0 : index
    %207 = vector.load %arg13[%206, %c0_62, %c0_63] : memref<8x8x512xf32, #tpu.memory_space<vmem>>, vector<1x8x512xf32>
    %208 = vector.shape_cast %207 : vector<1x8x512xf32> to vector<8x512xf32>
    %209 = vector.extract_strided_slice %208 {offsets = [0, 0], sizes = [8, 128], strides = [1, 1]} : vector<8x512xf32> to vector<8x128xf32>
    %cst_64 = arith.constant dense<0.000000e+00> : vector<8x128xf32>
    %210 = tpu.matmul %205, %17, %cst_64 {dimension_numbers = #tpu.dot_dimension_numbers<[1], [0], [0], [1], [0, 0, 1, 1], [], []>} : vector<8x128xbf16>, vector<128x128xbf16>, vector<8x128xf32> -> vector<8x128xf32>
    %211 = arith.addf %209, %210 : vector<8x128xf32>
    %212 = math.tanh %211 : vector<8x128xf32>
    %213 = vector.extract_strided_slice %208 {offsets = [0, 128], sizes = [8, 384], strides = [1, 1]} : vector<8x512xf32> to vector<8x384xf32>
    %cst_65 = arith.constant dense<0.000000e+00> : vector<8x384xf32>
    %214 = tpu.matmul %205, %18, %cst_65 {dimension_numbers = #tpu.dot_dimension_numbers<[1], [0], [0], [1], [0, 0, 1, 1], [], []>} : vector<8x128xbf16>, vector<128x384xbf16>, vector<8x384xf32> -> vector<8x384xf32>
    %215 = arith.addf %213, %214 : vector<8x384xf32>
    %216 = arith.negf %215 : vector<8x384xf32>
    %217 = math.exp %216 : vector<8x384xf32>
    %cst_66 = arith.constant 1.000000e+00 : f32
    %218 = vector.broadcast %cst_66 : f32 to vector<8x384xf32>
    %219 = arith.addf %218, %217 : vector<8x384xf32>
    %220 = arith.divf %218, %219 : vector<8x384xf32>
    %221 = vector.extract_strided_slice %220 {offsets = [0, 0], sizes = [8, 128], strides = [1, 1]} : vector<8x384xf32> to vector<8x128xf32>
    %222 = vector.extract_strided_slice %220 {offsets = [0, 128], sizes = [8, 128], strides = [1, 1]} : vector<8x384xf32> to vector<8x128xf32>
    %223 = vector.extract_strided_slice %220 {offsets = [0, 256], sizes = [8, 128], strides = [1, 1]} : vector<8x384xf32> to vector<8x128xf32>
    %224 = arith.mulf %222, %198 : vector<8x128xf32>
    %225 = arith.mulf %221, %212 : vector<8x128xf32>
    %226 = arith.addf %224, %225 : vector<8x128xf32>
    %227 = math.tanh %226 : vector<8x128xf32>
    %228 = arith.mulf %223, %227 : vector<8x128xf32>
    %229 = arith.index_cast %c7_i32 : i32 to index
    %c0_67 = arith.constant 0 : index
    %c0_68 = arith.constant 0 : index
    %230 = vector.load %arg14[%229, %c0_67, %c0_68] : memref<8x8x128xf32, #tpu.memory_space<vmem>>, vector<1x8x128xf32>
    %231 = vector.shape_cast %230 : vector<1x8x128xf32> to vector<8x128xf32>
    %232 = vector.shape_cast %228 : vector<8x128xf32> to vector<1x8x128xf32>
    tpu.vector_store %arg14[%229, %c0_67, %c0_68], %232 {strides = array<i32>} : memref<8x8x128xf32, #tpu.memory_space<vmem>>, vector<1x8x128xf32>,
    %c7_i32_69 = arith.constant 7 : i32
    %c0_i32_70 = arith.constant 0 : i32
    %233 = tpu.memref_slice %arg19[%c0_i32_70] : memref<4x!tpu.dma_semaphore, #tpu.memory_space<semaphore_mem>> -> memref<1x!tpu.dma_semaphore, #tpu.memory_space<semaphore_mem>>
    %234 = tpu.memref_squeeze %233 : memref<1x!tpu.dma_semaphore, #tpu.memory_space<semaphore_mem>> -> memref<!tpu.dma_semaphore, #tpu.memory_space<semaphore_mem>>
    tpu.wait_dma2 semaphore(%234 : memref<!tpu.dma_semaphore, #tpu.memory_space<semaphore_mem>>) src(%arg4 : memref<128x512xbf16, #tpu.memory_space<any>>) dst(%arg15 : memref<128x512xbf16, #tpu.memory_space<vmem>>)
    %c1_i32_71 = arith.constant 1 : i32
    %235 = tpu.memref_slice %arg19[%c1_i32_71] : memref<4x!tpu.dma_semaphore, #tpu.memory_space<semaphore_mem>> -> memref<1x!tpu.dma_semaphore, #tpu.memory_space<semaphore_mem>>
    %236 = tpu.memref_squeeze %235 : memref<1x!tpu.dma_semaphore, #tpu.memory_space<semaphore_mem>> -> memref<!tpu.dma_semaphore, #tpu.memory_space<semaphore_mem>>
    tpu.wait_dma2 semaphore(%236 : memref<!tpu.dma_semaphore, #tpu.memory_space<semaphore_mem>>) src(%arg5 : memref<128x512xbf16, #tpu.memory_space<any>>) dst(%arg16 : memref<128x512xbf16, #tpu.memory_space<vmem>>)
    %c0_72 = arith.constant 0 : index
    %c0_73 = arith.constant 0 : index
    %c0_74 = arith.constant 0 : index
    %237 = vector.load %arg14[%c0_72, %c0_73, %c0_74] : memref<8x8x128xf32, #tpu.memory_space<vmem>>, vector<8x8x128xf32>
    %238 = vector.shape_cast %237 : vector<8x8x128xf32> to vector<64x128xf32>
    %239 = arith.truncf %238 : vector<64x128xf32> to vector<64x128xbf16>
    %c0_75 = arith.constant 0 : index
    %c0_76 = arith.constant 0 : index
    %240 = vector.load %arg15[%c0_75, %c0_76] : memref<128x512xbf16, #tpu.memory_space<vmem>>, vector<128x512xbf16>
    %cst_77 = arith.constant dense<0.000000e+00> : vector<64x512xf32>
    %241 = tpu.matmul %239, %240, %cst_77 {dimension_numbers = #tpu.dot_dimension_numbers<[1], [0], [0], [1], [0, 0, 1, 1], [], []>} : vector<64x128xbf16>, vector<128x512xbf16>, vector<64x512xf32> -> vector<64x512xf32>
    %c0_78 = arith.constant 0 : index
    %c0_79 = arith.constant 0 : index
    %242 = vector.load %arg6[%c0_78, %c0_79] : memref<1x512xf32, #tpu.memory_space<vmem>>, vector<1x512xf32>
    %243 = vector.broadcast %242 : vector<1x512xf32> to vector<64x512xf32>
    %244 = arith.addf %241, %243 : vector<64x512xf32>
    %245 = vector.shape_cast %244 : vector<64x512xf32> to vector<8x8x512xf32>
    %c0_80 = arith.constant 0 : index
    %c0_81 = arith.constant 0 : index
    %c0_82 = arith.constant 0 : index
    %246 = vector.load %arg13[%c0_80, %c0_81, %c0_82] : memref<8x8x512xf32, #tpu.memory_space<vmem>>, vector<8x8x512xf32>
    tpu.vector_store %arg13[%c0_80, %c0_81, %c0_82], %245 {strides = array<i32>} : memref<8x8x512xf32, #tpu.memory_space<vmem>>, vector<8x8x512xf32>,
    %c0_83 = arith.constant 0 : index
    %c0_84 = arith.constant 0 : index
    %247 = vector.load %arg16[%c0_83, %c0_84] : memref<128x512xbf16, #tpu.memory_space<vmem>>, vector<128x512xbf16>
    %248 = vector.extract_strided_slice %247 {offsets = [0, 0], sizes = [128, 128], strides = [1, 1]} : vector<128x512xbf16> to vector<128x128xbf16>
    %249 = vector.extract_strided_slice %247 {offsets = [0, 128], sizes = [128, 384], strides = [1, 1]} : vector<128x512xbf16> to vector<128x384xbf16>
    %c0_85 = arith.constant 0 : index
    %c0_86 = arith.constant 0 : index
    %c0_87 = arith.constant 0 : index
    %250 = vector.load %arg13[%c0_85, %c0_86, %c0_87] : memref<8x8x512xf32, #tpu.memory_space<vmem>>, vector<1x8x512xf32>
    %251 = vector.shape_cast %250 : vector<1x8x512xf32> to vector<8x512xf32>
    %252 = vector.extract_strided_slice %251 {offsets = [0, 0], sizes = [8, 128], strides = [1, 1]} : vector<8x512xf32> to vector<8x128xf32>
    %253 = math.tanh %252 : vector<8x128xf32>
    %254 = vector.extract_strided_slice %251 {offsets = [0, 128], sizes = [8, 384], strides = [1, 1]} : vector<8x512xf32> to vector<8x384xf32>
    %255 = arith.negf %254 : vector<8x384xf32>
    %256 = math.exp %255 : vector<8x384xf32>
    %cst_88 = arith.constant 1.000000e+00 : f32
    %257 = vector.broadcast %cst_88 : f32 to vector<8x384xf32>
    %258 = arith.addf %257, %256 : vector<8x384xf32>
    %259 = arith.divf %257, %258 : vector<8x384xf32>
    %260 = vector.extract_strided_slice %259 {offsets = [0, 0], sizes = [8, 128], strides = [1, 1]} : vector<8x384xf32> to vector<8x128xf32>
    %261 = vector.extract_strided_slice %259 {offsets = [0, 256], sizes = [8, 128], strides = [1, 1]} : vector<8x384xf32> to vector<8x128xf32>
    %262 = arith.mulf %260, %253 : vector<8x128xf32>
    %263 = math.tanh %262 : vector<8x128xf32>
    %264 = arith.mulf %261, %263 : vector<8x128xf32>
    %c0_89 = arith.constant 0 : index
    %c0_90 = arith.constant 0 : index
    %c0_91 = arith.constant 0 : index
    %265 = vector.load %arg14[%c0_89, %c0_90, %c0_91] : memref<8x8x128xf32, #tpu.memory_space<vmem>>, vector<1x8x128xf32>
    %266 = vector.shape_cast %265 : vector<1x8x128xf32> to vector<8x128xf32>
    %267 = vector.shape_cast %264 : vector<8x128xf32> to vector<1x8x128xf32>
    tpu.vector_store %arg14[%c0_89, %c0_90, %c0_91], %267 {strides = array<i32>} : memref<8x8x128xf32, #tpu.memory_space<vmem>>, vector<1x8x128xf32>,
    %c1_i32_92 = arith.constant 1 : i32
    %268 = arith.truncf %264 : vector<8x128xf32> to vector<8x128xbf16>
    %269 = arith.index_cast %c1_i32_92 : i32 to index
    %c0_93 = arith.constant 0 : index
    %c0_94 = arith.constant 0 : index
    %270 = vector.load %arg13[%269, %c0_93, %c0_94] : memref<8x8x512xf32, #tpu.memory_space<vmem>>, vector<1x8x512xf32>
    %271 = vector.shape_cast %270 : vector<1x8x512xf32> to vector<8x512xf32>
    %272 = vector.extract_strided_slice %271 {offsets = [0, 0], sizes = [8, 128], strides = [1, 1]} : vector<8x512xf32> to vector<8x128xf32>
    %cst_95 = arith.constant dense<0.000000e+00> : vector<8x128xf32>
    %273 = tpu.matmul %268, %248, %cst_95 {dimension_numbers = #tpu.dot_dimension_numbers<[1], [0], [0], [1], [0, 0, 1, 1], [], []>} : vector<8x128xbf16>, vector<128x128xbf16>, vector<8x128xf32> -> vector<8x128xf32>
    %274 = arith.addf %272, %273 : vector<8x128xf32>
    %275 = math.tanh %274 : vector<8x128xf32>
    %276 = vector.extract_strided_slice %271 {offsets = [0, 128], sizes = [8, 384], strides = [1, 1]} : vector<8x512xf32> to vector<8x384xf32>
    %cst_96 = arith.constant dense<0.000000e+00> : vector<8x384xf32>
    %277 = tpu.matmul %268, %249, %cst_96 {dimension_numbers = #tpu.dot_dimension_numbers<[1], [0], [0], [1], [0, 0, 1, 1], [], []>} : vector<8x128xbf16>, vector<128x384xbf16>, vector<8x384xf32> -> vector<8x384xf32>
    %278 = arith.addf %276, %277 : vector<8x384xf32>
    %279 = arith.negf %278 : vector<8x384xf32>
    %280 = math.exp %279 : vector<8x384xf32>
    %cst_97 = arith.constant 1.000000e+00 : f32
    %281 = vector.broadcast %cst_97 : f32 to vector<8x384xf32>
    %282 = arith.addf %281, %280 : vector<8x384xf32>
    %283 = arith.divf %281, %282 : vector<8x384xf32>
    %284 = vector.extract_strided_slice %283 {offsets = [0, 0], sizes = [8, 128], strides = [1, 1]} : vector<8x384xf32> to vector<8x128xf32>
    %285 = vector.extract_strided_slice %283 {offsets = [0, 128], sizes = [8, 128], strides = [1, 1]} : vector<8x384xf32> to vector<8x128xf32>
    %286 = vector.extract_strided_slice %283 {offsets = [0, 256], sizes = [8, 128], strides = [1, 1]} : vector<8x384xf32> to vector<8x128xf32>
    %287 = arith.mulf %285, %262 : vector<8x128xf32>
    %288 = arith.mulf %284, %275 : vector<8x128xf32>
    %289 = arith.addf %287, %288 : vector<8x128xf32>
    %290 = math.tanh %289 : vector<8x128xf32>
    %291 = arith.mulf %286, %290 : vector<8x128xf32>
    %292 = arith.index_cast %c1_i32_92 : i32 to index
    %c0_98 = arith.constant 0 : index
    %c0_99 = arith.constant 0 : index
    %293 = vector.load %arg14[%292, %c0_98, %c0_99] : memref<8x8x128xf32, #tpu.memory_space<vmem>>, vector<1x8x128xf32>
    %294 = vector.shape_cast %293 : vector<1x8x128xf32> to vector<8x128xf32>
    %295 = vector.shape_cast %291 : vector<8x128xf32> to vector<1x8x128xf32>
    tpu.vector_store %arg14[%292, %c0_98, %c0_99], %295 {strides = array<i32>} : memref<8x8x128xf32, #tpu.memory_space<vmem>>, vector<1x8x128xf32>,
    %c2_i32_100 = arith.constant 2 : i32
    %296 = arith.truncf %291 : vector<8x128xf32> to vector<8x128xbf16>
    %297 = arith.index_cast %c2_i32_100 : i32 to index
    %c0_101 = arith.constant 0 : index
    %c0_102 = arith.constant 0 : index
    %298 = vector.load %arg13[%297, %c0_101, %c0_102] : memref<8x8x512xf32, #tpu.memory_space<vmem>>, vector<1x8x512xf32>
    %299 = vector.shape_cast %298 : vector<1x8x512xf32> to vector<8x512xf32>
    %300 = vector.extract_strided_slice %299 {offsets = [0, 0], sizes = [8, 128], strides = [1, 1]} : vector<8x512xf32> to vector<8x128xf32>
    %cst_103 = arith.constant dense<0.000000e+00> : vector<8x128xf32>
    %301 = tpu.matmul %296, %248, %cst_103 {dimension_numbers = #tpu.dot_dimension_numbers<[1], [0], [0], [1], [0, 0, 1, 1], [], []>} : vector<8x128xbf16>, vector<128x128xbf16>, vector<8x128xf32> -> vector<8x128xf32>
    %302 = arith.addf %300, %301 : vector<8x128xf32>
    %303 = math.tanh %302 : vector<8x128xf32>
    %304 = vector.extract_strided_slice %299 {offsets = [0, 128], sizes = [8, 384], strides = [1, 1]} : vector<8x512xf32> to vector<8x384xf32>
    %cst_104 = arith.constant dense<0.000000e+00> : vector<8x384xf32>
    %305 = tpu.matmul %296, %249, %cst_104 {dimension_numbers = #tpu.dot_dimension_numbers<[1], [0], [0], [1], [0, 0, 1, 1], [], []>} : vector<8x128xbf16>, vector<128x384xbf16>, vector<8x384xf32> -> vector<8x384xf32>
    %306 = arith.addf %304, %305 : vector<8x384xf32>
    %307 = arith.negf %306 : vector<8x384xf32>
    %308 = math.exp %307 : vector<8x384xf32>
    %cst_105 = arith.constant 1.000000e+00 : f32
    %309 = vector.broadcast %cst_105 : f32 to vector<8x384xf32>
    %310 = arith.addf %309, %308 : vector<8x384xf32>
    %311 = arith.divf %309, %310 : vector<8x384xf32>
    %312 = vector.extract_strided_slice %311 {offsets = [0, 0], sizes = [8, 128], strides = [1, 1]} : vector<8x384xf32> to vector<8x128xf32>
    %313 = vector.extract_strided_slice %311 {offsets = [0, 128], sizes = [8, 128], strides = [1, 1]} : vector<8x384xf32> to vector<8x128xf32>
    %314 = vector.extract_strided_slice %311 {offsets = [0, 256], sizes = [8, 128], strides = [1, 1]} : vector<8x384xf32> to vector<8x128xf32>
    %315 = arith.mulf %313, %289 : vector<8x128xf32>
    %316 = arith.mulf %312, %303 : vector<8x128xf32>
    %317 = arith.addf %315, %316 : vector<8x128xf32>
    %318 = math.tanh %317 : vector<8x128xf32>
    %319 = arith.mulf %314, %318 : vector<8x128xf32>
    %320 = arith.index_cast %c2_i32_100 : i32 to index
    %c0_106 = arith.constant 0 : index
    %c0_107 = arith.constant 0 : index
    %321 = vector.load %arg14[%320, %c0_106, %c0_107] : memref<8x8x128xf32, #tpu.memory_space<vmem>>, vector<1x8x128xf32>
    %322 = vector.shape_cast %321 : vector<1x8x128xf32> to vector<8x128xf32>
    %323 = vector.shape_cast %319 : vector<8x128xf32> to vector<1x8x128xf32>
    tpu.vector_store %arg14[%320, %c0_106, %c0_107], %323 {strides = array<i32>} : memref<8x8x128xf32, #tpu.memory_space<vmem>>, vector<1x8x128xf32>,
    %c3_i32_108 = arith.constant 3 : i32
    %324 = arith.truncf %319 : vector<8x128xf32> to vector<8x128xbf16>
    %325 = arith.index_cast %c3_i32_108 : i32 to index
    %c0_109 = arith.constant 0 : index
    %c0_110 = arith.constant 0 : index
    %326 = vector.load %arg13[%325, %c0_109, %c0_110] : memref<8x8x512xf32, #tpu.memory_space<vmem>>, vector<1x8x512xf32>
    %327 = vector.shape_cast %326 : vector<1x8x512xf32> to vector<8x512xf32>
    %328 = vector.extract_strided_slice %327 {offsets = [0, 0], sizes = [8, 128], strides = [1, 1]} : vector<8x512xf32> to vector<8x128xf32>
    %cst_111 = arith.constant dense<0.000000e+00> : vector<8x128xf32>
    %329 = tpu.matmul %324, %248, %cst_111 {dimension_numbers = #tpu.dot_dimension_numbers<[1], [0], [0], [1], [0, 0, 1, 1], [], []>} : vector<8x128xbf16>, vector<128x128xbf16>, vector<8x128xf32> -> vector<8x128xf32>
    %330 = arith.addf %328, %329 : vector<8x128xf32>
    %331 = math.tanh %330 : vector<8x128xf32>
    %332 = vector.extract_strided_slice %327 {offsets = [0, 128], sizes = [8, 384], strides = [1, 1]} : vector<8x512xf32> to vector<8x384xf32>
    %cst_112 = arith.constant dense<0.000000e+00> : vector<8x384xf32>
    %333 = tpu.matmul %324, %249, %cst_112 {dimension_numbers = #tpu.dot_dimension_numbers<[1], [0], [0], [1], [0, 0, 1, 1], [], []>} : vector<8x128xbf16>, vector<128x384xbf16>, vector<8x384xf32> -> vector<8x384xf32>
    %334 = arith.addf %332, %333 : vector<8x384xf32>
    %335 = arith.negf %334 : vector<8x384xf32>
    %336 = math.exp %335 : vector<8x384xf32>
    %cst_113 = arith.constant 1.000000e+00 : f32
    %337 = vector.broadcast %cst_113 : f32 to vector<8x384xf32>
    %338 = arith.addf %337, %336 : vector<8x384xf32>
    %339 = arith.divf %337, %338 : vector<8x384xf32>
    %340 = vector.extract_strided_slice %339 {offsets = [0, 0], sizes = [8, 128], strides = [1, 1]} : vector<8x384xf32> to vector<8x128xf32>
    %341 = vector.extract_strided_slice %339 {offsets = [0, 128], sizes = [8, 128], strides = [1, 1]} : vector<8x384xf32> to vector<8x128xf32>
    %342 = vector.extract_strided_slice %339 {offsets = [0, 256], sizes = [8, 128], strides = [1, 1]} : vector<8x384xf32> to vector<8x128xf32>
    %343 = arith.mulf %341, %317 : vector<8x128xf32>
    %344 = arith.mulf %340, %331 : vector<8x128xf32>
    %345 = arith.addf %343, %344 : vector<8x128xf32>
    %346 = math.tanh %345 : vector<8x128xf32>
    %347 = arith.mulf %342, %346 : vector<8x128xf32>
    %348 = arith.index_cast %c3_i32_108 : i32 to index
    %c0_114 = arith.constant 0 : index
    %c0_115 = arith.constant 0 : index
    %349 = vector.load %arg14[%348, %c0_114, %c0_115] : memref<8x8x128xf32, #tpu.memory_space<vmem>>, vector<1x8x128xf32>
    %350 = vector.shape_cast %349 : vector<1x8x128xf32> to vector<8x128xf32>
    %351 = vector.shape_cast %347 : vector<8x128xf32> to vector<1x8x128xf32>
    tpu.vector_store %arg14[%348, %c0_114, %c0_115], %351 {strides = array<i32>} : memref<8x8x128xf32, #tpu.memory_space<vmem>>, vector<1x8x128xf32>,
    %c4_i32_116 = arith.constant 4 : i32
    %352 = arith.truncf %347 : vector<8x128xf32> to vector<8x128xbf16>
    %353 = arith.index_cast %c4_i32_116 : i32 to index
    %c0_117 = arith.constant 0 : index
    %c0_118 = arith.constant 0 : index
    %354 = vector.load %arg13[%353, %c0_117, %c0_118] : memref<8x8x512xf32, #tpu.memory_space<vmem>>, vector<1x8x512xf32>
    %355 = vector.shape_cast %354 : vector<1x8x512xf32> to vector<8x512xf32>
    %356 = vector.extract_strided_slice %355 {offsets = [0, 0], sizes = [8, 128], strides = [1, 1]} : vector<8x512xf32> to vector<8x128xf32>
    %cst_119 = arith.constant dense<0.000000e+00> : vector<8x128xf32>
    %357 = tpu.matmul %352, %248, %cst_119 {dimension_numbers = #tpu.dot_dimension_numbers<[1], [0], [0], [1], [0, 0, 1, 1], [], []>} : vector<8x128xbf16>, vector<128x128xbf16>, vector<8x128xf32> -> vector<8x128xf32>
    %358 = arith.addf %356, %357 : vector<8x128xf32>
    %359 = math.tanh %358 : vector<8x128xf32>
    %360 = vector.extract_strided_slice %355 {offsets = [0, 128], sizes = [8, 384], strides = [1, 1]} : vector<8x512xf32> to vector<8x384xf32>
    %cst_120 = arith.constant dense<0.000000e+00> : vector<8x384xf32>
    %361 = tpu.matmul %352, %249, %cst_120 {dimension_numbers = #tpu.dot_dimension_numbers<[1], [0], [0], [1], [0, 0, 1, 1], [], []>} : vector<8x128xbf16>, vector<128x384xbf16>, vector<8x384xf32> -> vector<8x384xf32>
    %362 = arith.addf %360, %361 : vector<8x384xf32>
    %363 = arith.negf %362 : vector<8x384xf32>
    %364 = math.exp %363 : vector<8x384xf32>
    %cst_121 = arith.constant 1.000000e+00 : f32
    %365 = vector.broadcast %cst_121 : f32 to vector<8x384xf32>
    %366 = arith.addf %365, %364 : vector<8x384xf32>
    %367 = arith.divf %365, %366 : vector<8x384xf32>
    %368 = vector.extract_strided_slice %367 {offsets = [0, 0], sizes = [8, 128], strides = [1, 1]} : vector<8x384xf32> to vector<8x128xf32>
    %369 = vector.extract_strided_slice %367 {offsets = [0, 128], sizes = [8, 128], strides = [1, 1]} : vector<8x384xf32> to vector<8x128xf32>
    %370 = vector.extract_strided_slice %367 {offsets = [0, 256], sizes = [8, 128], strides = [1, 1]} : vector<8x384xf32> to vector<8x128xf32>
    %371 = arith.mulf %369, %345 : vector<8x128xf32>
    %372 = arith.mulf %368, %359 : vector<8x128xf32>
    %373 = arith.addf %371, %372 : vector<8x128xf32>
    %374 = math.tanh %373 : vector<8x128xf32>
    %375 = arith.mulf %370, %374 : vector<8x128xf32>
    %376 = arith.index_cast %c4_i32_116 : i32 to index
    %c0_122 = arith.constant 0 : index
    %c0_123 = arith.constant 0 : index
    %377 = vector.load %arg14[%376, %c0_122, %c0_123] : memref<8x8x128xf32, #tpu.memory_space<vmem>>, vector<1x8x128xf32>
    %378 = vector.shape_cast %377 : vector<1x8x128xf32> to vector<8x128xf32>
    %379 = vector.shape_cast %375 : vector<8x128xf32> to vector<1x8x128xf32>
    tpu.vector_store %arg14[%376, %c0_122, %c0_123], %379 {strides = array<i32>} : memref<8x8x128xf32, #tpu.memory_space<vmem>>, vector<1x8x128xf32>,
    %c5_i32_124 = arith.constant 5 : i32
    %380 = arith.truncf %375 : vector<8x128xf32> to vector<8x128xbf16>
    %381 = arith.index_cast %c5_i32_124 : i32 to index
    %c0_125 = arith.constant 0 : index
    %c0_126 = arith.constant 0 : index
    %382 = vector.load %arg13[%381, %c0_125, %c0_126] : memref<8x8x512xf32, #tpu.memory_space<vmem>>, vector<1x8x512xf32>
    %383 = vector.shape_cast %382 : vector<1x8x512xf32> to vector<8x512xf32>
    %384 = vector.extract_strided_slice %383 {offsets = [0, 0], sizes = [8, 128], strides = [1, 1]} : vector<8x512xf32> to vector<8x128xf32>
    %cst_127 = arith.constant dense<0.000000e+00> : vector<8x128xf32>
    %385 = tpu.matmul %380, %248, %cst_127 {dimension_numbers = #tpu.dot_dimension_numbers<[1], [0], [0], [1], [0, 0, 1, 1], [], []>} : vector<8x128xbf16>, vector<128x128xbf16>, vector<8x128xf32> -> vector<8x128xf32>
    %386 = arith.addf %384, %385 : vector<8x128xf32>
    %387 = math.tanh %386 : vector<8x128xf32>
    %388 = vector.extract_strided_slice %383 {offsets = [0, 128], sizes = [8, 384], strides = [1, 1]} : vector<8x512xf32> to vector<8x384xf32>
    %cst_128 = arith.constant dense<0.000000e+00> : vector<8x384xf32>
    %389 = tpu.matmul %380, %249, %cst_128 {dimension_numbers = #tpu.dot_dimension_numbers<[1], [0], [0], [1], [0, 0, 1, 1], [], []>} : vector<8x128xbf16>, vector<128x384xbf16>, vector<8x384xf32> -> vector<8x384xf32>
    %390 = arith.addf %388, %389 : vector<8x384xf32>
    %391 = arith.negf %390 : vector<8x384xf32>
    %392 = math.exp %391 : vector<8x384xf32>
    %cst_129 = arith.constant 1.000000e+00 : f32
    %393 = vector.broadcast %cst_129 : f32 to vector<8x384xf32>
    %394 = arith.addf %393, %392 : vector<8x384xf32>
    %395 = arith.divf %393, %394 : vector<8x384xf32>
    %396 = vector.extract_strided_slice %395 {offsets = [0, 0], sizes = [8, 128], strides = [1, 1]} : vector<8x384xf32> to vector<8x128xf32>
    %397 = vector.extract_strided_slice %395 {offsets = [0, 128], sizes = [8, 128], strides = [1, 1]} : vector<8x384xf32> to vector<8x128xf32>
    %398 = vector.extract_strided_slice %395 {offsets = [0, 256], sizes = [8, 128], strides = [1, 1]} : vector<8x384xf32> to vector<8x128xf32>
    %399 = arith.mulf %397, %373 : vector<8x128xf32>
    %400 = arith.mulf %396, %387 : vector<8x128xf32>
    %401 = arith.addf %399, %400 : vector<8x128xf32>
    %402 = math.tanh %401 : vector<8x128xf32>
    %403 = arith.mulf %398, %402 : vector<8x128xf32>
    %404 = arith.index_cast %c5_i32_124 : i32 to index
    %c0_130 = arith.constant 0 : index
    %c0_131 = arith.constant 0 : index
    %405 = vector.load %arg14[%404, %c0_130, %c0_131] : memref<8x8x128xf32, #tpu.memory_space<vmem>>, vector<1x8x128xf32>
    %406 = vector.shape_cast %405 : vector<1x8x128xf32> to vector<8x128xf32>
    %407 = vector.shape_cast %403 : vector<8x128xf32> to vector<1x8x128xf32>
    tpu.vector_store %arg14[%404, %c0_130, %c0_131], %407 {strides = array<i32>} : memref<8x8x128xf32, #tpu.memory_space<vmem>>, vector<1x8x128xf32>,
    %c6_i32_132 = arith.constant 6 : i32
    %408 = arith.truncf %403 : vector<8x128xf32> to vector<8x128xbf16>
    %409 = arith.index_cast %c6_i32_132 : i32 to index
    %c0_133 = arith.constant 0 : index
    %c0_134 = arith.constant 0 : index
    %410 = vector.load %arg13[%409, %c0_133, %c0_134] : memref<8x8x512xf32, #tpu.memory_space<vmem>>, vector<1x8x512xf32>
    %411 = vector.shape_cast %410 : vector<1x8x512xf32> to vector<8x512xf32>
    %412 = vector.extract_strided_slice %411 {offsets = [0, 0], sizes = [8, 128], strides = [1, 1]} : vector<8x512xf32> to vector<8x128xf32>
    %cst_135 = arith.constant dense<0.000000e+00> : vector<8x128xf32>
    %413 = tpu.matmul %408, %248, %cst_135 {dimension_numbers = #tpu.dot_dimension_numbers<[1], [0], [0], [1], [0, 0, 1, 1], [], []>} : vector<8x128xbf16>, vector<128x128xbf16>, vector<8x128xf32> -> vector<8x128xf32>
    %414 = arith.addf %412, %413 : vector<8x128xf32>
    %415 = math.tanh %414 : vector<8x128xf32>
    %416 = vector.extract_strided_slice %411 {offsets = [0, 128], sizes = [8, 384], strides = [1, 1]} : vector<8x512xf32> to vector<8x384xf32>
    %cst_136 = arith.constant dense<0.000000e+00> : vector<8x384xf32>
    %417 = tpu.matmul %408, %249, %cst_136 {dimension_numbers = #tpu.dot_dimension_numbers<[1], [0], [0], [1], [0, 0, 1, 1], [], []>} : vector<8x128xbf16>, vector<128x384xbf16>, vector<8x384xf32> -> vector<8x384xf32>
    %418 = arith.addf %416, %417 : vector<8x384xf32>
    %419 = arith.negf %418 : vector<8x384xf32>
    %420 = math.exp %419 : vector<8x384xf32>
    %cst_137 = arith.constant 1.000000e+00 : f32
    %421 = vector.broadcast %cst_137 : f32 to vector<8x384xf32>
    %422 = arith.addf %421, %420 : vector<8x384xf32>
    %423 = arith.divf %421, %422 : vector<8x384xf32>
    %424 = vector.extract_strided_slice %423 {offsets = [0, 0], sizes = [8, 128], strides = [1, 1]} : vector<8x384xf32> to vector<8x128xf32>
    %425 = vector.extract_strided_slice %423 {offsets = [0, 128], sizes = [8, 128], strides = [1, 1]} : vector<8x384xf32> to vector<8x128xf32>
    %426 = vector.extract_strided_slice %423 {offsets = [0, 256], sizes = [8, 128], strides = [1, 1]} : vector<8x384xf32> to vector<8x128xf32>
    %427 = arith.mulf %425, %401 : vector<8x128xf32>
    %428 = arith.mulf %424, %415 : vector<8x128xf32>
    %429 = arith.addf %427, %428 : vector<8x128xf32>
    %430 = math.tanh %429 : vector<8x128xf32>
    %431 = arith.mulf %426, %430 : vector<8x128xf32>
    %432 = arith.index_cast %c6_i32_132 : i32 to index
    %c0_138 = arith.constant 0 : index
    %c0_139 = arith.constant 0 : index
    %433 = vector.load %arg14[%432, %c0_138, %c0_139] : memref<8x8x128xf32, #tpu.memory_space<vmem>>, vector<1x8x128xf32>
    %434 = vector.shape_cast %433 : vector<1x8x128xf32> to vector<8x128xf32>
    %435 = vector.shape_cast %431 : vector<8x128xf32> to vector<1x8x128xf32>
    tpu.vector_store %arg14[%432, %c0_138, %c0_139], %435 {strides = array<i32>} : memref<8x8x128xf32, #tpu.memory_space<vmem>>, vector<1x8x128xf32>,
    %c7_i32_140 = arith.constant 7 : i32
    %436 = arith.truncf %431 : vector<8x128xf32> to vector<8x128xbf16>
    %437 = arith.index_cast %c7_i32_140 : i32 to index
    %c0_141 = arith.constant 0 : index
    %c0_142 = arith.constant 0 : index
    %438 = vector.load %arg13[%437, %c0_141, %c0_142] : memref<8x8x512xf32, #tpu.memory_space<vmem>>, vector<1x8x512xf32>
    %439 = vector.shape_cast %438 : vector<1x8x512xf32> to vector<8x512xf32>
    %440 = vector.extract_strided_slice %439 {offsets = [0, 0], sizes = [8, 128], strides = [1, 1]} : vector<8x512xf32> to vector<8x128xf32>
    %cst_143 = arith.constant dense<0.000000e+00> : vector<8x128xf32>
    %441 = tpu.matmul %436, %248, %cst_143 {dimension_numbers = #tpu.dot_dimension_numbers<[1], [0], [0], [1], [0, 0, 1, 1], [], []>} : vector<8x128xbf16>, vector<128x128xbf16>, vector<8x128xf32> -> vector<8x128xf32>
    %442 = arith.addf %440, %441 : vector<8x128xf32>
    %443 = math.tanh %442 : vector<8x128xf32>
    %444 = vector.extract_strided_slice %439 {offsets = [0, 128], sizes = [8, 384], strides = [1, 1]} : vector<8x512xf32> to vector<8x384xf32>
    %cst_144 = arith.constant dense<0.000000e+00> : vector<8x384xf32>
    %445 = tpu.matmul %436, %249, %cst_144 {dimension_numbers = #tpu.dot_dimension_numbers<[1], [0], [0], [1], [0, 0, 1, 1], [], []>} : vector<8x128xbf16>, vector<128x384xbf16>, vector<8x384xf32> -> vector<8x384xf32>
    %446 = arith.addf %444, %445 : vector<8x384xf32>
    %447 = arith.negf %446 : vector<8x384xf32>
    %448 = math.exp %447 : vector<8x384xf32>
    %cst_145 = arith.constant 1.000000e+00 : f32
    %449 = vector.broadcast %cst_145 : f32 to vector<8x384xf32>
    %450 = arith.addf %449, %448 : vector<8x384xf32>
    %451 = arith.divf %449, %450 : vector<8x384xf32>
    %452 = vector.extract_strided_slice %451 {offsets = [0, 0], sizes = [8, 128], strides = [1, 1]} : vector<8x384xf32> to vector<8x128xf32>
    %453 = vector.extract_strided_slice %451 {offsets = [0, 128], sizes = [8, 128], strides = [1, 1]} : vector<8x384xf32> to vector<8x128xf32>
    %454 = vector.extract_strided_slice %451 {offsets = [0, 256], sizes = [8, 128], strides = [1, 1]} : vector<8x384xf32> to vector<8x128xf32>
    %455 = arith.mulf %453, %429 : vector<8x128xf32>
    %456 = arith.mulf %452, %443 : vector<8x128xf32>
    %457 = arith.addf %455, %456 : vector<8x128xf32>
    %458 = math.tanh %457 : vector<8x128xf32>
    %459 = arith.mulf %454, %458 : vector<8x128xf32>
    %460 = arith.index_cast %c7_i32_140 : i32 to index
    %c0_146 = arith.constant 0 : index
    %c0_147 = arith.constant 0 : index
    %461 = vector.load %arg14[%460, %c0_146, %c0_147] : memref<8x8x128xf32, #tpu.memory_space<vmem>>, vector<1x8x128xf32>
    %462 = vector.shape_cast %461 : vector<1x8x128xf32> to vector<8x128xf32>
    %463 = vector.shape_cast %459 : vector<8x128xf32> to vector<1x8x128xf32>
    tpu.vector_store %arg14[%460, %c0_146, %c0_147], %463 {strides = array<i32>} : memref<8x8x128xf32, #tpu.memory_space<vmem>>, vector<1x8x128xf32>,
    %c7_i32_148 = arith.constant 7 : i32
    %c2_i32_149 = arith.constant 2 : i32
    %464 = tpu.memref_slice %arg19[%c2_i32_149] : memref<4x!tpu.dma_semaphore, #tpu.memory_space<semaphore_mem>> -> memref<1x!tpu.dma_semaphore, #tpu.memory_space<semaphore_mem>>
    %465 = tpu.memref_squeeze %464 : memref<1x!tpu.dma_semaphore, #tpu.memory_space<semaphore_mem>> -> memref<!tpu.dma_semaphore, #tpu.memory_space<semaphore_mem>>
    tpu.wait_dma2 semaphore(%465 : memref<!tpu.dma_semaphore, #tpu.memory_space<semaphore_mem>>) src(%arg7 : memref<128x512xbf16, #tpu.memory_space<any>>) dst(%arg17 : memref<128x512xbf16, #tpu.memory_space<vmem>>)
    %c3_i32_150 = arith.constant 3 : i32
    %466 = tpu.memref_slice %arg19[%c3_i32_150] : memref<4x!tpu.dma_semaphore, #tpu.memory_space<semaphore_mem>> -> memref<1x!tpu.dma_semaphore, #tpu.memory_space<semaphore_mem>>
    %467 = tpu.memref_squeeze %466 : memref<1x!tpu.dma_semaphore, #tpu.memory_space<semaphore_mem>> -> memref<!tpu.dma_semaphore, #tpu.memory_space<semaphore_mem>>
    tpu.wait_dma2 semaphore(%467 : memref<!tpu.dma_semaphore, #tpu.memory_space<semaphore_mem>>) src(%arg8 : memref<128x512xbf16, #tpu.memory_space<any>>) dst(%arg18 : memref<128x512xbf16, #tpu.memory_space<vmem>>)
    %c0_151 = arith.constant 0 : index
    %c0_152 = arith.constant 0 : index
    %c0_153 = arith.constant 0 : index
    %468 = vector.load %arg14[%c0_151, %c0_152, %c0_153] : memref<8x8x128xf32, #tpu.memory_space<vmem>>, vector<8x8x128xf32>
    %469 = vector.shape_cast %468 : vector<8x8x128xf32> to vector<64x128xf32>
    %470 = arith.truncf %469 : vector<64x128xf32> to vector<64x128xbf16>
    %c0_154 = arith.constant 0 : index
    %c0_155 = arith.constant 0 : index
    %471 = vector.load %arg17[%c0_154, %c0_155] : memref<128x512xbf16, #tpu.memory_space<vmem>>, vector<128x512xbf16>
    %cst_156 = arith.constant dense<0.000000e+00> : vector<64x512xf32>
    %472 = tpu.matmul %470, %471, %cst_156 {dimension_numbers = #tpu.dot_dimension_numbers<[1], [0], [0], [1], [0, 0, 1, 1], [], []>} : vector<64x128xbf16>, vector<128x512xbf16>, vector<64x512xf32> -> vector<64x512xf32>
    %c0_157 = arith.constant 0 : index
    %c0_158 = arith.constant 0 : index
    %473 = vector.load %arg9[%c0_157, %c0_158] : memref<1x512xf32, #tpu.memory_space<vmem>>, vector<1x512xf32>
    %474 = vector.broadcast %473 : vector<1x512xf32> to vector<64x512xf32>
    %475 = arith.addf %472, %474 : vector<64x512xf32>
    %476 = vector.shape_cast %475 : vector<64x512xf32> to vector<8x8x512xf32>
    %c0_159 = arith.constant 0 : index
    %c0_160 = arith.constant 0 : index
    %c0_161 = arith.constant 0 : index
    %477 = vector.load %arg13[%c0_159, %c0_160, %c0_161] : memref<8x8x512xf32, #tpu.memory_space<vmem>>, vector<8x8x512xf32>
    tpu.vector_store %arg13[%c0_159, %c0_160, %c0_161], %476 {strides = array<i32>} : memref<8x8x512xf32, #tpu.memory_space<vmem>>, vector<8x8x512xf32>,
    %c0_162 = arith.constant 0 : index
    %c0_163 = arith.constant 0 : index
    %478 = vector.load %arg18[%c0_162, %c0_163] : memref<128x512xbf16, #tpu.memory_space<vmem>>, vector<128x512xbf16>
    %479 = vector.extract_strided_slice %478 {offsets = [0, 0], sizes = [128, 128], strides = [1, 1]} : vector<128x512xbf16> to vector<128x128xbf16>
    %480 = vector.extract_strided_slice %478 {offsets = [0, 128], sizes = [128, 384], strides = [1, 1]} : vector<128x512xbf16> to vector<128x384xbf16>
    %c0_164 = arith.constant 0 : index
    %c0_165 = arith.constant 0 : index
    %c0_166 = arith.constant 0 : index
    %481 = vector.load %arg13[%c0_164, %c0_165, %c0_166] : memref<8x8x512xf32, #tpu.memory_space<vmem>>, vector<1x8x512xf32>
    %482 = vector.shape_cast %481 : vector<1x8x512xf32> to vector<8x512xf32>
    %483 = vector.extract_strided_slice %482 {offsets = [0, 0], sizes = [8, 128], strides = [1, 1]} : vector<8x512xf32> to vector<8x128xf32>
    %484 = math.tanh %483 : vector<8x128xf32>
    %485 = vector.extract_strided_slice %482 {offsets = [0, 128], sizes = [8, 384], strides = [1, 1]} : vector<8x512xf32> to vector<8x384xf32>
    %486 = arith.negf %485 : vector<8x384xf32>
    %487 = math.exp %486 : vector<8x384xf32>
    %cst_167 = arith.constant 1.000000e+00 : f32
    %488 = vector.broadcast %cst_167 : f32 to vector<8x384xf32>
    %489 = arith.addf %488, %487 : vector<8x384xf32>
    %490 = arith.divf %488, %489 : vector<8x384xf32>
    %491 = vector.extract_strided_slice %490 {offsets = [0, 0], sizes = [8, 128], strides = [1, 1]} : vector<8x384xf32> to vector<8x128xf32>
    %492 = vector.extract_strided_slice %490 {offsets = [0, 256], sizes = [8, 128], strides = [1, 1]} : vector<8x384xf32> to vector<8x128xf32>
    %493 = arith.mulf %491, %484 : vector<8x128xf32>
    %494 = math.tanh %493 : vector<8x128xf32>
    %495 = arith.mulf %492, %494 : vector<8x128xf32>
    %c1_i32_168 = arith.constant 1 : i32
    %496 = arith.truncf %495 : vector<8x128xf32> to vector<8x128xbf16>
    %497 = arith.index_cast %c1_i32_168 : i32 to index
    %c0_169 = arith.constant 0 : index
    %c0_170 = arith.constant 0 : index
    %498 = vector.load %arg13[%497, %c0_169, %c0_170] : memref<8x8x512xf32, #tpu.memory_space<vmem>>, vector<1x8x512xf32>
    %499 = vector.shape_cast %498 : vector<1x8x512xf32> to vector<8x512xf32>
    %500 = vector.extract_strided_slice %499 {offsets = [0, 0], sizes = [8, 128], strides = [1, 1]} : vector<8x512xf32> to vector<8x128xf32>
    %cst_171 = arith.constant dense<0.000000e+00> : vector<8x128xf32>
    %501 = tpu.matmul %496, %479, %cst_171 {dimension_numbers = #tpu.dot_dimension_numbers<[1], [0], [0], [1], [0, 0, 1, 1], [], []>} : vector<8x128xbf16>, vector<128x128xbf16>, vector<8x128xf32> -> vector<8x128xf32>
    %502 = arith.addf %500, %501 : vector<8x128xf32>
    %503 = math.tanh %502 : vector<8x128xf32>
    %504 = vector.extract_strided_slice %499 {offsets = [0, 128], sizes = [8, 384], strides = [1, 1]} : vector<8x512xf32> to vector<8x384xf32>
    %cst_172 = arith.constant dense<0.000000e+00> : vector<8x384xf32>
    %505 = tpu.matmul %496, %480, %cst_172 {dimension_numbers = #tpu.dot_dimension_numbers<[1], [0], [0], [1], [0, 0, 1, 1], [], []>} : vector<8x128xbf16>, vector<128x384xbf16>, vector<8x384xf32> -> vector<8x384xf32>
    %506 = arith.addf %504, %505 : vector<8x384xf32>
    %507 = arith.negf %506 : vector<8x384xf32>
    %508 = math.exp %507 : vector<8x384xf32>
    %cst_173 = arith.constant 1.000000e+00 : f32
    %509 = vector.broadcast %cst_173 : f32 to vector<8x384xf32>
    %510 = arith.addf %509, %508 : vector<8x384xf32>
    %511 = arith.divf %509, %510 : vector<8x384xf32>
    %512 = vector.extract_strided_slice %511 {offsets = [0, 0], sizes = [8, 128], strides = [1, 1]} : vector<8x384xf32> to vector<8x128xf32>
    %513 = vector.extract_strided_slice %511 {offsets = [0, 128], sizes = [8, 128], strides = [1, 1]} : vector<8x384xf32> to vector<8x128xf32>
    %514 = vector.extract_strided_slice %511 {offsets = [0, 256], sizes = [8, 128], strides = [1, 1]} : vector<8x384xf32> to vector<8x128xf32>
    %515 = arith.mulf %513, %493 : vector<8x128xf32>
    %516 = arith.mulf %512, %503 : vector<8x128xf32>
    %517 = arith.addf %515, %516 : vector<8x128xf32>
    %518 = math.tanh %517 : vector<8x128xf32>
    %519 = arith.mulf %514, %518 : vector<8x128xf32>
    %c2_i32_174 = arith.constant 2 : i32
    %520 = arith.truncf %519 : vector<8x128xf32> to vector<8x128xbf16>
    %521 = arith.index_cast %c2_i32_174 : i32 to index
    %c0_175 = arith.constant 0 : index
    %c0_176 = arith.constant 0 : index
    %522 = vector.load %arg13[%521, %c0_175, %c0_176] : memref<8x8x512xf32, #tpu.memory_space<vmem>>, vector<1x8x512xf32>
    %523 = vector.shape_cast %522 : vector<1x8x512xf32> to vector<8x512xf32>
    %524 = vector.extract_strided_slice %523 {offsets = [0, 0], sizes = [8, 128], strides = [1, 1]} : vector<8x512xf32> to vector<8x128xf32>
    %cst_177 = arith.constant dense<0.000000e+00> : vector<8x128xf32>
    %525 = tpu.matmul %520, %479, %cst_177 {dimension_numbers = #tpu.dot_dimension_numbers<[1], [0], [0], [1], [0, 0, 1, 1], [], []>} : vector<8x128xbf16>, vector<128x128xbf16>, vector<8x128xf32> -> vector<8x128xf32>
    %526 = arith.addf %524, %525 : vector<8x128xf32>
    %527 = math.tanh %526 : vector<8x128xf32>
    %528 = vector.extract_strided_slice %523 {offsets = [0, 128], sizes = [8, 384], strides = [1, 1]} : vector<8x512xf32> to vector<8x384xf32>
    %cst_178 = arith.constant dense<0.000000e+00> : vector<8x384xf32>
    %529 = tpu.matmul %520, %480, %cst_178 {dimension_numbers = #tpu.dot_dimension_numbers<[1], [0], [0], [1], [0, 0, 1, 1], [], []>} : vector<8x128xbf16>, vector<128x384xbf16>, vector<8x384xf32> -> vector<8x384xf32>
    %530 = arith.addf %528, %529 : vector<8x384xf32>
    %531 = arith.negf %530 : vector<8x384xf32>
    %532 = math.exp %531 : vector<8x384xf32>
    %cst_179 = arith.constant 1.000000e+00 : f32
    %533 = vector.broadcast %cst_179 : f32 to vector<8x384xf32>
    %534 = arith.addf %533, %532 : vector<8x384xf32>
    %535 = arith.divf %533, %534 : vector<8x384xf32>
    %536 = vector.extract_strided_slice %535 {offsets = [0, 0], sizes = [8, 128], strides = [1, 1]} : vector<8x384xf32> to vector<8x128xf32>
    %537 = vector.extract_strided_slice %535 {offsets = [0, 128], sizes = [8, 128], strides = [1, 1]} : vector<8x384xf32> to vector<8x128xf32>
    %538 = vector.extract_strided_slice %535 {offsets = [0, 256], sizes = [8, 128], strides = [1, 1]} : vector<8x384xf32> to vector<8x128xf32>
    %539 = arith.mulf %537, %517 : vector<8x128xf32>
    %540 = arith.mulf %536, %527 : vector<8x128xf32>
    %541 = arith.addf %539, %540 : vector<8x128xf32>
    %542 = math.tanh %541 : vector<8x128xf32>
    %543 = arith.mulf %538, %542 : vector<8x128xf32>
    %c3_i32_180 = arith.constant 3 : i32
    %544 = arith.truncf %543 : vector<8x128xf32> to vector<8x128xbf16>
    %545 = arith.index_cast %c3_i32_180 : i32 to index
    %c0_181 = arith.constant 0 : index
    %c0_182 = arith.constant 0 : index
    %546 = vector.load %arg13[%545, %c0_181, %c0_182] : memref<8x8x512xf32, #tpu.memory_space<vmem>>, vector<1x8x512xf32>
    %547 = vector.shape_cast %546 : vector<1x8x512xf32> to vector<8x512xf32>
    %548 = vector.extract_strided_slice %547 {offsets = [0, 0], sizes = [8, 128], strides = [1, 1]} : vector<8x512xf32> to vector<8x128xf32>
    %cst_183 = arith.constant dense<0.000000e+00> : vector<8x128xf32>
    %549 = tpu.matmul %544, %479, %cst_183 {dimension_numbers = #tpu.dot_dimension_numbers<[1], [0], [0], [1], [0, 0, 1, 1], [], []>} : vector<8x128xbf16>, vector<128x128xbf16>, vector<8x128xf32> -> vector<8x128xf32>
    %550 = arith.addf %548, %549 : vector<8x128xf32>
    %551 = math.tanh %550 : vector<8x128xf32>
    %552 = vector.extract_strided_slice %547 {offsets = [0, 128], sizes = [8, 384], strides = [1, 1]} : vector<8x512xf32> to vector<8x384xf32>
    %cst_184 = arith.constant dense<0.000000e+00> : vector<8x384xf32>
    %553 = tpu.matmul %544, %480, %cst_184 {dimension_numbers = #tpu.dot_dimension_numbers<[1], [0], [0], [1], [0, 0, 1, 1], [], []>} : vector<8x128xbf16>, vector<128x384xbf16>, vector<8x384xf32> -> vector<8x384xf32>
    %554 = arith.addf %552, %553 : vector<8x384xf32>
    %555 = arith.negf %554 : vector<8x384xf32>
    %556 = math.exp %555 : vector<8x384xf32>
    %cst_185 = arith.constant 1.000000e+00 : f32
    %557 = vector.broadcast %cst_185 : f32 to vector<8x384xf32>
    %558 = arith.addf %557, %556 : vector<8x384xf32>
    %559 = arith.divf %557, %558 : vector<8x384xf32>
    %560 = vector.extract_strided_slice %559 {offsets = [0, 0], sizes = [8, 128], strides = [1, 1]} : vector<8x384xf32> to vector<8x128xf32>
    %561 = vector.extract_strided_slice %559 {offsets = [0, 128], sizes = [8, 128], strides = [1, 1]} : vector<8x384xf32> to vector<8x128xf32>
    %562 = vector.extract_strided_slice %559 {offsets = [0, 256], sizes = [8, 128], strides = [1, 1]} : vector<8x384xf32> to vector<8x128xf32>
    %563 = arith.mulf %561, %541 : vector<8x128xf32>
    %564 = arith.mulf %560, %551 : vector<8x128xf32>
    %565 = arith.addf %563, %564 : vector<8x128xf32>
    %566 = math.tanh %565 : vector<8x128xf32>
    %567 = arith.mulf %562, %566 : vector<8x128xf32>
    %c4_i32_186 = arith.constant 4 : i32
    %568 = arith.truncf %567 : vector<8x128xf32> to vector<8x128xbf16>
    %569 = arith.index_cast %c4_i32_186 : i32 to index
    %c0_187 = arith.constant 0 : index
    %c0_188 = arith.constant 0 : index
    %570 = vector.load %arg13[%569, %c0_187, %c0_188] : memref<8x8x512xf32, #tpu.memory_space<vmem>>, vector<1x8x512xf32>
    %571 = vector.shape_cast %570 : vector<1x8x512xf32> to vector<8x512xf32>
    %572 = vector.extract_strided_slice %571 {offsets = [0, 0], sizes = [8, 128], strides = [1, 1]} : vector<8x512xf32> to vector<8x128xf32>
    %cst_189 = arith.constant dense<0.000000e+00> : vector<8x128xf32>
    %573 = tpu.matmul %568, %479, %cst_189 {dimension_numbers = #tpu.dot_dimension_numbers<[1], [0], [0], [1], [0, 0, 1, 1], [], []>} : vector<8x128xbf16>, vector<128x128xbf16>, vector<8x128xf32> -> vector<8x128xf32>
    %574 = arith.addf %572, %573 : vector<8x128xf32>
    %575 = math.tanh %574 : vector<8x128xf32>
    %576 = vector.extract_strided_slice %571 {offsets = [0, 128], sizes = [8, 384], strides = [1, 1]} : vector<8x512xf32> to vector<8x384xf32>
    %cst_190 = arith.constant dense<0.000000e+00> : vector<8x384xf32>
    %577 = tpu.matmul %568, %480, %cst_190 {dimension_numbers = #tpu.dot_dimension_numbers<[1], [0], [0], [1], [0, 0, 1, 1], [], []>} : vector<8x128xbf16>, vector<128x384xbf16>, vector<8x384xf32> -> vector<8x384xf32>
    %578 = arith.addf %576, %577 : vector<8x384xf32>
    %579 = arith.negf %578 : vector<8x384xf32>
    %580 = math.exp %579 : vector<8x384xf32>
    %cst_191 = arith.constant 1.000000e+00 : f32
    %581 = vector.broadcast %cst_191 : f32 to vector<8x384xf32>
    %582 = arith.addf %581, %580 : vector<8x384xf32>
    %583 = arith.divf %581, %582 : vector<8x384xf32>
    %584 = vector.extract_strided_slice %583 {offsets = [0, 0], sizes = [8, 128], strides = [1, 1]} : vector<8x384xf32> to vector<8x128xf32>
    %585 = vector.extract_strided_slice %583 {offsets = [0, 128], sizes = [8, 128], strides = [1, 1]} : vector<8x384xf32> to vector<8x128xf32>
    %586 = vector.extract_strided_slice %583 {offsets = [0, 256], sizes = [8, 128], strides = [1, 1]} : vector<8x384xf32> to vector<8x128xf32>
    %587 = arith.mulf %585, %565 : vector<8x128xf32>
    %588 = arith.mulf %584, %575 : vector<8x128xf32>
    %589 = arith.addf %587, %588 : vector<8x128xf32>
    %590 = math.tanh %589 : vector<8x128xf32>
    %591 = arith.mulf %586, %590 : vector<8x128xf32>
    %c5_i32_192 = arith.constant 5 : i32
    %592 = arith.truncf %591 : vector<8x128xf32> to vector<8x128xbf16>
    %593 = arith.index_cast %c5_i32_192 : i32 to index
    %c0_193 = arith.constant 0 : index
    %c0_194 = arith.constant 0 : index
    %594 = vector.load %arg13[%593, %c0_193, %c0_194] : memref<8x8x512xf32, #tpu.memory_space<vmem>>, vector<1x8x512xf32>
    %595 = vector.shape_cast %594 : vector<1x8x512xf32> to vector<8x512xf32>
    %596 = vector.extract_strided_slice %595 {offsets = [0, 0], sizes = [8, 128], strides = [1, 1]} : vector<8x512xf32> to vector<8x128xf32>
    %cst_195 = arith.constant dense<0.000000e+00> : vector<8x128xf32>
    %597 = tpu.matmul %592, %479, %cst_195 {dimension_numbers = #tpu.dot_dimension_numbers<[1], [0], [0], [1], [0, 0, 1, 1], [], []>} : vector<8x128xbf16>, vector<128x128xbf16>, vector<8x128xf32> -> vector<8x128xf32>
    %598 = arith.addf %596, %597 : vector<8x128xf32>
    %599 = math.tanh %598 : vector<8x128xf32>
    %600 = vector.extract_strided_slice %595 {offsets = [0, 128], sizes = [8, 384], strides = [1, 1]} : vector<8x512xf32> to vector<8x384xf32>
    %cst_196 = arith.constant dense<0.000000e+00> : vector<8x384xf32>
    %601 = tpu.matmul %592, %480, %cst_196 {dimension_numbers = #tpu.dot_dimension_numbers<[1], [0], [0], [1], [0, 0, 1, 1], [], []>} : vector<8x128xbf16>, vector<128x384xbf16>, vector<8x384xf32> -> vector<8x384xf32>
    %602 = arith.addf %600, %601 : vector<8x384xf32>
    %603 = arith.negf %602 : vector<8x384xf32>
    %604 = math.exp %603 : vector<8x384xf32>
    %cst_197 = arith.constant 1.000000e+00 : f32
    %605 = vector.broadcast %cst_197 : f32 to vector<8x384xf32>
    %606 = arith.addf %605, %604 : vector<8x384xf32>
    %607 = arith.divf %605, %606 : vector<8x384xf32>
    %608 = vector.extract_strided_slice %607 {offsets = [0, 0], sizes = [8, 128], strides = [1, 1]} : vector<8x384xf32> to vector<8x128xf32>
    %609 = vector.extract_strided_slice %607 {offsets = [0, 128], sizes = [8, 128], strides = [1, 1]} : vector<8x384xf32> to vector<8x128xf32>
    %610 = vector.extract_strided_slice %607 {offsets = [0, 256], sizes = [8, 128], strides = [1, 1]} : vector<8x384xf32> to vector<8x128xf32>
    %611 = arith.mulf %609, %589 : vector<8x128xf32>
    %612 = arith.mulf %608, %599 : vector<8x128xf32>
    %613 = arith.addf %611, %612 : vector<8x128xf32>
    %614 = math.tanh %613 : vector<8x128xf32>
    %615 = arith.mulf %610, %614 : vector<8x128xf32>
    %c6_i32_198 = arith.constant 6 : i32
    %616 = arith.truncf %615 : vector<8x128xf32> to vector<8x128xbf16>
    %617 = arith.index_cast %c6_i32_198 : i32 to index
    %c0_199 = arith.constant 0 : index
    %c0_200 = arith.constant 0 : index
    %618 = vector.load %arg13[%617, %c0_199, %c0_200] : memref<8x8x512xf32, #tpu.memory_space<vmem>>, vector<1x8x512xf32>
    %619 = vector.shape_cast %618 : vector<1x8x512xf32> to vector<8x512xf32>
    %620 = vector.extract_strided_slice %619 {offsets = [0, 0], sizes = [8, 128], strides = [1, 1]} : vector<8x512xf32> to vector<8x128xf32>
    %cst_201 = arith.constant dense<0.000000e+00> : vector<8x128xf32>
    %621 = tpu.matmul %616, %479, %cst_201 {dimension_numbers = #tpu.dot_dimension_numbers<[1], [0], [0], [1], [0, 0, 1, 1], [], []>} : vector<8x128xbf16>, vector<128x128xbf16>, vector<8x128xf32> -> vector<8x128xf32>
    %622 = arith.addf %620, %621 : vector<8x128xf32>
    %623 = math.tanh %622 : vector<8x128xf32>
    %624 = vector.extract_strided_slice %619 {offsets = [0, 128], sizes = [8, 384], strides = [1, 1]} : vector<8x512xf32> to vector<8x384xf32>
    %cst_202 = arith.constant dense<0.000000e+00> : vector<8x384xf32>
    %625 = tpu.matmul %616, %480, %cst_202 {dimension_numbers = #tpu.dot_dimension_numbers<[1], [0], [0], [1], [0, 0, 1, 1], [], []>} : vector<8x128xbf16>, vector<128x384xbf16>, vector<8x384xf32> -> vector<8x384xf32>
    %626 = arith.addf %624, %625 : vector<8x384xf32>
    %627 = arith.negf %626 : vector<8x384xf32>
    %628 = math.exp %627 : vector<8x384xf32>
    %cst_203 = arith.constant 1.000000e+00 : f32
    %629 = vector.broadcast %cst_203 : f32 to vector<8x384xf32>
    %630 = arith.addf %629, %628 : vector<8x384xf32>
    %631 = arith.divf %629, %630 : vector<8x384xf32>
    %632 = vector.extract_strided_slice %631 {offsets = [0, 0], sizes = [8, 128], strides = [1, 1]} : vector<8x384xf32> to vector<8x128xf32>
    %633 = vector.extract_strided_slice %631 {offsets = [0, 128], sizes = [8, 128], strides = [1, 1]} : vector<8x384xf32> to vector<8x128xf32>
    %634 = vector.extract_strided_slice %631 {offsets = [0, 256], sizes = [8, 128], strides = [1, 1]} : vector<8x384xf32> to vector<8x128xf32>
    %635 = arith.mulf %633, %613 : vector<8x128xf32>
    %636 = arith.mulf %632, %623 : vector<8x128xf32>
    %637 = arith.addf %635, %636 : vector<8x128xf32>
    %638 = math.tanh %637 : vector<8x128xf32>
    %639 = arith.mulf %634, %638 : vector<8x128xf32>
    %c7_i32_204 = arith.constant 7 : i32
    %640 = arith.truncf %639 : vector<8x128xf32> to vector<8x128xbf16>
    %641 = arith.index_cast %c7_i32_204 : i32 to index
    %c0_205 = arith.constant 0 : index
    %c0_206 = arith.constant 0 : index
    %642 = vector.load %arg13[%641, %c0_205, %c0_206] : memref<8x8x512xf32, #tpu.memory_space<vmem>>, vector<1x8x512xf32>
    %643 = vector.shape_cast %642 : vector<1x8x512xf32> to vector<8x512xf32>
    %644 = vector.extract_strided_slice %643 {offsets = [0, 0], sizes = [8, 128], strides = [1, 1]} : vector<8x512xf32> to vector<8x128xf32>
    %cst_207 = arith.constant dense<0.000000e+00> : vector<8x128xf32>
    %645 = tpu.matmul %640, %479, %cst_207 {dimension_numbers = #tpu.dot_dimension_numbers<[1], [0], [0], [1], [0, 0, 1, 1], [], []>} : vector<8x128xbf16>, vector<128x128xbf16>, vector<8x128xf32> -> vector<8x128xf32>
    %646 = arith.addf %644, %645 : vector<8x128xf32>
    %647 = math.tanh %646 : vector<8x128xf32>
    %648 = vector.extract_strided_slice %643 {offsets = [0, 128], sizes = [8, 384], strides = [1, 1]} : vector<8x512xf32> to vector<8x384xf32>
    %cst_208 = arith.constant dense<0.000000e+00> : vector<8x384xf32>
    %649 = tpu.matmul %640, %480, %cst_208 {dimension_numbers = #tpu.dot_dimension_numbers<[1], [0], [0], [1], [0, 0, 1, 1], [], []>} : vector<8x128xbf16>, vector<128x384xbf16>, vector<8x384xf32> -> vector<8x384xf32>
    %650 = arith.addf %648, %649 : vector<8x384xf32>
    %651 = arith.negf %650 : vector<8x384xf32>
    %652 = math.exp %651 : vector<8x384xf32>
    %cst_209 = arith.constant 1.000000e+00 : f32
    %653 = vector.broadcast %cst_209 : f32 to vector<8x384xf32>
    %654 = arith.addf %653, %652 : vector<8x384xf32>
    %655 = arith.divf %653, %654 : vector<8x384xf32>
    %656 = vector.extract_strided_slice %655 {offsets = [0, 0], sizes = [8, 128], strides = [1, 1]} : vector<8x384xf32> to vector<8x128xf32>
    %657 = vector.extract_strided_slice %655 {offsets = [0, 128], sizes = [8, 128], strides = [1, 1]} : vector<8x384xf32> to vector<8x128xf32>
    %658 = vector.extract_strided_slice %655 {offsets = [0, 256], sizes = [8, 128], strides = [1, 1]} : vector<8x384xf32> to vector<8x128xf32>
    %659 = arith.mulf %657, %637 : vector<8x128xf32>
    %660 = arith.mulf %656, %647 : vector<8x128xf32>
    %661 = arith.addf %659, %660 : vector<8x128xf32>
    %662 = math.tanh %661 : vector<8x128xf32>
    %663 = arith.mulf %658, %662 : vector<8x128xf32>
    %c7_i32_210 = arith.constant 7 : i32
    %664 = arith.truncf %663 : vector<8x128xf32> to vector<8x128xbf16>
    %c0_211 = arith.constant 0 : index
    %c0_212 = arith.constant 0 : index
    %665 = vector.load %arg10[%c0_211, %c0_212] : memref<128x128xbf16, #tpu.memory_space<vmem>>, vector<128x128xbf16>
    %cst_213 = arith.constant dense<0.000000e+00> : vector<8x128xf32>
    %666 = tpu.matmul %664, %665, %cst_213 {dimension_numbers = #tpu.dot_dimension_numbers<[1], [0], [0], [1], [0, 0, 1, 1], [], []>} : vector<8x128xbf16>, vector<128x128xbf16>, vector<8x128xf32> -> vector<8x128xf32>
    %c0_214 = arith.constant 0 : index
    %c0_215 = arith.constant 0 : index
    %667 = vector.load %arg11[%c0_214, %c0_215] : memref<1x128xf32, #tpu.memory_space<vmem>>, vector<1x128xf32>
    %668 = vector.broadcast %667 : vector<1x128xf32> to vector<8x128xf32>
    %669 = arith.addf %666, %668 : vector<8x128xf32>
    %c0_216 = arith.constant 0 : index
    %c0_217 = arith.constant 0 : index
    %670 = vector.load %arg12[%c0_216, %c0_217] : memref<8x128xf32, #tpu.memory_space<vmem>>, vector<8x128xf32>
    tpu.vector_store %arg12[%c0_216, %c0_217], %669 {strides = array<i32>} : memref<8x128xf32, #tpu.memory_space<vmem>>, vector<8x128xf32>,
    return
  }
}

</mosaic_0001>

<bundles_post_ra>
// kernel: lstm_forward.1
= control target key start
LH: loop header
LB: loop body
LE: loop exit
PB: predicated region body
PF: predicated region fallthrough
CT: control target
= control target key end

     0   :  { %17 = vsyncpa [#allocation10], 0  ;;  %s9234_s0 = inlined_call_operand.vmem [shape: bf16[64,128], index: 0, kind: input, shape index: {}]   ;;  %s9235_s1 = inlined_call_operand.hbm [shape: bf16[128,512], index: 1, kind: input, shape index: {}]   ;;  %s9236_s2 = inlined_call_operand.hbm [shape: bf16[128,512], index: 2, kind: input, shape index: {}]   ;;  %s9237_s3 = inlined_call_operand.vmem [shape: f32[1,512], index: 3, kind: input, shape index: {}]   ;;  %s9238_s4 = inlined_call_operand.hbm [shape: bf16[128,512], index: 4, kind: input, shape index: {}]   ;;  %s9239_s5 = inlined_call_operand.hbm [shape: bf16[128,512], index: 5, kind: input, shape index: {}]   ;;  %s9240_s6 = inlined_call_operand.vmem [shape: f32[1,512], index: 6, kind: input, shape index: {}]   ;;  %s9241_s7 = inlined_call_operand.hbm [shape: bf16[128,512], index: 7, kind: input, shape index: {}]   ;;  %s9242_s8 = inlined_call_operand.hbm [shape: bf16[128,512], index: 8, kind: input, shape index: {}]   ;;  %s9243_s9 = inlined_call_operand.vmem [shape: f32[1,512], index: 9, kind: input, shape index: {}]   ;;  %s9244_s10 = inlined_call_operand.vmem [shape: bf16[128,128], index: 10, kind: input, shape index: {}]   ;;  %s9245_s11 = inlined_call_operand.vmem [shape: f32[1,128], index: 11, kind: input, shape index: {}]   ;;  %s9246_s12 = inlined_call_operand.vmem [shape: f32[8,128], index: 12, kind: output, shape index: {}]  }
   0x1   :  { %18 = vsyncpa [#allocation12], 0  ;;  %s6908_s21 = smov [#allocation9]   ;;  %s6852_s25 = scalar_lea.hbm %s9235_s1, 4096 }
   0x2   :  { %s26_s22 = sshll.u32 %s6908_s21, 4  ;;  %p6853_p0 = scmp.ne.s32.totalorder %s9235_s1, %s6852_s25  ;;  %s27_s22 = int_to_ptr.vmem [resolvable:$true] %s26_s22 }
   0x3   :  { %p6856_p1 = scmp.lt.u32.totalorder %s6852_s25, %s9235_s1 }
   0x5   :  { %p6858_p2 = pnand %p6856_p1, %p6853_p0 }
   0x7   :  { %6861 = shalt.err (!%p6858_p2)
}
   0x8   :  { %s6862_s30 = scalar_lea.vmem %s27_s22, 4096  ;;  %p6867_p4 = scmp.lt.s32.totalorder %s27_s22, %s27_s22 }
   0x9   :  { %p6863_p3 = scmp.ne.s32.totalorder %s27_s22, %s6862_s30  ;;  %p6868_p5 = scmp.lt.s32.totalorder %s6862_s30, %s6862_s30 }
   0xb   :  { %p6869_p6 = por %p6868_p5, %p6867_p4 }
   0xd   :  { %p6870_p7 = pnand %p6869_p6, %p6863_p3 }
   0xf   :  { %6873 = shalt.err (!%p6870_p7)
}
  0x10   :  { %s6909_s13 = smov 256   ;;  %s6910_s14 = smov 16  }
  0x11   :  { %32 = dma.hbm_to_vmem [thread:$0]  %s9235_s1, 4096, %s27_s22, [#allocation10], %s6909_s13, %s6909_s13, %s6910_s14  }
  0x12   :  { %s6911_s17 = smov [#allocation11]   ;;  %s6874_s21 = scalar_lea.hbm %s9236_s2, 4096 }
  0x13   :  { %s38_s18 = sshll.u32 %s6911_s17, 4  ;;  %p6875_p8 = scmp.ne.s32.totalorder %s9236_s2, %s6874_s21  ;;  %s39_s18 = int_to_ptr.vmem [resolvable:$true] %s38_s18 }
  0x14   :  { %p6878_p9 = scmp.lt.u32.totalorder %s6874_s21, %s9236_s2 }
  0x16   :  { %p6880_p10 = pnand %p6878_p9, %p6875_p8 }
  0x18   :  { %6883 = shalt.err (!%p6880_p10)
}
  0x19   :  { %s6884_s27 = scalar_lea.vmem %s39_s18, 4096  ;;  %p6889_p12 = scmp.lt.s32.totalorder %s39_s18, %s39_s18 }
  0x1a   :  { %p6885_p11 = scmp.ne.s32.totalorder %s39_s18, %s6884_s27  ;;  %p6890_p13 = scmp.lt.s32.totalorder %s6884_s27, %s6884_s27 }
  0x1c   :  { %p6891_p0 = por %p6890_p13, %p6889_p12 }
  0x1e   :  { %p6892_p1 = pnand %p6891_p0, %p6885_p11 }
  0x20   :  { %6895 = shalt.err (!%p6892_p1)
}
  0x21   :  { %44 = dma.hbm_to_vmem [thread:$0]  %s9236_s2, 4096, %s39_s18, [#allocation12], %s6909_s13, %s6909_s13, %s6910_s14  }
  0x22   :  { %6896 = dma.done.wait [#allocation10], 4096  }
  0x23   :  { %6897 = vsyncadd [#allocation10], 4294963200 }
  0x24   :  { %6898 = dma.done.wait [#allocation12], 4096  }
  0x25   :  { %6899 = vsyncadd [#allocation12], 4294963200  ;;  %s66_s28 = sld [smem:[#allocation0]]   ;;  %s6912_s29 = smov 512   ;;  %v9247_v0 = vmov 0   ;;  %v9251_v36 = vmov 0.0   ;;  %v244_v62 = vlaneseq }
  0x26   :  { %78 = sst [smem:[#allocation14]] %s6912_s29  ;;  %480 = vmatprep.mubr.bf16.mxu0 %v9247_v0  ;;  %553 = vmatprep.mubr.bf16.mxu1 %v9247_v0  ;;  %s6914_s30 = smov 4   ;;  %vm6931_vm0 = vmmov 0  }
  0x27   :  { %80 = sst [smem:[#allocation14 + $0x1]] %s6912_s29  ;;  %s6915_s15 = smov 64   ;;  %v7184_v63 = vshrl.u32 %v244_v62, 7 }
  0x28   :  { %82 = sst [smem:[#allocation14 + $0x2]] %s6914_s30  ;;  %s6916_s2 = smov [#allocation4]  }
  0x29   :  { %84 = sst [smem:[#allocation14 + $0x3]] %s6915_s15  ;;  %s74_s14 = sshll.u32 %s6916_s2, 4  ;;  %s75_s14 = int_to_ptr.vmem [resolvable:$true] %s74_s14 }
  0x2a   :  { %90 = sst [smem:[#allocation14 + $0x6]] %s6909_s13  ;;  %s6917_s18 = smov 128  }
  0x2b   :  { %92 = sst [smem:[#allocation14 + $0x7]] %s6915_s15  ;;  %s4847_s16 = sshll.u32 %s66_s28, 26 }
  0x2c   :  { %94 = sst [smem:[#allocation14 + $0x8]] %s6914_s30  ;;  %s7034_s17 = sadd.s32 134217728, %s4847_s16 }
  0x2d   :  { %86 = sst [smem:[#allocation14 + $0x4]] %s6917_s18  ;;  %s6918_s19 = smov 2  }
  0x2e   :  { %88 = sst [smem:[#allocation14 + $0x5]] %s6918_s19  ;;  %s6919_s20 = smov [#allocation8]  }
  0x2f   :  { %s6920_s21 = smov [#allocation13]   ;;  %s6921_s25 = smov [#allocation5]  }
  0x30   :  { %96 = dma.general %s9238_s4, 4096, %s75_s14, %s6919_s20, %s6920_s21, [#allocation14], %s7034_s17, 0  }
  0x31   :  { %113 = sst [smem:[#allocation16]] %s6912_s29  ;;  %s109_s26 = sshll.u32 %s6921_s25, 4  ;;  %s110_s26 = int_to_ptr.vmem [resolvable:$true] %s109_s26 }
  0x32   :  { %115 = sst [smem:[#allocation16 + $0x1]] %s6912_s29  ;;  %s6922_s4 = smov [#allocation8 + $0x1]  }
  0x33   :  { %117 = sst [smem:[#allocation16 + $0x2]] %s6914_s30  ;;  %s6923_s27 = smov [#allocation15]  }
  0x34   :  { %119 = sst [smem:[#allocation16 + $0x3]] %s6915_s15  ;;  %s6924_s28 = smov [#allocation6]  }
  0x35   :  { %121 = sst [smem:[#allocation16 + $0x4]] %s6917_s18  ;;  %s144_s2 = sshll.u32 %s6924_s28, 4  ;;  %s145_s2 = int_to_ptr.vmem [resolvable:$true] %s144_s2 }
  0x36   :  { %123 = sst [smem:[#allocation16 + $0x5]] %s6918_s19  ;;  %s6926_s14 = smov [#allocation17]  }
  0x37   :  { %125 = sst [smem:[#allocation16 + $0x6]] %s6909_s13  ;;  %s6927_s21 = smov [#allocation7]  }
  0x38   :  { %127 = sst [smem:[#allocation16 + $0x7]] %s6915_s15  ;;  %s179_s23 = sshll.u32 %s6927_s21, 4  ;;  %s180_s23 = int_to_ptr.vmem [resolvable:$true] %s179_s23 }
  0x39   :  { %129 = sst [smem:[#allocation16 + $0x8]] %s6914_s30  ;;  %s6929_s24 = smov [#allocation19]  }
  0x3a   :  { %131 = dma.general %s9239_s5, 4096, %s110_s26, %s6922_s4, %s6923_s27, [#allocation16], %s7034_s17, 0  }
  0x3b   :  { %148 = sst [smem:[#allocation18]] %s6912_s29  ;;  %s6925_s5 = smov [#allocation8 + $0x2]  }
  0x3c   :  { %150 = sst [smem:[#allocation18 + $0x1]] %s6912_s29 }
  0x3d   :  { %152 = sst [smem:[#allocation18 + $0x2]] %s6914_s30 }
  0x3e   :  { %154 = sst [smem:[#allocation18 + $0x3]] %s6915_s15 }
  0x3f   :  { %156 = sst [smem:[#allocation18 + $0x4]] %s6917_s18 }
  0x40   :  { %158 = sst [smem:[#allocation18 + $0x5]] %s6918_s19 }
  0x41   :  { %160 = sst [smem:[#allocation18 + $0x6]] %s6909_s13 }
  0x42   :  { %162 = sst [smem:[#allocation18 + $0x7]] %s6915_s15 }
  0x43   :  { %164 = sst [smem:[#allocation18 + $0x8]] %s6914_s30 }
  0x44   :  { %166 = dma.general %s9241_s7, 4096, %s145_s2, %s6925_s5, %s6926_s14, [#allocation18], %s7034_s17, 0  }
  0x45   :  { %183 = sst [smem:[#allocation20]] %s6912_s29  ;;  %s6928_s7 = smov [#allocation8 + $0x3]  }
  0x46   :  { %185 = sst [smem:[#allocation20 + $0x1]] %s6912_s29 }
  0x47   :  { %187 = sst [smem:[#allocation20 + $0x2]] %s6914_s30 }
  0x48   :  { %189 = sst [smem:[#allocation20 + $0x3]] %s6915_s15 }
  0x49   :  { %191 = sst [smem:[#allocation20 + $0x4]] %s6917_s18 }
  0x4a   :  { %193 = sst [smem:[#allocation20 + $0x5]] %s6918_s19 }
  0x4b   :  { %195 = sst [smem:[#allocation20 + $0x6]] %s6909_s13 }
  0x4c   :  { %197 = sst [smem:[#allocation20 + $0x7]] %s6915_s15 }
  0x4d   :  { %199 = sst [smem:[#allocation20 + $0x8]] %s6914_s30 }
  0x4e   :  { %201 = dma.general %s9242_s8, 4096, %s180_s23, %s6928_s7, %s6929_s24, [#allocation20], %s7034_s17, 0  }
  0x4f   :  { %v6276_v1 = vld [vmem:[#allocation9 + $0x4] ss:$16 sps:$4 sm:$0xff]   ;;  %v6278_v2 = vld [vmem:[#allocation9] ss:$16 sps:$4 sm:$0xff]   ;;  %v6285_v6 = vld [vmem:[#allocation9 + $0xc] ss:$16 sps:$4 sm:$0xff]  }
  0x50   :  { %448 = vmatprep.subr.bf16.mxu0 %v6276_v1  ;;  %v6279_v3 = vld [vmem:[#allocation9 + $0x24] ss:$16 sps:$4 sm:$0xff]   ;;  %v6281_v4 = vld [vmem:[#allocation9 + $0x20] ss:$16 sps:$4 sm:$0xff]   ;;  %v6287_v7 = vld [vmem:[#allocation9 + $0x8] ss:$16 sps:$4 sm:$0xff]   ;;  %521 = vmatprep.subr.bf16.mxu1 %v6285_v6 }
  0x51   :  { %449 = vmatpush1.bf16.msra.mxu0 %v6278_v2  ;;  %v6282_v5 = vld [vmem:[#allocation9 + $0x44] ss:$16 sps:$4 sm:$0xff]   ;;  %v6284_v8 = vld [vmem:[#allocation9 + $0x40] ss:$16 sps:$4 sm:$0xff]   ;;  %522 = vmatpush1.bf16.msra.mxu1 %v6287_v7  ;;  %v6291_v9 = vld [vmem:[#allocation9 + $0x2c] ss:$16 sps:$4 sm:$0xff]  }
  0x52   :  { %450 = vmatprep.subr.bf16.mxu0 %v6279_v3  ;;  %v6293_v10 = vld [vmem:[#allocation9 + $0x28] ss:$16 sps:$4 sm:$0xff]   ;;  %v6288_v11 = vld [vmem:[#allocation9 + $0x64] ss:$16 sps:$4 sm:$0xff]   ;;  %523 = vmatprep.subr.bf16.mxu1 %v6291_v9  ;;  %v6290_v12 = vld [vmem:[#allocation9 + $0x60] ss:$16 sps:$4 sm:$0xff]  }
  0x53   :  { %v6297_v13 = vld [vmem:[#allocation9 + $0x4c] ss:$16 sps:$4 sm:$0xff]   ;;  %v6294_v14 = vld [vmem:[#allocation9 + $0x84] ss:$16 sps:$4 sm:$0xff]   ;;  %v6299_v15 = vld [vmem:[#allocation9 + $0x48] ss:$16 sps:$4 sm:$0xff]  }
  0x54   :  { %v6303_v16 = vld [vmem:[#allocation9 + $0x6c] ss:$16 sps:$4 sm:$0xff]   ;;  %v6296_v17 = vld [vmem:[#allocation9 + $0x80] ss:$16 sps:$4 sm:$0xff]   ;;  %v6300_v18 = vld [vmem:[#allocation9 + $0xa4] ss:$16 sps:$4 sm:$0xff]  }
  0x55   :  { %451 = vmatpush1.bf16.msra.mxu0 %v6281_v4  ;;  %524 = vmatpush1.bf16.msra.mxu1 %v6293_v10  ;;  %v6305_v19 = vld [vmem:[#allocation9 + $0x68] ss:$16 sps:$4 sm:$0xff]   ;;  %v6309_v20 = vld [vmem:[#allocation9 + $0x8c] ss:$16 sps:$4 sm:$0xff]   ;;  %v6302_v21 = vld [vmem:[#allocation9 + $0xa0] ss:$16 sps:$4 sm:$0xff]  }
  0x56   :  { %452 = vmatprep.subr.bf16.mxu0 %v6282_v5  ;;  %525 = vmatprep.subr.bf16.mxu1 %v6297_v13  ;;  %v6311_v22 = vld [vmem:[#allocation9 + $0x88] ss:$16 sps:$4 sm:$0xff]   ;;  %v6306_v23 = vld [vmem:[#allocation9 + $0xc4] ss:$16 sps:$4 sm:$0xff]   ;;  %v6315_v24 = vld [vmem:[#allocation9 + $0xac] ss:$16 sps:$4 sm:$0xff]  }
  0x57   :  { %v6308_v25 = vld [vmem:[#allocation9 + $0xc0] ss:$16 sps:$4 sm:$0xff]   ;;  %v6312_v26 = vld [vmem:[#allocation9 + $0xe4] ss:$16 sps:$4 sm:$0xff]   ;;  %v6317_v27 = vld [vmem:[#allocation9 + $0xa8] ss:$16 sps:$4 sm:$0xff]  }
  0x58   :  { %v6319_v28 = vld [vmem:[#allocation9 + $0xcc] ss:$16 sps:$4 sm:$0xff]   ;;  %v6314_v29 = vld [vmem:[#allocation9 + $0xe0] ss:$16 sps:$4 sm:$0xff]   ;;  %v6321_v30 = vld [vmem:[#allocation9 + $0xc8] ss:$16 sps:$4 sm:$0xff]  }
  0x59   :  { %453 = vmatpush1.bf16.msra.mxu0 %v6284_v8  ;;  %526 = vmatpush1.bf16.msra.mxu1 %v6299_v15  ;;  %v6322_v31 = vld [vmem:[#allocation9 + $0xec] ss:$16 sps:$4 sm:$0xff]   ;;  %v6318_v32 = vld [vmem:[%s9234_s0] sm:$0xff]   ;;  %v6324_v33 = vld [vmem:[#allocation9 + $0xe8] ss:$16 sps:$4 sm:$0xff]   ;;  %v7187_v1 = vsub.s32 1, %v7184_v63 }
  0x5a   :  { %454 = vmatprep.subr.bf16.mxu0 %v6288_v11  ;;  %527 = vmatprep.subr.bf16.mxu1 %v6303_v16  ;;  %v7086_v34 = vld [vmem:[#allocation11] ss:$16 sps:$4 sm:$0xff]   ;;  %v7088_v35 = vld [vmem:[#allocation11 + $0x8] ss:$16 sps:$4 sm:$0xff]   ;;  %v7091_v37 = vld [vmem:[#allocation11 + $0x4] ss:$16 sps:$4 sm:$0xff]  }
  0x5b   :  { %v7097_v38 = vld [vmem:[#allocation11 + $0x20] ss:$16 sps:$4 sm:$0xff]   ;;  %v7099_v39 = vld [vmem:[#allocation11 + $0x28] ss:$16 sps:$4 sm:$0xff]   ;;  %v7104_v41 = vld [vmem:[#allocation11 + $0x24] ss:$16 sps:$4 sm:$0xff]  }
  0x5c   :  { %v6334_v40 = vld [vmem:[%s9234_s0 + $0x8] sm:$0xff]   ;;  %v7110_v42 = vld [vmem:[#allocation11 + $0x40] ss:$16 sps:$4 sm:$0xff]   ;;  %v7114_v44 = vld [vmem:[#allocation11 + $0x44] ss:$16 sps:$4 sm:$0xff]   ;;  %9261 = vst [vmem:[#allocation27_spill] sm:$0xff] %v7187_v1 }
  0x5d   :  { %455 = vmatpush1.bf16.msra.mxu0 %v6290_v12  ;;  %528 = vmatpush1.bf16.msra.mxu1 %v6305_v19  ;;  %v7112_v43 = vld [vmem:[#allocation11 + $0x48] ss:$16 sps:$4 sm:$0xff]   ;;  %v7122_v45 = vld [vmem:[#allocation11 + $0x60] ss:$16 sps:$4 sm:$0xff]   ;;  %v7129_v48 = vld [vmem:[#allocation11 + $0x64] ss:$16 sps:$4 sm:$0xff]  }
  0x5e   :  { %456 = vmatprep.subr.bf16.mxu0 %v6294_v14  ;;  %529 = vmatprep.subr.bf16.mxu1 %v6309_v20  ;;  %v7124_v46 = vld [vmem:[#allocation11 + $0x68] ss:$16 sps:$4 sm:$0xff]   ;;  %v6345_v47 = vld [vmem:[%s9234_s0 + $0x10] sm:$0xff]   ;;  %v7192_v2 = vld [vmem:[%s9237_s3] sm:$0xf]  ;;  %v7199_v4 = vsub.s32 3, %v7184_v63 }
  0x5f   :  { %v7135_v49 = vld [vmem:[#allocation11 + $0x80] ss:$16 sps:$4 sm:$0xff]   ;;  %v7137_v50 = vld [vmem:[#allocation11 + $0x88] ss:$16 sps:$4 sm:$0xff]   ;;  %v7139_v51 = vld [vmem:[#allocation11 + $0x84] ss:$16 sps:$4 sm:$0xff]   ;;  %v7196_v3 = vrot.slane %v7192_v2, %v7187_v1 }
  0x60   :  { %v7147_v52 = vld [vmem:[#allocation11 + $0xa0] ss:$16 sps:$4 sm:$0xff]   ;;  %v7149_v53 = vld [vmem:[#allocation11 + $0xa8] ss:$16 sps:$4 sm:$0xff]   ;;  %v7154_v55 = vld [vmem:[#allocation11 + $0xa4] ss:$16 sps:$4 sm:$0xff]   ;;  %v7206_v9 = vrot.slane %v7192_v2, %v7199_v4 }
  0x61   :  { %457 = vmatpush1.bf16.msra.mxu0 %v6296_v17  ;;  %530 = vmatpush1.bf16.msra.mxu1 %v6311_v22  ;;  %v6356_v54 = vld [vmem:[%s9234_s0 + $0x18] sm:$0xff]   ;;  %v7160_v57 = vld [vmem:[#allocation11 + $0xc0] ss:$16 sps:$4 sm:$0xff]   ;;  %v7163_v58 = vld [vmem:[#allocation11 + $0xc4] ss:$16 sps:$4 sm:$0xff]   ;;  %9262 = vst [vmem:[#allocation28_spill] sm:$0xff] %v7199_v4 }
  0x62   :  { %458 = vmatprep.subr.bf16.mxu0 %v6300_v18  ;;  %531 = vmatprep.subr.bf16.mxu1 %v6315_v24  ;;  %v7157_v56 = vld [vmem:[#allocation11 + $0xc8] ss:$16 sps:$4 sm:$0xff]   ;;  %v7172_v60 = vld [vmem:[#allocation11 + $0xe0] ss:$16 sps:$4 sm:$0xff]   ;;  %v7177_v61 = vld [vmem:[#allocation11 + $0xe4] ss:$16 sps:$4 sm:$0xff]  }
  0x63   :  { %v7166_v59 = vld [vmem:[#allocation11 + $0xe8] ss:$16 sps:$4 sm:$0xff]   ;;  %v7211_v14 = vsub.s32 0, %v7184_v63  ;;  %v7261_v62 = vld [vmem:[#allocation11 + $0xac] ss:$16 sps:$4 sm:$0xff]  }
  0x65   :  { %459 = vmatpush1.bf16.msra.mxu0 %v6302_v21  ;;  %532 = vmatpush1.bf16.msra.mxu1 %v6317_v27  ;;  %9263 = vst [vmem:[#allocation29_spill] sm:$0xff] %v7211_v14  ;;  %v7220_v19 = vrot.slane %v7192_v2, %v7211_v14 }
  0x66   :  { %460 = vmatprep.subr.bf16.mxu0 %v6306_v23  ;;  %533 = vmatprep.subr.bf16.mxu1 %v6319_v28 }
  0x69   :  { %461 = vmatpush1.bf16.msra.mxu0 %v6308_v25  ;;  %534 = vmatpush1.bf16.msra.mxu1 %v6321_v30 }
  0x6a   :  { %462 = vmatprep.subr.bf16.mxu0 %v6312_v26  ;;  %535 = vmatprep.subr.bf16.mxu1 %v6322_v31  ;;  %v7228_v31 = vld [vmem:[#allocation11 + $0xc] ss:$16 sps:$4 sm:$0xff]  }
  0x6d   :  { %463 = vmatpush1.bf16.msra.mxu0 %v6314_v29  ;;  %536 = vmatpush1.bf16.msra.mxu1 %v6324_v33  ;;  %v7233_v33 = vld [vmem:[#allocation11 + $0x2c] ss:$16 sps:$4 sm:$0xff]  }
  0x6e   :  { %5392 = vmatprep.subr.bf16.mxu0 %v9251_v36  ;;  %886 = vmatprep.subr.bf16.mxu1 %v7088_v35 }
  0x70   :  { %481 = vmatmul.mubr.bf16.vlgmr.msra.gmra.mrb[0].mxu0 %v6318_v32  ;;  %554 = vmatmul.mubr.bf16.vlgmr.msra.gmra.mrb[0].mxu1 %v6318_v32 }
  0x71   :  { %490 = vmatprep.mubr.bf16.mxu0 %v9247_v0  ;;  %563 = vmatprep.mubr.bf16.mxu1 %v9247_v0 }
  0x72   :  { %5393 = vmatpush3.bf16.msra.mxu0 %v7086_v34  ;;  %887 = vmatpush1.bf16.msra.mxu1 %v7091_v37 }
  0x73   :  { %5394 = vmatprep.subr.bf16.mxu0 %v9251_v36  ;;  %888 = vmatprep.subr.bf16.mxu1 %v7099_v39 }
  0x76   :  { %5395 = vmatpush3.bf16.msra.mxu0 %v7097_v38  ;;  %889 = vmatpush1.bf16.msra.mxu1 %v7104_v41 }
  0x77   :  { %5396 = vmatprep.subr.bf16.mxu0 %v9251_v36  ;;  %890 = vmatprep.subr.bf16.mxu1 %v7112_v43 }
  0x78   :  { %491 = vmatmul.mubr.bf16.gmra.mrb[4].mxu0 %v6334_v40  ;;  %564 = vmatmul.mubr.bf16.gmra.mrb[4].mxu1 %v6334_v40  ;;  %v7243_v40 = vld [vmem:[#allocation11 + $0x4c] ss:$16 sps:$4 sm:$0xff]  }
  0x79   :  { %500 = vmatprep.mubr.bf16.mxu0 %v9247_v0  ;;  %573 = vmatprep.mubr.bf16.mxu1 %v9247_v0 }
  0x7a   :  { %5397 = vmatpush3.bf16.msra.mxu0 %v7110_v42  ;;  %891 = vmatpush1.bf16.msra.mxu1 %v7114_v44 }
  0x7b   :  { %5398 = vmatprep.subr.bf16.mxu0 %v9251_v36  ;;  %892 = vmatprep.subr.bf16.mxu1 %v7124_v46 }
  0x7e   :  { %5399 = vmatpush3.bf16.msra.mxu0 %v7122_v45  ;;  %893 = vmatpush1.bf16.msra.mxu1 %v7129_v48 }
  0x7f   :  { %5400 = vmatprep.subr.bf16.mxu0 %v9251_v36  ;;  %894 = vmatprep.subr.bf16.mxu1 %v7137_v50 }
  0x80   :  { %501 = vmatmul.mubr.bf16.gmra.mrb[8].mxu0 %v6345_v47  ;;  %574 = vmatmul.mubr.bf16.gmra.mrb[8].mxu1 %v6345_v47  ;;  %v7249_v47 = vld [vmem:[#allocation11 + $0x6c] ss:$16 sps:$4 sm:$0xff]  }
  0x81   :  { %510 = vmatprep.mubr.bf16.mxu0 %v9247_v0  ;;  %583 = vmatprep.mubr.bf16.mxu1 %v9247_v0 }
  0x82   :  { %5401 = vmatpush3.bf16.msra.mxu0 %v7135_v49  ;;  %895 = vmatpush1.bf16.msra.mxu1 %v7139_v51 }
  0x83   :  { %5402 = vmatprep.subr.bf16.mxu0 %v9251_v36  ;;  %896 = vmatprep.subr.bf16.mxu1 %v7149_v53 }
  0x86   :  { %5403 = vmatpush3.bf16.msra.mxu0 %v7147_v52  ;;  %897 = vmatpush1.bf16.msra.mxu1 %v7154_v55 }
  0x87   :  { %5404 = vmatprep.subr.bf16.mxu0 %v9251_v36  ;;  %898 = vmatprep.subr.bf16.mxu1 %v7157_v56 }
  0x88   :  { %511 = vmatmul.mubr.bf16.gmra.mrb[12].mxu0 %v6356_v54  ;;  %584 = vmatmul.mubr.bf16.gmra.mrb[12].mxu1 %v6356_v54  ;;  %v7255_v54 = vld [vmem:[#allocation11 + $0x8c] ss:$16 sps:$4 sm:$0xff]  }
  0x89   :  { %5408 = vmatprep.mubr.msk.bf16.mxu0 %vm6931_vm0, %v9251_v36  ;;  %918 = vmatprep.mubr.bf16.mxu1 %v9247_v0 }
  0x8a   :  { %5405 = vmatpush3.bf16.msra.mxu0 %v7160_v57  ;;  %899 = vmatpush1.bf16.msra.mxu1 %v7163_v58 }
  0x8b   :  { %5406 = vmatprep.subr.bf16.mxu0 %v9251_v36  ;;  %900 = vmatprep.subr.bf16.mxu1 %v7166_v59 }
  0x8e   :  { %5407 = vmatpush3.bf16.msra.mxu0 %v7172_v60  ;;  %901 = vmatpush1.bf16.msra.mxu1 %v7177_v61 }
  0x8f   :  { %5412 = vmatprep.subr.bf16.mxu0 %v9251_v36  ;;  %5432 = vmatprep.subr.bf16.mxu1 %v9251_v36 }
 0x143   :  { %v482_v5 = vpop.f32.mrb[0].mxu0  ;;  %v555_v12 = vpop.f32.mrb[0].mxu1 }
 0x144   :  { %v484_v6 = vpop.f32.mrb[1].mxu0  ;;  %v557_v13 = vpop.f32.mrb[1].mxu1  ;;  %v483_v20 = vadd.f32 %v482_v5, %v7220_v19  ;;  %v7267_v5 = vld [vmem:[#allocation11 + $0xcc] ss:$16 sps:$4 sm:$0xff]  }
 0x145   :  { %v485_v7 = vadd.f32 %v484_v6, %v7196_v3  ;;  %v7202_v8 = vpop.f32.mrb[2].mxu0  ;;  %v558_v15 = vadd.f32 %v557_v13, %v7206_v9  ;;  %v7214_v16 = vpop.f32.mrb[2].mxu1  ;;  %v7273_v6 = vld [vmem:[#allocation11 + $0xec] ss:$16 sps:$4 sm:$0xff]  }
 0x146   :  { %v7208_v10 = vpop.f32.mrb[3].mxu0  ;;  %v7216_v17 = vpop.f32.mrb[3].mxu1 }
 0x147   :  { %v4891_v11 = vmul.f32 -1.442695, %v485_v7  ;;  %v4892_v18 = vmul.f32 -1.442695, %v558_v15 }
 0x149   :  { %6376 = vpow2.f32 %v4891_v11 }
 0x14a   :  { %6378 = vpow2.f32 %v4892_v18 }
 0x14b   :  { %6380 = vtanh.f32 %v483_v20  ;;  %v7295_v7 = vpop.f32.mrb[4].mxu0  ;;  %v7299_v12 = vpop.f32.mrb[4].mxu1 }
 0x14c   :  { %v7297_v11 = vpop.f32.mrb[5].mxu0  ;;  %v7304_v15 = vpop.f32.mrb[5].mxu1 }
 0x14d   :  { %v7302_v13 = vpop.f32.mrb[6].mxu0  ;;  %v7309_v20 = vpop.f32.mrb[6].mxu1 }
 0x14e   :  { %v7307_v18 = vpop.f32.mrb[7].mxu0  ;;  %9265 = vst [vmem:[#allocation31_spill] sm:$0xff] %v7309_v20 }
 0x153   :  { %v6377_v21 = vpop.eup %6376 }
 0x154   :  { %v668_v22 = vadd.f32 1.0, %v6377_v21  ;;  %v6379_v23 = vpop.eup %6378  ;;  %v7311_v21 = vpop.f32.mrb[7].mxu1 }
 0x155   :  { %v669_v24 = vadd.f32 1.0, %v6379_v23  ;;  %v6381_v25 = vpop.eup %6380  ;;  %9266 = vst [vmem:[#allocation32_spill] sm:$0xff] %v7311_v21 }
 0x156   :  { %6382 = vrcp.f32 %v668_v22  ;;  %v7315_v22 = vpop.f32.mrb[8].mxu0 }
 0x157   :  { %6384 = vrcp.f32 %v669_v24  ;;  %9267 = vst [vmem:[#allocation33_spill] sm:$0xff] %v7315_v22  ;;  %v7317_v23 = vpop.f32.mrb[9].mxu0  ;;  %v7319_v24 = vpop.f32.mrb[8].mxu1 }
 0x158   :  { %9268 = vst [vmem:[#allocation34_spill] sm:$0xff] %v7317_v23  ;;  %9269 = vst [vmem:[#allocation35_spill] sm:$0xff] %v7319_v24 }
 0x160   :  { %v6383_v26 = vpop.eup %6382 }
 0x161   :  { %v7223_v27 = vmul.f32 %v6383_v26, %v6381_v25  ;;  %v6385_v28 = vpop.eup %6384  ;;  %v7321_v25 = vpop.f32.mrb[10].mxu0 }
 0x162   :  { %9270 = vst [vmem:[#allocation36_spill] sm:$0xff] %v7321_v25  ;;  %v7323_v26 = vpop.f32.mrb[9].mxu1 }
 0x163   :  { %6386 = vtanh.f32 %v7223_v27  ;;  %9271 = vst [vmem:[#allocation37_spill] sm:$0xff] %v7323_v26 }
 0x16d   :  { %v6387_v29 = vpop.eup %6386 }
 0x16e   :  { %v7226_v30 = vmul.f32 %v6387_v29, %v6385_v28  ;;  %v7325_v28 = vpop.f32.mrb[11].mxu0  ;;  %v7327_v29 = vpop.f32.mrb[10].mxu1 }
 0x16f   :  { %9272 = vst [vmem:[#allocation38_spill] sm:$0xff] %v7325_v28  ;;  %9273 = vst [vmem:[#allocation39_spill] sm:$0xff] %v7327_v29  ;;  %v7348_v29 = vsub.s32 2, %v7184_v63 }
 0x170   :  { %9264 = vst [vmem:[#allocation30_spill] sm:$0xff] %v7226_v30  ;;  %v678_v32 = vpack.c.bf16 %v7226_v30, %v7226_v30 }
 0x171   :  { %9283 = vst [vmem:[#allocation49_spill] sm:$0xff] %v7348_v29 }
 0x172   :  { %5409 = vmatmul.mubr.bf16.vlgmr.msra.gmra.mrb[16].mxu0 %v678_v32  ;;  %919 = vmatmul.mubr.bf16.vlgmr.msra.gmra.mrb[16].mxu1 %v678_v32 }
 0x173   :  { %5413 = vmatpush3.bf16.msra.mxu0 %v7228_v31  ;;  %5428 = vmatprep.mubr.msk.bf16.mxu0 %vm6931_vm0, %v9251_v36 }
 0x174   :  { %5414 = vmatprep.subr.bf16.mxu0 %v9251_v36  ;;  %5433 = vmatpush3.bf16.msra.mxu1 %v7086_v34 }
 0x175   :  { %5434 = vmatprep.subr.bf16.mxu1 %v9251_v36  ;;  %5448 = vmatprep.mubr.msk.bf16.mxu1 %vm6931_vm0, %v9251_v36 }
 0x177   :  { %5415 = vmatpush3.bf16.msra.mxu0 %v7233_v33 }
 0x178   :  { %5416 = vmatprep.subr.bf16.mxu0 %v9251_v36  ;;  %5435 = vmatpush3.bf16.msra.mxu1 %v7097_v38 }
 0x179   :  { %5436 = vmatprep.subr.bf16.mxu1 %v9251_v36 }
 0x17b   :  { %5417 = vmatpush3.bf16.msra.mxu0 %v7243_v40 }
 0x17c   :  { %5418 = vmatprep.subr.bf16.mxu0 %v9251_v36  ;;  %5437 = vmatpush3.bf16.msra.mxu1 %v7110_v42 }
 0x17d   :  { %5438 = vmatprep.subr.bf16.mxu1 %v9251_v36 }
 0x17f   :  { %5419 = vmatpush3.bf16.msra.mxu0 %v7249_v47 }
 0x180   :  { %5420 = vmatprep.subr.bf16.mxu0 %v9251_v36  ;;  %5439 = vmatpush3.bf16.msra.mxu1 %v7122_v45 }
 0x181   :  { %5440 = vmatprep.subr.bf16.mxu1 %v9251_v36 }
 0x183   :  { %5421 = vmatpush3.bf16.msra.mxu0 %v7255_v54 }
 0x184   :  { %5422 = vmatprep.subr.bf16.mxu0 %v9251_v36  ;;  %5441 = vmatpush3.bf16.msra.mxu1 %v7135_v49 }
 0x185   :  { %5442 = vmatprep.subr.bf16.mxu1 %v9251_v36 }
 0x187   :  { %5423 = vmatpush3.bf16.msra.mxu0 %v7261_v62 }
 0x188   :  { %5424 = vmatprep.subr.bf16.mxu0 %v9251_v36  ;;  %5443 = vmatpush3.bf16.msra.mxu1 %v7147_v52 }
 0x189   :  { %5444 = vmatprep.subr.bf16.mxu1 %v9251_v36 }
 0x18b   :  { %5425 = vmatpush3.bf16.msra.mxu0 %v7267_v5 }
 0x18c   :  { %5426 = vmatprep.subr.bf16.mxu0 %v9251_v36  ;;  %5445 = vmatpush3.bf16.msra.mxu1 %v7160_v57 }
 0x18d   :  { %5446 = vmatprep.subr.bf16.mxu1 %v9251_v36 }
 0x18f   :  { %5427 = vmatpush3.bf16.msra.mxu0 %v7273_v6 }
 0x190   :  { %1043 = vmatprep.subr.bf16.mxu0 %v7088_v35  ;;  %5447 = vmatpush3.bf16.msra.mxu1 %v7172_v60 }
 0x191   :  { %5452 = vmatprep.subr.bf16.mxu1 %v9251_v36 }
 0x192   :  { %5429 = vmatmul.mubr.bf16.vlgmr.msra.gmra.mrb[20].mxu0 %v678_v32  ;;  %v7329_v32 = vpop.f32.mrb[11].mxu1 }
 0x193   :  { %1044 = vmatpush1.bf16.msra.mxu0 %v7091_v37  ;;  %1075 = vmatprep.mubr.bf16.mxu0 %v9247_v0  ;;  %9274 = vst [vmem:[#allocation40_spill] sm:$0xff] %v7329_v32  ;;  %v7331_v0 = vpop.f32.mrb[12].mxu0 }
 0x194   :  { %1045 = vmatprep.subr.bf16.mxu0 %v7099_v39  ;;  %9275 = vst [vmem:[#allocation41_spill] sm:$0xff] %v7331_v0  ;;  %v7333_v14 = vpop.f32.mrb[13].mxu0  ;;  %v7352_v0 = vrot.slane %v7192_v2, %v7348_v29 }
 0x195   :  { %9276 = vst [vmem:[#allocation42_spill] sm:$0xff] %v7333_v14  ;;  %v7337_v4 = vpop.f32.mrb[14].mxu0 }
 0x196   :  { %9278 = vst [vmem:[#allocation44_spill] sm:$0xff] %v7337_v4  ;;  %v7341_v30 = vpop.f32.mrb[15].mxu0  ;;  %v489_v4 = vadd.f32 %v7208_v10, %v7196_v3 }
 0x197   :  { %1046 = vmatpush1.bf16.msra.mxu0 %v7104_v41  ;;  %9280 = vst [vmem:[#allocation46_spill] sm:$0xff] %v7341_v30  ;;  %v560_v30 = vadd.f32 %v7214_v16, %v7352_v0 }
 0x198   :  { %1047 = vmatprep.subr.bf16.mxu0 %v7112_v43 }
 0x19b   :  { %1048 = vmatpush1.bf16.msra.mxu0 %v7114_v44 }
 0x19c   :  { %1049 = vmatprep.subr.bf16.mxu0 %v7124_v46 }
 0x19f   :  { %1050 = vmatpush1.bf16.msra.mxu0 %v7129_v48 }
 0x1a0   :  { %1051 = vmatprep.subr.bf16.mxu0 %v7137_v50 }
 0x1a3   :  { %1052 = vmatpush1.bf16.msra.mxu0 %v7139_v51 }
 0x1a4   :  { %1053 = vmatprep.subr.bf16.mxu0 %v7149_v53 }
 0x1a7   :  { %1054 = vmatpush1.bf16.msra.mxu0 %v7154_v55 }
 0x1a8   :  { %1055 = vmatprep.subr.bf16.mxu0 %v7157_v56 }
 0x1ab   :  { %1056 = vmatpush1.bf16.msra.mxu0 %v7163_v58 }
 0x1ac   :  { %1057 = vmatprep.subr.bf16.mxu0 %v7166_v59 }
 0x1af   :  { %1058 = vmatpush1.bf16.msra.mxu0 %v7177_v61 }
 0x1b0   :  { %5472 = vmatprep.subr.bf16.mxu0 %v9251_v36  ;;  %v7335_v36 = vpop.f32.mrb[12].mxu1 }
 0x1b1   :  { %9277 = vst [vmem:[#allocation43_spill] sm:$0xff] %v7335_v36  ;;  %v7339_v1 = vpop.f32.mrb[13].mxu1  ;;  %v487_v36 = vadd.f32 %v7202_v8, %v7220_v19 }
 0x1b2   :  { %9279 = vst [vmem:[#allocation45_spill] sm:$0xff] %v7339_v1  ;;  %v7343_v25 = vpop.f32.mrb[14].mxu1 }
 0x1b3   :  { %9281 = vst [vmem:[#allocation47_spill] sm:$0xff] %v7343_v25  ;;  %v7345_v26 = vpop.f32.mrb[15].mxu1 }
 0x1b4   :  { %9282 = vst [vmem:[#allocation48_spill] sm:$0xff] %v7345_v26 }
 0x245   :  { %v766_v1 = vpop.f32.mrb[16].mxu0  ;;  %v920_v25 = vpop.f32.mrb[16].mxu1 }
 0x246   :  { %v772_v14 = vadd.f32 %v766_v1, %v487_v36  ;;  %v967_v26 = vadd.f32 %v920_v25, %v489_v4  ;;  %v5410_v32 = vpop.f32.mrb[17].mxu0  ;;  %v922_v63 = vpop.f32.mrb[17].mxu1 }
 0x247   :  { %v968_v28 = vadd.f32 %v922_v63, %v560_v30  ;;  %v769_v24 = vpop.f32.mrb[18].mxu0  ;;  %v924_v23 = vpop.f32.mrb[18].mxu1 }
 0x248   :  { %v4925_v2 = vmul.f32 -1.442695, %v967_v26  ;;  %v5411_v29 = vpop.f32.mrb[19].mxu0  ;;  %v925_v22 = vpop.f32.mrb[19].mxu1  ;;  %v562_v23 = vadd.f32 %v7216_v17, %v7206_v9 }
 0x249   :  { %v4926_v21 = vmul.f32 -1.442695, %v968_v28 }
 0x24a   :  { %6388 = vpow2.f32 %v4925_v2 }
 0x24b   :  { %6390 = vpow2.f32 %v4926_v21 }
 0x24c   :  { %6392 = vtanh.f32 %v772_v14 }
 0x254   :  { %v6389_v8 = vpop.eup %6388 }
 0x255   :  { %v6391_v10 = vpop.eup %6390  ;;  %v979_v20 = vadd.f32 1.0, %v6389_v8  ;;  %v9284_v8 = vmov 0.0  }
 0x256   :  { %v980_v16 = vadd.f32 1.0, %v6391_v10  ;;  %v6393_v36 = vpop.eup %6392  ;;  %v9285_v10 = vmov 0  }
 0x257   :  { %6394 = vrcp.f32 %v979_v20 }
 0x258   :  { %6396 = vrcp.f32 %v980_v16  ;;  %v493_v16 = vadd.f32 %v7295_v7, %v7220_v19 }
 0x261   :  { %v6395_v1 = vpop.eup %6394 }
 0x262   :  { %v6397_v4 = vpop.eup %6396  ;;  %v989_v25 = vmul.f32 %v6395_v1, %v6393_v36  ;;  %v495_v36 = vadd.f32 %v7297_v11, %v7196_v3  ;;  %v566_v1 = vadd.f32 %v7299_v12, %v7352_v0 }
 0x263   :  { %v988_v30 = vmul.f32 %v6397_v4, %v7223_v27 }
 0x265   :  { %v7363_v22 = vadd.f32 %v989_v25, %v988_v30  ;;  %v961_v24 = vpop.f32.mrb[20].mxu0 }
 0x266   :  { %v969_v21 = vadd.f32 %v961_v24, %v562_v23  ;;  %v5430_v26 = vpop.f32.mrb[21].mxu0 }
 0x267   :  { %v964_v28 = vpop.f32.mrb[22].mxu0 }
 0x268   :  { %v4927_v29 = vmul.f32 -1.442695, %v969_v21  ;;  %v5431_v14 = vpop.f32.mrb[23].mxu0 }
 0x26a   :  { %6398 = vpow2.f32 %v4927_v29 }
 0x26b   :  { %6400 = vtanh.f32 %v7363_v22 }
 0x274   :  { %v6399_v20 = vpop.eup %6398 }
 0x275   :  { %v981_v32 = vadd.f32 1.0, %v6399_v20  ;;  %v6401_v63 = vpop.eup %6400 }
 0x277   :  { %6402 = vrcp.f32 %v981_v32 }
 0x281   :  { %v6403_v2 = vpop.eup %6402 }
 0x282   :  { %v7366_v27 = vmul.f32 %v6403_v2, %v6401_v63 }
 0x284   :  { %v995_v17 = vpack.c.bf16 %v7366_v27, %v7366_v27 }
 0x286   :  { %5449 = vmatmul.mubr.bf16.vlgmr.msra.gmra.mrb[20].mxu1 %v995_v17  ;;  %1076 = vmatmul.mubr.bf16.vlgmr.msra.gmra.mrb[24].mxu0 %v995_v17 }
 0x287   :  { %5453 = vmatpush3.bf16.msra.mxu1 %v7228_v31  ;;  %5468 = vmatprep.mubr.msk.bf16.mxu1 %vm6931_vm0, %v9284_v8 }
 0x288   :  { %5454 = vmatprep.subr.bf16.mxu1 %v9284_v8  ;;  %5473 = vmatpush3.bf16.msra.mxu0 %v7086_v34 }
 0x289   :  { %5474 = vmatprep.subr.bf16.mxu0 %v9284_v8  ;;  %5488 = vmatprep.mubr.msk.bf16.mxu0 %vm6931_vm0, %v9284_v8 }
 0x28b   :  { %5455 = vmatpush3.bf16.msra.mxu1 %v7233_v33 }
 0x28c   :  { %5456 = vmatprep.subr.bf16.mxu1 %v9284_v8  ;;  %5475 = vmatpush3.bf16.msra.mxu0 %v7097_v38 }
 0x28d   :  { %5476 = vmatprep.subr.bf16.mxu0 %v9284_v8 }
 0x28f   :  { %5457 = vmatpush3.bf16.msra.mxu1 %v7243_v40 }
 0x290   :  { %5458 = vmatprep.subr.bf16.mxu1 %v9284_v8  ;;  %5477 = vmatpush3.bf16.msra.mxu0 %v7110_v42 }
 0x291   :  { %5478 = vmatprep.subr.bf16.mxu0 %v9284_v8 }
 0x293   :  { %5459 = vmatpush3.bf16.msra.mxu1 %v7249_v47 }
 0x294   :  { %5460 = vmatprep.subr.bf16.mxu1 %v9284_v8  ;;  %5479 = vmatpush3.bf16.msra.mxu0 %v7122_v45 }
 0x295   :  { %5480 = vmatprep.subr.bf16.mxu0 %v9284_v8 }
 0x297   :  { %5461 = vmatpush3.bf16.msra.mxu1 %v7255_v54 }
 0x298   :  { %5462 = vmatprep.subr.bf16.mxu1 %v9284_v8  ;;  %5481 = vmatpush3.bf16.msra.mxu0 %v7135_v49 }
 0x299   :  { %5482 = vmatprep.subr.bf16.mxu0 %v9284_v8 }
 0x29b   :  { %5463 = vmatpush3.bf16.msra.mxu1 %v7261_v62 }
 0x29c   :  { %5464 = vmatprep.subr.bf16.mxu1 %v9284_v8  ;;  %5483 = vmatpush3.bf16.msra.mxu0 %v7147_v52 }
 0x29d   :  { %5484 = vmatprep.subr.bf16.mxu0 %v9284_v8 }
 0x29f   :  { %5465 = vmatpush3.bf16.msra.mxu1 %v7267_v5 }
 0x2a0   :  { %5466 = vmatprep.subr.bf16.mxu1 %v9284_v8  ;;  %5485 = vmatpush3.bf16.msra.mxu0 %v7160_v57 }
 0x2a1   :  { %5486 = vmatprep.subr.bf16.mxu0 %v9284_v8 }
 0x2a3   :  { %5467 = vmatpush3.bf16.msra.mxu1 %v7273_v6 }
 0x2a4   :  { %1200 = vmatprep.subr.bf16.mxu1 %v7088_v35  ;;  %5487 = vmatpush3.bf16.msra.mxu0 %v7172_v60 }
 0x2a5   :  { %5492 = vmatprep.subr.bf16.mxu0 %v9284_v8 }
 0x2a6   :  { %5469 = vmatmul.mubr.bf16.vlgmr.msra.gmra.mrb[24].mxu1 %v995_v17 }
 0x2a7   :  { %1201 = vmatpush1.bf16.msra.mxu1 %v7091_v37  ;;  %1232 = vmatprep.mubr.bf16.mxu1 %v9285_v10 }
 0x2a8   :  { %1202 = vmatprep.subr.bf16.mxu1 %v7099_v39 }
 0x2ab   :  { %1203 = vmatpush1.bf16.msra.mxu1 %v7104_v41 }
 0x2ac   :  { %1204 = vmatprep.subr.bf16.mxu1 %v7112_v43 }
 0x2af   :  { %1205 = vmatpush1.bf16.msra.mxu1 %v7114_v44 }
 0x2b0   :  { %1206 = vmatprep.subr.bf16.mxu1 %v7124_v46 }
 0x2b3   :  { %1207 = vmatpush1.bf16.msra.mxu1 %v7129_v48 }
 0x2b4   :  { %1208 = vmatprep.subr.bf16.mxu1 %v7137_v50 }
 0x2b7   :  { %1209 = vmatpush1.bf16.msra.mxu1 %v7139_v51 }
 0x2b8   :  { %1210 = vmatprep.subr.bf16.mxu1 %v7149_v53 }
 0x2bb   :  { %1211 = vmatpush1.bf16.msra.mxu1 %v7154_v55 }
 0x2bc   :  { %1212 = vmatprep.subr.bf16.mxu1 %v7157_v56 }
 0x2bf   :  { %1213 = vmatpush1.bf16.msra.mxu1 %v7163_v58 }
 0x2c0   :  { %1214 = vmatprep.subr.bf16.mxu1 %v7166_v59 }
 0x2c3   :  { %1215 = vmatpush1.bf16.msra.mxu1 %v7177_v61 }
 0x2c4   :  { %5512 = vmatprep.subr.bf16.mxu1 %v9284_v8 }
 0x359   :  { %v1035_v4 = vpop.f32.mrb[20].mxu1  ;;  %v1077_v25 = vpop.f32.mrb[24].mxu0 }
 0x35a   :  { %v1041_v30 = vadd.f32 %v1035_v4, %v493_v16  ;;  %v1124_v23 = vadd.f32 %v1077_v25, %v495_v36  ;;  %v5450_v24 = vpop.f32.mrb[21].mxu1  ;;  %v1079_v21 = vpop.f32.mrb[25].mxu0  ;;  %v568_v25 = vadd.f32 %v7304_v15, %v7206_v9 }
 0x35b   :  { %v1125_v26 = vadd.f32 %v1079_v21, %v566_v1  ;;  %v1038_v28 = vpop.f32.mrb[22].mxu1  ;;  %v1081_v29 = vpop.f32.mrb[26].mxu0 }
 0x35c   :  { %v4928_v14 = vmul.f32 -1.442695, %v1124_v23  ;;  %v5451_v20 = vpop.f32.mrb[23].mxu1  ;;  %v1082_v32 = vpop.f32.mrb[27].mxu0 }
 0x35d   :  { %v4929_v63 = vmul.f32 -1.442695, %v1125_v26 }
 0x35e   :  { %6404 = vpow2.f32 %v4928_v14 }
 0x35f   :  { %6406 = vpow2.f32 %v4929_v63 }
 0x360   :  { %6408 = vtanh.f32 %v1041_v30 }
 0x368   :  { %v6405_v7 = vpop.eup %6404 }
 0x369   :  { %v6407_v11 = vpop.eup %6406  ;;  %v1136_v2 = vadd.f32 1.0, %v6405_v7  ;;  %v497_v7 = vadd.f32 %v7302_v13, %v7220_v19 }
 0x36a   :  { %v1137_v12 = vadd.f32 1.0, %v6407_v11  ;;  %v6409_v17 = vpop.eup %6408  ;;  %v499_v11 = vadd.f32 %v7307_v18, %v7196_v3 }
 0x36b   :  { %6410 = vrcp.f32 %v1136_v2  ;;  %v9286_v2 = vld [vmem:[#allocation31_spill] sm:$0xff] }
 0x36c   :  { %6412 = vrcp.f32 %v1137_v12  ;;  %v570_v12 = vadd.f32 %v9286_v2, %v7352_v0 }
 0x375   :  { %v6411_v16 = vpop.eup %6410 }
 0x376   :  { %v6413_v36 = vpop.eup %6412  ;;  %v1146_v4 = vmul.f32 %v6411_v16, %v6409_v17 }
 0x377   :  { %v1145_v1 = vmul.f32 %v6413_v36, %v7363_v22 }
 0x379   :  { %v7432_v23 = vadd.f32 %v1146_v4, %v1145_v1  ;;  %v1118_v24 = vpop.f32.mrb[24].mxu1 }
 0x37a   :  { %v1126_v21 = vadd.f32 %v1118_v24, %v568_v25  ;;  %v5470_v26 = vpop.f32.mrb[25].mxu1 }
 0x37b   :  { %v1121_v28 = vpop.f32.mrb[26].mxu1 }
 0x37c   :  { %v4930_v29 = vmul.f32 -1.442695, %v1126_v21  ;;  %v5471_v30 = vpop.f32.mrb[27].mxu1 }
 0x37e   :  { %6414 = vpow2.f32 %v4930_v29 }
 0x37f   :  { %6416 = vtanh.f32 %v7432_v23 }
 0x388   :  { %v6415_v14 = vpop.eup %6414 }
 0x389   :  { %v1138_v20 = vadd.f32 1.0, %v6415_v14  ;;  %v6417_v32 = vpop.eup %6416 }
 0x38b   :  { %6418 = vrcp.f32 %v1138_v20 }
 0x395   :  { %v6419_v63 = vpop.eup %6418 }
 0x396   :  { %v7435_v22 = vmul.f32 %v6419_v63, %v6417_v32 }
 0x398   :  { %v1152_v15 = vpack.c.bf16 %v7435_v22, %v7435_v22 }
 0x39a   :  { %5489 = vmatmul.mubr.bf16.vlgmr.msra.gmra.mrb[28].mxu0 %v1152_v15  ;;  %1233 = vmatmul.mubr.bf16.vlgmr.msra.gmra.mrb[28].mxu1 %v1152_v15 }
 0x39b   :  { %5493 = vmatpush3.bf16.msra.mxu0 %v7228_v31  ;;  %5508 = vmatprep.mubr.msk.bf16.mxu0 %vm6931_vm0, %v9284_v8 }
 0x39c   :  { %5494 = vmatprep.subr.bf16.mxu0 %v9284_v8  ;;  %5513 = vmatpush3.bf16.msra.mxu1 %v7086_v34 }
 0x39d   :  { %5514 = vmatprep.subr.bf16.mxu1 %v9284_v8  ;;  %5528 = vmatprep.mubr.msk.bf16.mxu1 %vm6931_vm0, %v9284_v8 }
 0x39f   :  { %5495 = vmatpush3.bf16.msra.mxu0 %v7233_v33 }
 0x3a0   :  { %5496 = vmatprep.subr.bf16.mxu0 %v9284_v8  ;;  %5515 = vmatpush3.bf16.msra.mxu1 %v7097_v38 }
 0x3a1   :  { %5516 = vmatprep.subr.bf16.mxu1 %v9284_v8 }
 0x3a3   :  { %5497 = vmatpush3.bf16.msra.mxu0 %v7243_v40 }
 0x3a4   :  { %5498 = vmatprep.subr.bf16.mxu0 %v9284_v8  ;;  %5517 = vmatpush3.bf16.msra.mxu1 %v7110_v42 }
 0x3a5   :  { %5518 = vmatprep.subr.bf16.mxu1 %v9284_v8 }
 0x3a7   :  { %5499 = vmatpush3.bf16.msra.mxu0 %v7249_v47 }
 0x3a8   :  { %5500 = vmatprep.subr.bf16.mxu0 %v9284_v8  ;;  %5519 = vmatpush3.bf16.msra.mxu1 %v7122_v45 }
 0x3a9   :  { %5520 = vmatprep.subr.bf16.mxu1 %v9284_v8 }
 0x3ab   :  { %5501 = vmatpush3.bf16.msra.mxu0 %v7255_v54 }
 0x3ac   :  { %5502 = vmatprep.subr.bf16.mxu0 %v9284_v8  ;;  %5521 = vmatpush3.bf16.msra.mxu1 %v7135_v49 }
 0x3ad   :  { %5522 = vmatprep.subr.bf16.mxu1 %v9284_v8 }
 0x3af   :  { %5503 = vmatpush3.bf16.msra.mxu0 %v7261_v62 }
 0x3b0   :  { %5504 = vmatprep.subr.bf16.mxu0 %v9284_v8  ;;  %5523 = vmatpush3.bf16.msra.mxu1 %v7147_v52 }
 0x3b1   :  { %5524 = vmatprep.subr.bf16.mxu1 %v9284_v8 }
 0x3b3   :  { %5505 = vmatpush3.bf16.msra.mxu0 %v7267_v5 }
 0x3b4   :  { %5506 = vmatprep.subr.bf16.mxu0 %v9284_v8  ;;  %5525 = vmatpush3.bf16.msra.mxu1 %v7160_v57 }
 0x3b5   :  { %5526 = vmatprep.subr.bf16.mxu1 %v9284_v8 }
 0x3b7   :  { %5507 = vmatpush3.bf16.msra.mxu0 %v7273_v6 }
 0x3b8   :  { %1357 = vmatprep.subr.bf16.mxu0 %v7088_v35  ;;  %5527 = vmatpush3.bf16.msra.mxu1 %v7172_v60 }
 0x3b9   :  { %5532 = vmatprep.subr.bf16.mxu1 %v9284_v8 }
 0x3ba   :  { %5509 = vmatmul.mubr.bf16.vlgmr.msra.gmra.mrb[32].mxu0 %v1152_v15 }
 0x3bb   :  { %1358 = vmatpush1.bf16.msra.mxu0 %v7091_v37  ;;  %1389 = vmatprep.mubr.bf16.mxu0 %v9285_v10 }
 0x3bc   :  { %1359 = vmatprep.subr.bf16.mxu0 %v7099_v39 }
 0x3bf   :  { %1360 = vmatpush1.bf16.msra.mxu0 %v7104_v41 }
 0x3c0   :  { %1361 = vmatprep.subr.bf16.mxu0 %v7112_v43 }
 0x3c3   :  { %1362 = vmatpush1.bf16.msra.mxu0 %v7114_v44 }
 0x3c4   :  { %1363 = vmatprep.subr.bf16.mxu0 %v7124_v46 }
 0x3c7   :  { %1364 = vmatpush1.bf16.msra.mxu0 %v7129_v48 }
 0x3c8   :  { %1365 = vmatprep.subr.bf16.mxu0 %v7137_v50 }
 0x3cb   :  { %1366 = vmatpush1.bf16.msra.mxu0 %v7139_v51 }
 0x3cc   :  { %1367 = vmatprep.subr.bf16.mxu0 %v7149_v53 }
 0x3cf   :  { %1368 = vmatpush1.bf16.msra.mxu0 %v7154_v55 }
 0x3d0   :  { %1369 = vmatprep.subr.bf16.mxu0 %v7157_v56 }
 0x3d3   :  { %1370 = vmatpush1.bf16.msra.mxu0 %v7163_v58 }
 0x3d4   :  { %1371 = vmatprep.subr.bf16.mxu0 %v7166_v59 }
 0x3d7   :  { %1372 = vmatpush1.bf16.msra.mxu0 %v7177_v61 }
 0x3d8   :  { %5552 = vmatprep.subr.bf16.mxu0 %v9284_v8 }
 0x46d   :  { %v1192_v17 = vpop.f32.mrb[28].mxu0  ;;  %v1234_v16 = vpop.f32.mrb[28].mxu1 }
 0x46e   :  { %v1198_v36 = vadd.f32 %v1192_v17, %v497_v7  ;;  %v1281_v4 = vadd.f32 %v1234_v16, %v499_v11  ;;  %v5490_v1 = vpop.f32.mrb[29].mxu0  ;;  %v1236_v25 = vpop.f32.mrb[29].mxu1 }
 0x46f   :  { %v1282_v24 = vadd.f32 %v1236_v25, %v570_v12  ;;  %v1195_v21 = vpop.f32.mrb[30].mxu0  ;;  %v1238_v26 = vpop.f32.mrb[30].mxu1  ;;  %v9287_v12 = vld [vmem:[#allocation32_spill] sm:$0xff] }
 0x470   :  { %v4931_v28 = vmul.f32 -1.442695, %v1281_v4  ;;  %v5491_v29 = vpop.f32.mrb[31].mxu0  ;;  %v1239_v30 = vpop.f32.mrb[31].mxu1  ;;  %v572_v17 = vadd.f32 %v9287_v12, %v7206_v9 }
 0x471   :  { %v4932_v14 = vmul.f32 -1.442695, %v1282_v24 }
 0x472   :  { %6420 = vpow2.f32 %v4931_v28 }
 0x473   :  { %6422 = vpow2.f32 %v4932_v14 }
 0x474   :  { %6424 = vtanh.f32 %v1198_v36 }
 0x47c   :  { %v6421_v13 = vpop.eup %6420 }
 0x47d   :  { %v6423_v18 = vpop.eup %6422  ;;  %v1293_v20 = vadd.f32 1.0, %v6421_v13 }
 0x47e   :  { %v1294_v32 = vadd.f32 1.0, %v6423_v18  ;;  %v6425_v63 = vpop.eup %6424 }
 0x47f   :  { %6426 = vrcp.f32 %v1293_v20 }
 0x480   :  { %6428 = vrcp.f32 %v1294_v32 }
 0x489   :  { %v6427_v15 = vpop.eup %6426 }
 0x48a   :  { %v6429_v7 = vpop.eup %6428  ;;  %v1303_v11 = vmul.f32 %v6427_v15, %v6425_v63  ;;  %v9291_v63 = vld [vmem:[#allocation37_spill] sm:$0xff] }
 0x48b   :  { %v1302_v2 = vmul.f32 %v6429_v7, %v7432_v23  ;;  %v578_v15 = vadd.f32 %v9291_v63, %v7206_v9 }
 0x48d   :  { %v7501_v16 = vadd.f32 %v1303_v11, %v1302_v2  ;;  %v1275_v4 = vpop.f32.mrb[32].mxu0 }
 0x48e   :  { %v1283_v1 = vadd.f32 %v1275_v4, %v572_v17  ;;  %v5510_v25 = vpop.f32.mrb[33].mxu0 }
 0x48f   :  { %v1278_v24 = vpop.f32.mrb[34].mxu0 }
 0x490   :  { %v4933_v21 = vmul.f32 -1.442695, %v1283_v1  ;;  %v5511_v36 = vpop.f32.mrb[35].mxu0 }
 0x492   :  { %6430 = vpow2.f32 %v4933_v21 }
 0x493   :  { %6432 = vtanh.f32 %v7501_v16 }
 0x49c   :  { %v6431_v26 = vpop.eup %6430 }
 0x49d   :  { %v1295_v28 = vadd.f32 1.0, %v6431_v26  ;;  %v6433_v29 = vpop.eup %6432 }
 0x49f   :  { %6434 = vrcp.f32 %v1295_v28  ;;  %v7581_v28 = vld [vmem:[#allocation11] ss:$16 sps:$4 sm:$0xff]  }
 0x4a9   :  { %v6435_v30 = vpop.eup %6434 }
 0x4aa   :  { %v7504_v23 = vmul.f32 %v6435_v30, %v6433_v29  ;;  %v7589_v29 = vld [vmem:[#allocation11 + $0x20] ss:$16 sps:$4 sm:$0xff]  }
 0x4ab   :  { %v7627_v30 = vld [vmem:[#allocation11 + $0xe0] ss:$16 sps:$4 sm:$0xff]  }
 0x4ac   :  { %v1309_v14 = vpack.c.bf16 %v7504_v23, %v7504_v23 }
 0x4ae   :  { %5529 = vmatmul.mubr.bf16.vlgmr.msra.gmra.mrb[32].mxu1 %v1309_v14  ;;  %1390 = vmatmul.mubr.bf16.vlgmr.msra.gmra.mrb[36].mxu0 %v1309_v14 }
 0x4af   :  { %5533 = vmatpush3.bf16.msra.mxu1 %v7228_v31  ;;  %5548 = vmatprep.mubr.msk.bf16.mxu1 %vm6931_vm0, %v9284_v8 }
 0x4b0   :  { %5534 = vmatprep.subr.bf16.mxu1 %v9284_v8  ;;  %5553 = vmatpush3.bf16.msra.mxu0 %v7086_v34  ;;  %v9288_v34 = vld [vmem:[#allocation33_spill] sm:$0xff] }
 0x4b1   :  { %5554 = vmatprep.subr.bf16.mxu0 %v9284_v8  ;;  %5568 = vmatprep.mubr.msk.bf16.mxu0 %vm6931_vm0, %v9284_v8 }
 0x4b3   :  { %5535 = vmatpush3.bf16.msra.mxu1 %v7233_v33 }
 0x4b4   :  { %5536 = vmatprep.subr.bf16.mxu1 %v9284_v8  ;;  %5555 = vmatpush3.bf16.msra.mxu0 %v7097_v38 }
 0x4b5   :  { %5556 = vmatprep.subr.bf16.mxu0 %v9284_v8 }
 0x4b7   :  { %5537 = vmatpush3.bf16.msra.mxu1 %v7243_v40 }
 0x4b8   :  { %5538 = vmatprep.subr.bf16.mxu1 %v9284_v8  ;;  %5557 = vmatpush3.bf16.msra.mxu0 %v7110_v42 }
 0x4b9   :  { %5558 = vmatprep.subr.bf16.mxu0 %v9284_v8 }
 0x4bb   :  { %5539 = vmatpush3.bf16.msra.mxu1 %v7249_v47 }
 0x4bc   :  { %5540 = vmatprep.subr.bf16.mxu1 %v9284_v8  ;;  %5559 = vmatpush3.bf16.msra.mxu0 %v7122_v45 }
 0x4bd   :  { %5560 = vmatprep.subr.bf16.mxu0 %v9284_v8 }
 0x4bf   :  { %5541 = vmatpush3.bf16.msra.mxu1 %v7255_v54 }
 0x4c0   :  { %5542 = vmatprep.subr.bf16.mxu1 %v9284_v8  ;;  %5561 = vmatpush3.bf16.msra.mxu0 %v7135_v49 }
 0x4c1   :  { %5562 = vmatprep.subr.bf16.mxu0 %v9284_v8 }
 0x4c3   :  { %5543 = vmatpush3.bf16.msra.mxu1 %v7261_v62 }
 0x4c4   :  { %5544 = vmatprep.subr.bf16.mxu1 %v9284_v8  ;;  %5563 = vmatpush3.bf16.msra.mxu0 %v7147_v52 }
 0x4c5   :  { %5564 = vmatprep.subr.bf16.mxu0 %v9284_v8 }
 0x4c7   :  { %5545 = vmatpush3.bf16.msra.mxu1 %v7267_v5 }
 0x4c8   :  { %5546 = vmatprep.subr.bf16.mxu1 %v9284_v8  ;;  %5565 = vmatpush3.bf16.msra.mxu0 %v7160_v57 }
 0x4c9   :  { %5566 = vmatprep.subr.bf16.mxu0 %v9284_v8 }
 0x4cb   :  { %5547 = vmatpush3.bf16.msra.mxu1 %v7273_v6 }
 0x4cc   :  { %1514 = vmatprep.subr.bf16.mxu1 %v7088_v35  ;;  %5567 = vmatpush3.bf16.msra.mxu0 %v7172_v60  ;;  %v503_v35 = vadd.f32 %v9288_v34, %v7220_v19  ;;  %v7641_v34 = vld [vmem:[#allocation11 + $0x48] ss:$16 sps:$4 sm:$0xff]  }
 0x4cd   :  { %5572 = vmatprep.subr.bf16.mxu0 %v9284_v8 }
 0x4ce   :  { %5549 = vmatmul.mubr.bf16.vlgmr.msra.gmra.mrb[36].mxu1 %v1309_v14  ;;  %v7635_v14 = vld [vmem:[#allocation11 + $0x28] ss:$16 sps:$4 sm:$0xff]  }
 0x4cf   :  { %1515 = vmatpush1.bf16.msra.mxu1 %v7091_v37  ;;  %1546 = vmatprep.mubr.bf16.mxu1 %v9285_v10  ;;  %v9289_v37 = vld [vmem:[#allocation34_spill] sm:$0xff] }
 0x4d0   :  { %1516 = vmatprep.subr.bf16.mxu1 %v7099_v39  ;;  %v505_v38 = vadd.f32 %v9289_v37, %v7196_v3  ;;  %v9290_v39 = vld [vmem:[#allocation35_spill] sm:$0xff]  ;;  %v7647_v37 = vld [vmem:[#allocation11 + $0x68] ss:$16 sps:$4 sm:$0xff]  }
 0x4d3   :  { %1517 = vmatpush1.bf16.msra.mxu1 %v7104_v41  ;;  %v576_v41 = vadd.f32 %v9290_v39, %v7352_v0  ;;  %v7653_v39 = vld [vmem:[#allocation11 + $0x88] ss:$16 sps:$4 sm:$0xff]  }
 0x4d4   :  { %1518 = vmatprep.subr.bf16.mxu1 %v7112_v43 }
 0x4d7   :  { %1519 = vmatpush1.bf16.msra.mxu1 %v7114_v44 }
 0x4d8   :  { %1520 = vmatprep.subr.bf16.mxu1 %v7124_v46 }
 0x4db   :  { %1521 = vmatpush1.bf16.msra.mxu1 %v7129_v48 }
 0x4dc   :  { %1522 = vmatprep.subr.bf16.mxu1 %v7137_v50 }
 0x4df   :  { %1523 = vmatpush1.bf16.msra.mxu1 %v7139_v51 }
 0x4e0   :  { %1524 = vmatprep.subr.bf16.mxu1 %v7149_v53 }
 0x4e3   :  { %1525 = vmatpush1.bf16.msra.mxu1 %v7154_v55 }
 0x4e4   :  { %1526 = vmatprep.subr.bf16.mxu1 %v7157_v56 }
 0x4e7   :  { %1527 = vmatpush1.bf16.msra.mxu1 %v7163_v58 }
 0x4e8   :  { %1528 = vmatprep.subr.bf16.mxu1 %v7166_v59 }
 0x4eb   :  { %1529 = vmatpush1.bf16.msra.mxu1 %v7177_v61 }
 0x4ec   :  { %5592 = vmatprep.subr.bf16.mxu1 %v9284_v8 }
 0x581   :  { %v1349_v42 = vpop.f32.mrb[32].mxu1  ;;  %v1391_v43 = vpop.f32.mrb[36].mxu0 }
 0x582   :  { %v1355_v44 = vadd.f32 %v1349_v42, %v503_v35  ;;  %v1438_v45 = vadd.f32 %v1391_v43, %v505_v38  ;;  %v5530_v46 = vpop.f32.mrb[33].mxu1  ;;  %v1393_v48 = vpop.f32.mrb[37].mxu0  ;;  %v7644_v35 = vld [vmem:[#allocation11 + $0x44] ss:$16 sps:$4 sm:$0xff]   ;;  %v7659_v42 = vld [vmem:[#allocation11 + $0xa8] ss:$16 sps:$4 sm:$0xff]  }
 0x583   :  { %v1439_v49 = vadd.f32 %v1393_v48, %v576_v41  ;;  %v1352_v50 = vpop.f32.mrb[34].mxu1  ;;  %v1395_v51 = vpop.f32.mrb[38].mxu0  ;;  %v7650_v38 = vld [vmem:[#allocation11 + $0x64] ss:$16 sps:$4 sm:$0xff]   ;;  %v7671_v46 = vld [vmem:[#allocation11 + $0xe8] ss:$16 sps:$4 sm:$0xff]  }
 0x584   :  { %v4934_v52 = vmul.f32 -1.442695, %v1438_v45  ;;  %v5531_v53 = vpop.f32.mrb[35].mxu1  ;;  %v1396_v55 = vpop.f32.mrb[39].mxu0  ;;  %v7656_v41 = vld [vmem:[#allocation11 + $0x84] ss:$16 sps:$4 sm:$0xff]  }
 0x585   :  { %v4935_v56 = vmul.f32 -1.442695, %v1439_v49  ;;  %v7662_v43 = vld [vmem:[#allocation11 + $0xa4] ss:$16 sps:$4 sm:$0xff]   ;;  %v9292_v49 = vld [vmem:[#allocation36_spill] sm:$0xff]  ;;  %v9293_v51 = vld [vmem:[#allocation38_spill] sm:$0xff] }
 0x586   :  { %6436 = vpow2.f32 %v4934_v52  ;;  %v7668_v45 = vld [vmem:[#allocation11 + $0xc4] ss:$16 sps:$4 sm:$0xff]   ;;  %v507_v50 = vadd.f32 %v9292_v49, %v7220_v19  ;;  %v509_v52 = vadd.f32 %v9293_v51, %v7196_v3 }
 0x587   :  { %6438 = vpow2.f32 %v4935_v56  ;;  %v7674_v48 = vld [vmem:[#allocation11 + $0xe4] ss:$16 sps:$4 sm:$0xff]  }
 0x588   :  { %6440 = vtanh.f32 %v1355_v44  ;;  %v7665_v44 = vld [vmem:[#allocation11 + $0xc8] ss:$16 sps:$4 sm:$0xff]   ;;  %v9294_v53 = vld [vmem:[#allocation39_spill] sm:$0xff] }
 0x589   :  { %v580_v55 = vadd.f32 %v9294_v53, %v7352_v0 }
 0x590   :  { %v6437_v57 = vpop.eup %6436 }
 0x591   :  { %v6439_v58 = vpop.eup %6438  ;;  %v1450_v59 = vadd.f32 1.0, %v6437_v57 }
 0x592   :  { %v1451_v60 = vadd.f32 1.0, %v6439_v58  ;;  %v6441_v61 = vpop.eup %6440 }
 0x593   :  { %6442 = vrcp.f32 %v1450_v59 }
 0x594   :  { %6444 = vrcp.f32 %v1451_v60 }
 0x59d   :  { %v6443_v13 = vpop.eup %6442 }
 0x59e   :  { %v6445_v18 = vpop.eup %6444  ;;  %v1460_v20 = vmul.f32 %v6443_v13, %v6441_v61 }
 0x59f   :  { %v1459_v32 = vmul.f32 %v6445_v18, %v7501_v16 }
 0x5a1   :  { %v7570_v7 = vadd.f32 %v1460_v20, %v1459_v32  ;;  %v1432_v11 = vpop.f32.mrb[36].mxu1 }
 0x5a2   :  { %v1440_v2 = vadd.f32 %v1432_v11, %v578_v15  ;;  %v5550_v12 = vpop.f32.mrb[37].mxu1 }
 0x5a3   :  { %v1435_v17 = vpop.f32.mrb[38].mxu1 }
 0x5a4   :  { %v4936_v4 = vmul.f32 -1.442695, %v1440_v2  ;;  %v5551_v1 = vpop.f32.mrb[39].mxu1 }
 0x5a6   :  { %6446 = vpow2.f32 %v4936_v4 }
 0x5a7   :  { %6448 = vtanh.f32 %v7570_v7 }
 0x5b0   :  { %v6447_v25 = vpop.eup %6446 }
 0x5b1   :  { %v1452_v24 = vadd.f32 1.0, %v6447_v25  ;;  %v6449_v21 = vpop.eup %6448 }
 0x5b3   :  { %6450 = vrcp.f32 %v1452_v24 }
 0x5bd   :  { %v6451_v36 = vpop.eup %6450 }
 0x5be   :  { %v7573_v16 = vmul.f32 %v6451_v36, %v6449_v21 }
 0x5c0   :  { %v1466_v26 = vpack.c.bf16 %v7573_v16, %v7573_v16 }
 0x5c2   :  { %5569 = vmatmul.mubr.bf16.vlgmr.msra.gmra.mrb[40].mxu0 %v1466_v26  ;;  %1547 = vmatmul.mubr.bf16.vlgmr.msra.gmra.mrb[40].mxu1 %v1466_v26 }
 0x5c3   :  { %5573 = vmatpush3.bf16.msra.mxu0 %v7228_v31  ;;  %5588 = vmatprep.mubr.msk.bf16.mxu0 %vm6931_vm0, %v9284_v8  ;;  %v7595_v31 = vld [vmem:[#allocation11 + $0x40] ss:$16 sps:$4 sm:$0xff]  }
 0x5c4   :  { %5574 = vmatprep.subr.bf16.mxu0 %v9284_v8  ;;  %5593 = vmatpush3.bf16.msra.mxu1 %v7581_v28 }
 0x5c5   :  { %5594 = vmatprep.subr.bf16.mxu1 %v9284_v8  ;;  %5608 = vmatprep.mubr.msk.bf16.mxu1 %vm6931_vm0, %v9284_v8 }
 0x5c7   :  { %5575 = vmatpush3.bf16.msra.mxu0 %v7233_v33  ;;  %v7601_v33 = vld [vmem:[#allocation11 + $0x60] ss:$16 sps:$4 sm:$0xff]  }
 0x5c8   :  { %5576 = vmatprep.subr.bf16.mxu0 %v9284_v8  ;;  %5595 = vmatpush3.bf16.msra.mxu1 %v7589_v29 }
 0x5c9   :  { %5596 = vmatprep.subr.bf16.mxu1 %v9284_v8 }
 0x5cb   :  { %5577 = vmatpush3.bf16.msra.mxu0 %v7243_v40  ;;  %v7607_v40 = vld [vmem:[#allocation11 + $0x80] ss:$16 sps:$4 sm:$0xff]  }
 0x5cc   :  { %5578 = vmatprep.subr.bf16.mxu0 %v9284_v8  ;;  %5597 = vmatpush3.bf16.msra.mxu1 %v7595_v31 }
 0x5cd   :  { %5598 = vmatprep.subr.bf16.mxu1 %v9284_v8 }
 0x5cf   :  { %5579 = vmatpush3.bf16.msra.mxu0 %v7249_v47  ;;  %v7613_v47 = vld [vmem:[#allocation11 + $0xa0] ss:$16 sps:$4 sm:$0xff]  }
 0x5d0   :  { %5580 = vmatprep.subr.bf16.mxu0 %v9284_v8  ;;  %5599 = vmatpush3.bf16.msra.mxu1 %v7601_v33 }
 0x5d1   :  { %5600 = vmatprep.subr.bf16.mxu1 %v9284_v8 }
 0x5d3   :  { %5581 = vmatpush3.bf16.msra.mxu0 %v7255_v54  ;;  %v7619_v54 = vld [vmem:[#allocation11 + $0xc0] ss:$16 sps:$4 sm:$0xff]  }
 0x5d4   :  { %5582 = vmatprep.subr.bf16.mxu0 %v9284_v8  ;;  %5601 = vmatpush3.bf16.msra.mxu1 %v7607_v40 }
 0x5d5   :  { %5602 = vmatprep.subr.bf16.mxu1 %v9284_v8 }
 0x5d7   :  { %5583 = vmatpush3.bf16.msra.mxu0 %v7261_v62  ;;  %v7624_v62 = vld [vmem:[#allocation11 + $0x8] ss:$16 sps:$4 sm:$0xff]  }
 0x5d8   :  { %5584 = vmatprep.subr.bf16.mxu0 %v9284_v8  ;;  %5603 = vmatpush3.bf16.msra.mxu1 %v7613_v47 }
 0x5d9   :  { %5604 = vmatprep.subr.bf16.mxu1 %v9284_v8 }
 0x5db   :  { %5585 = vmatpush3.bf16.msra.mxu0 %v7267_v5  ;;  %v7631_v5 = vld [vmem:[#allocation11 + $0x4] ss:$16 sps:$4 sm:$0xff]  }
 0x5dc   :  { %5586 = vmatprep.subr.bf16.mxu0 %v9284_v8  ;;  %5605 = vmatpush3.bf16.msra.mxu1 %v7619_v54 }
 0x5dd   :  { %5606 = vmatprep.subr.bf16.mxu1 %v9284_v8 }
 0x5df   :  { %5587 = vmatpush3.bf16.msra.mxu0 %v7273_v6  ;;  %v7638_v6 = vld [vmem:[#allocation11 + $0x24] ss:$16 sps:$4 sm:$0xff]  }
 0x5e0   :  { %1671 = vmatprep.subr.bf16.mxu0 %v7624_v62  ;;  %5607 = vmatpush3.bf16.msra.mxu1 %v7627_v30 }
 0x5e1   :  { %5612 = vmatprep.subr.bf16.mxu1 %v9284_v8 }
 0x5e2   :  { %5589 = vmatmul.mubr.bf16.vlgmr.msra.gmra.mrb[44].mxu0 %v1466_v26  ;;  %v9295_v26 = vld [vmem:[#allocation40_spill] sm:$0xff] }
 0x5e3   :  { %1672 = vmatpush1.bf16.msra.mxu0 %v7631_v5  ;;  %1703 = vmatprep.mubr.bf16.mxu0 %v9285_v10  ;;  %v582_v49 = vadd.f32 %v9295_v26, %v7206_v9 }
 0x5e4   :  { %1673 = vmatprep.subr.bf16.mxu0 %v7635_v14 }
 0x5e7   :  { %1674 = vmatpush1.bf16.msra.mxu0 %v7638_v6 }
 0x5e8   :  { %1675 = vmatprep.subr.bf16.mxu0 %v7641_v34 }
 0x5eb   :  { %1676 = vmatpush1.bf16.msra.mxu0 %v7644_v35 }
 0x5ec   :  { %1677 = vmatprep.subr.bf16.mxu0 %v7647_v37 }
 0x5ef   :  { %1678 = vmatpush1.bf16.msra.mxu0 %v7650_v38 }
 0x5f0   :  { %1679 = vmatprep.subr.bf16.mxu0 %v7653_v39 }
 0x5f3   :  { %1680 = vmatpush1.bf16.msra.mxu0 %v7656_v41 }
 0x5f4   :  { %1681 = vmatprep.subr.bf16.mxu0 %v7659_v42 }
 0x5f7   :  { %1682 = vmatpush1.bf16.msra.mxu0 %v7662_v43 }
 0x5f8   :  { %1683 = vmatprep.subr.bf16.mxu0 %v7665_v44 }
 0x5fb   :  { %1684 = vmatpush1.bf16.msra.mxu0 %v7668_v45 }
 0x5fc   :  { %1685 = vmatprep.subr.bf16.mxu0 %v7671_v46 }
 0x5ff   :  { %1686 = vmatpush1.bf16.msra.mxu0 %v7674_v48 }
 0x600   :  { %5632 = vmatprep.subr.bf16.mxu0 %v9284_v8 }
 0x695   :  { %v1506_v56 = vpop.f32.mrb[40].mxu0  ;;  %v1548_v57 = vpop.f32.mrb[40].mxu1 }
 0x696   :  { %v1512_v58 = vadd.f32 %v1506_v56, %v507_v50  ;;  %v1595_v59 = vadd.f32 %v1548_v57, %v509_v52  ;;  %v5570_v60 = vpop.f32.mrb[41].mxu0  ;;  %v1550_v61 = vpop.f32.mrb[41].mxu1 }
 0x697   :  { %v1596_v13 = vadd.f32 %v1550_v61, %v580_v55  ;;  %v1509_v18 = vpop.f32.mrb[42].mxu0  ;;  %v1552_v20 = vpop.f32.mrb[42].mxu1 }
 0x698   :  { %v4937_v32 = vmul.f32 -1.442695, %v1595_v59  ;;  %v5571_v63 = vpop.f32.mrb[43].mxu0  ;;  %v1553_v15 = vpop.f32.mrb[43].mxu1  ;;  %v7694_v18 = vld [vmem:[#allocation11 + $0xc] ss:$16 sps:$4 sm:$0xff]  }
 0x699   :  { %v4938_v11 = vmul.f32 -1.442695, %v1596_v13  ;;  %v7704_v20 = vld [vmem:[#allocation11 + $0x2c] ss:$16 sps:$4 sm:$0xff]  }
 0x69a   :  { %6452 = vpow2.f32 %v4937_v32  ;;  %v7710_v32 = vld [vmem:[#allocation11 + $0x4c] ss:$16 sps:$4 sm:$0xff]  }
 0x69b   :  { %6454 = vpow2.f32 %v4938_v11 }
 0x69c   :  { %6456 = vtanh.f32 %v1512_v58 }
 0x6a4   :  { %v6453_v2 = vpop.eup %6452 }
 0x6a5   :  { %v6455_v12 = vpop.eup %6454  ;;  %v1607_v17 = vadd.f32 1.0, %v6453_v2 }
 0x6a6   :  { %v1608_v4 = vadd.f32 1.0, %v6455_v12  ;;  %v6457_v1 = vpop.eup %6456 }
 0x6a7   :  { %6458 = vrcp.f32 %v1607_v17 }
 0x6a8   :  { %6460 = vrcp.f32 %v1608_v4 }
 0x6b1   :  { %v6459_v25 = vpop.eup %6458 }
 0x6b2   :  { %v6461_v24 = vpop.eup %6460  ;;  %v1617_v21 = vmul.f32 %v6459_v25, %v6457_v1 }
 0x6b3   :  { %v1616_v36 = vmul.f32 %v6461_v24, %v7570_v7  ;;  %v9299_v24 = vld [vmem:[#allocation45_spill] sm:$0xff] }
 0x6b5   :  { %v7687_v50 = vadd.f32 %v1617_v21, %v1616_v36  ;;  %v1589_v51 = vpop.f32.mrb[44].mxu0  ;;  %v588_v21 = vadd.f32 %v9299_v24, %v7206_v9 }
 0x6b6   :  { %v1597_v52 = vadd.f32 %v1589_v51, %v582_v49  ;;  %v5590_v53 = vpop.f32.mrb[45].mxu0 }
 0x6b7   :  { %v1592_v55 = vpop.f32.mrb[46].mxu0 }
 0x6b8   :  { %v4939_v56 = vmul.f32 -1.442695, %v1597_v52  ;;  %v5591_v57 = vpop.f32.mrb[47].mxu0 }
 0x6ba   :  { %6462 = vpow2.f32 %v4939_v56 }
 0x6bb   :  { %6464 = vtanh.f32 %v7687_v50 }
 0x6c4   :  { %v6463_v58 = vpop.eup %6462 }
 0x6c5   :  { %v1609_v59 = vadd.f32 1.0, %v6463_v58  ;;  %v6465_v60 = vpop.eup %6464 }
 0x6c7   :  { %6466 = vrcp.f32 %v1609_v59 }
 0x6d1   :  { %v6467_v61 = vpop.eup %6466 }
 0x6d2   :  { %v7690_v7 = vmul.f32 %v6467_v61, %v6465_v60  ;;  %v9300_v61 = vld [vmem:[#allocation44_spill] sm:$0xff] }
 0x6d4   :  { %v1623_v13 = vpack.c.bf16 %v7690_v7, %v7690_v7 }
 0x6d6   :  { %5609 = vmatmul.mubr.bf16.vlgmr.msra.gmra.mrb[44].mxu1 %v1623_v13  ;;  %1704 = vmatmul.mubr.bf16.vlgmr.msra.gmra.mrb[48].mxu0 %v1623_v13 }
 0x6d7   :  { %5613 = vmatpush3.bf16.msra.mxu1 %v7694_v18  ;;  %5628 = vmatprep.mubr.msk.bf16.mxu1 %vm6931_vm0, %v9284_v8 }
 0x6d8   :  { %5614 = vmatprep.subr.bf16.mxu1 %v9284_v8  ;;  %5633 = vmatpush3.bf16.msra.mxu0 %v7581_v28  ;;  %v7716_v28 = vld [vmem:[#allocation11 + $0x6c] ss:$16 sps:$4 sm:$0xff]  }
 0x6d9   :  { %5634 = vmatprep.subr.bf16.mxu0 %v9284_v8  ;;  %5648 = vmatprep.mubr.msk.bf16.mxu0 %vm6931_vm0, %v9284_v8 }
 0x6db   :  { %5615 = vmatpush3.bf16.msra.mxu1 %v7704_v20 }
 0x6dc   :  { %5616 = vmatprep.subr.bf16.mxu1 %v9284_v8  ;;  %5635 = vmatpush3.bf16.msra.mxu0 %v7589_v29  ;;  %v7722_v29 = vld [vmem:[#allocation11 + $0x8c] ss:$16 sps:$4 sm:$0xff]  }
 0x6dd   :  { %5636 = vmatprep.subr.bf16.mxu0 %v9284_v8 }
 0x6df   :  { %5617 = vmatpush3.bf16.msra.mxu1 %v7710_v32 }
 0x6e0   :  { %5618 = vmatprep.subr.bf16.mxu1 %v9284_v8  ;;  %5637 = vmatpush3.bf16.msra.mxu0 %v7595_v31  ;;  %v7728_v31 = vld [vmem:[#allocation11 + $0xac] ss:$16 sps:$4 sm:$0xff]  }
 0x6e1   :  { %5638 = vmatprep.subr.bf16.mxu0 %v9284_v8 }
 0x6e3   :  { %5619 = vmatpush3.bf16.msra.mxu1 %v7716_v28 }
 0x6e4   :  { %5620 = vmatprep.subr.bf16.mxu1 %v9284_v8  ;;  %5639 = vmatpush3.bf16.msra.mxu0 %v7601_v33  ;;  %v7734_v33 = vld [vmem:[#allocation11 + $0xcc] ss:$16 sps:$4 sm:$0xff]  }
 0x6e5   :  { %5640 = vmatprep.subr.bf16.mxu0 %v9284_v8 }
 0x6e7   :  { %5621 = vmatpush3.bf16.msra.mxu1 %v7722_v29 }
 0x6e8   :  { %5622 = vmatprep.subr.bf16.mxu1 %v9284_v8  ;;  %5641 = vmatpush3.bf16.msra.mxu0 %v7607_v40  ;;  %v7740_v40 = vld [vmem:[#allocation11 + $0xec] ss:$16 sps:$4 sm:$0xff]  }
 0x6e9   :  { %5642 = vmatprep.subr.bf16.mxu0 %v9284_v8 }
 0x6eb   :  { %5623 = vmatpush3.bf16.msra.mxu1 %v7728_v31 }
 0x6ec   :  { %5624 = vmatprep.subr.bf16.mxu1 %v9284_v8  ;;  %5643 = vmatpush3.bf16.msra.mxu0 %v7613_v47  ;;  %v9296_v47 = vld [vmem:[#allocation41_spill] sm:$0xff] }
 0x6ed   :  { %5644 = vmatprep.subr.bf16.mxu0 %v9284_v8 }
 0x6ef   :  { %5625 = vmatpush3.bf16.msra.mxu1 %v7734_v33 }
 0x6f0   :  { %5626 = vmatprep.subr.bf16.mxu1 %v9284_v8  ;;  %5645 = vmatpush3.bf16.msra.mxu0 %v7619_v54  ;;  %v513_v54 = vadd.f32 %v9296_v47, %v7220_v19 }
 0x6f1   :  { %5646 = vmatprep.subr.bf16.mxu0 %v9284_v8 }
 0x6f3   :  { %5627 = vmatpush3.bf16.msra.mxu1 %v7740_v40 }
 0x6f4   :  { %1828 = vmatprep.subr.bf16.mxu1 %v7624_v62  ;;  %5647 = vmatpush3.bf16.msra.mxu0 %v7627_v30  ;;  %v9297_v62 = vld [vmem:[#allocation42_spill] sm:$0xff] }
 0x6f5   :  { %5652 = vmatprep.subr.bf16.mxu0 %v9284_v8  ;;  %v515_v30 = vadd.f32 %v9297_v62, %v7196_v3 }
 0x6f6   :  { %5629 = vmatmul.mubr.bf16.vlgmr.msra.gmra.mrb[48].mxu1 %v1623_v13  ;;  %v517_v13 = vadd.f32 %v9300_v61, %v7220_v19 }
 0x6f7   :  { %1829 = vmatpush1.bf16.msra.mxu1 %v7631_v5  ;;  %1860 = vmatprep.mubr.bf16.mxu1 %v9285_v10  ;;  %v9298_v5 = vld [vmem:[#allocation43_spill] sm:$0xff] }
 0x6f8   :  { %1830 = vmatprep.subr.bf16.mxu1 %v7635_v14  ;;  %v586_v14 = vadd.f32 %v9298_v5, %v7352_v0 }
 0x6fb   :  { %1831 = vmatpush1.bf16.msra.mxu1 %v7638_v6 }
 0x6fc   :  { %1832 = vmatprep.subr.bf16.mxu1 %v7641_v34 }
 0x6ff   :  { %1833 = vmatpush1.bf16.msra.mxu1 %v7644_v35 }
 0x700   :  { %1834 = vmatprep.subr.bf16.mxu1 %v7647_v37 }
 0x703   :  { %1835 = vmatpush1.bf16.msra.mxu1 %v7650_v38 }
 0x704   :  { %1836 = vmatprep.subr.bf16.mxu1 %v7653_v39 }
 0x707   :  { %1837 = vmatpush1.bf16.msra.mxu1 %v7656_v41 }
 0x708   :  { %1838 = vmatprep.subr.bf16.mxu1 %v7659_v42 }
 0x70b   :  { %1839 = vmatpush1.bf16.msra.mxu1 %v7662_v43 }
 0x70c   :  { %1840 = vmatprep.subr.bf16.mxu1 %v7665_v44 }
 0x70f   :  { %1841 = vmatpush1.bf16.msra.mxu1 %v7668_v45 }
 0x710   :  { %1842 = vmatprep.subr.bf16.mxu1 %v7671_v46 }
 0x713   :  { %1843 = vmatpush1.bf16.msra.mxu1 %v7674_v48 }
 0x7a9   :  { %v1663_v6 = vpop.f32.mrb[44].mxu1  ;;  %v1705_v34 = vpop.f32.mrb[48].mxu0 }
 0x7aa   :  { %v1669_v35 = vadd.f32 %v1663_v6, %v513_v54  ;;  %v1752_v37 = vadd.f32 %v1705_v34, %v515_v30  ;;  %v5610_v38 = vpop.f32.mrb[45].mxu1  ;;  %v1707_v39 = vpop.f32.mrb[49].mxu0 }
 0x7ab   :  { %v1753_v41 = vadd.f32 %v1707_v39, %v586_v14  ;;  %v1666_v42 = vpop.f32.mrb[46].mxu1  ;;  %v1709_v43 = vpop.f32.mrb[50].mxu0 }
 0x7ac   :  { %v4940_v44 = vmul.f32 -1.442695, %v1752_v37  ;;  %v5611_v45 = vpop.f32.mrb[47].mxu1  ;;  %v1710_v46 = vpop.f32.mrb[51].mxu0 }
 0x7ad   :  { %v4941_v48 = vmul.f32 -1.442695, %v1753_v41 }
 0x7ae   :  { %6468 = vpow2.f32 %v4940_v44  ;;  %v9303_v44 = vld [vmem:[#allocation48_spill] sm:$0xff] }
 0x7af   :  { %6470 = vpow2.f32 %v4941_v48  ;;  %v592_v45 = vadd.f32 %v9303_v44, %v7206_v9 }
 0x7b0   :  { %6472 = vtanh.f32 %v1669_v35 }
 0x7b8   :  { %v6469_v63 = vpop.eup %6468 }
 0x7b9   :  { %v6471_v15 = vpop.eup %6470  ;;  %v1764_v11 = vadd.f32 1.0, %v6469_v63 }
 0x7ba   :  { %v1765_v2 = vadd.f32 1.0, %v6471_v15  ;;  %v6473_v12 = vpop.eup %6472 }
 0x7bb   :  { %6474 = vrcp.f32 %v1764_v11 }
 0x7bc   :  { %6476 = vrcp.f32 %v1765_v2 }
 0x7c5   :  { %v6475_v17 = vpop.eup %6474 }
 0x7c6   :  { %v6477_v4 = vpop.eup %6476  ;;  %v1774_v1 = vmul.f32 %v6475_v17, %v6473_v12 }
 0x7c7   :  { %v1773_v25 = vmul.f32 %v6477_v4, %v7687_v50 }
 0x7c9   :  { %v7771_v36 = vadd.f32 %v1774_v1, %v1773_v25  ;;  %v1746_v26 = vpop.f32.mrb[48].mxu1 }
 0x7ca   :  { %v1754_v49 = vadd.f32 %v1746_v26, %v588_v21  ;;  %v5630_v51 = vpop.f32.mrb[49].mxu1 }
 0x7cb   :  { %v1749_v52 = vpop.f32.mrb[50].mxu1 }
 0x7cc   :  { %v4942_v53 = vmul.f32 -1.442695, %v1754_v49  ;;  %v5631_v55 = vpop.f32.mrb[51].mxu1 }
 0x7ce   :  { %6478 = vpow2.f32 %v4942_v53 }
 0x7cf   :  { %6480 = vtanh.f32 %v7771_v36 }
 0x7d8   :  { %v6479_v56 = vpop.eup %6478 }
 0x7d9   :  { %v1766_v57 = vadd.f32 1.0, %v6479_v56  ;;  %v6481_v58 = vpop.eup %6480 }
 0x7db   :  { %6482 = vrcp.f32 %v1766_v57 }
 0x7e5   :  { %v6483_v59 = vpop.eup %6482 }
 0x7e6   :  { %v7774_v50 = vmul.f32 %v6483_v59, %v6481_v58 }
 0x7e8   :  { %v1780_v60 = vpack.c.bf16 %v7774_v50, %v7774_v50 }
 0x7ea   :  { %5649 = vmatmul.mubr.bf16.vlgmr.msra.gmra.mrb[52].mxu0 %v1780_v60  ;;  %1861 = vmatmul.mubr.bf16.vlgmr.msra.gmra.mrb[52].mxu1 %v1780_v60 }
 0x7eb   :  { %5653 = vmatpush3.bf16.msra.mxu0 %v7694_v18  ;;  %5668 = vmatprep.mubr.msk.bf16.mxu0 %vm6931_vm0, %v9284_v8  ;;  %v9301_v18 = vld [vmem:[#allocation46_spill] sm:$0xff] }
 0x7ec   :  { %5654 = vmatprep.subr.bf16.mxu0 %v9284_v8 }
 0x7ef   :  { %5655 = vmatpush3.bf16.msra.mxu0 %v7704_v20  ;;  %v519_v20 = vadd.f32 %v9301_v18, %v7196_v3 }
 0x7f0   :  { %5656 = vmatprep.subr.bf16.mxu0 %v9284_v8 }
 0x7f3   :  { %5657 = vmatpush3.bf16.msra.mxu0 %v7710_v32  ;;  %v9302_v32 = vld [vmem:[#allocation47_spill] sm:$0xff] }
 0x7f4   :  { %5658 = vmatprep.subr.bf16.mxu0 %v9284_v8 }
 0x7f7   :  { %5659 = vmatpush3.bf16.msra.mxu0 %v7716_v28  ;;  %v590_v28 = vadd.f32 %v9302_v32, %v7352_v0 }
 0x7f8   :  { %5660 = vmatprep.subr.bf16.mxu0 %v9284_v8 }
 0x7fb   :  { %5661 = vmatpush3.bf16.msra.mxu0 %v7722_v29 }
 0x7fc   :  { %5662 = vmatprep.subr.bf16.mxu0 %v9284_v8 }
 0x7ff   :  { %5663 = vmatpush3.bf16.msra.mxu0 %v7728_v31 }
 0x800   :  { %5664 = vmatprep.subr.bf16.mxu0 %v9284_v8 }
 0x803   :  { %5665 = vmatpush3.bf16.msra.mxu0 %v7734_v33 }
 0x804   :  { %5666 = vmatprep.subr.bf16.mxu0 %v9284_v8 }
 0x807   :  { %5667 = vmatpush3.bf16.msra.mxu0 %v7740_v40 }
 0x80a   :  { %5669 = vmatmul.mubr.bf16.vlgmr.msra.gmra.mrb[56].mxu0 %v1780_v60 }
 0x8bd   :  { %v1820_v29 = vpop.f32.mrb[52].mxu0  ;;  %v1862_v31 = vpop.f32.mrb[52].mxu1 }
 0x8be   :  { %v1826_v47 = vadd.f32 %v1820_v29, %v517_v13  ;;  %v1909_v54 = vadd.f32 %v1862_v31, %v519_v20  ;;  %v5650_v62 = vpop.f32.mrb[53].mxu0  ;;  %v1864_v33 = vpop.f32.mrb[53].mxu1 }
 0x8bf   :  { %v1910_v30 = vadd.f32 %v1864_v33, %v590_v28  ;;  %v1823_v5 = vpop.f32.mrb[54].mxu0  ;;  %v1866_v14 = vpop.f32.mrb[54].mxu1 }
 0x8c0   :  { %v4943_v40 = vmul.f32 -1.442695, %v1909_v54  ;;  %v5651_v6 = vpop.f32.mrb[55].mxu0  ;;  %v1867_v34 = vpop.f32.mrb[55].mxu1 }
 0x8c1   :  { %v4944_v35 = vmul.f32 -1.442695, %v1910_v30 }
 0x8c2   :  { %6484 = vpow2.f32 %v4943_v40 }
 0x8c3   :  { %6486 = vpow2.f32 %v4944_v35 }
 0x8c4   :  { %6488 = vtanh.f32 %v1826_v47 }
 0x8cc   :  { %v6485_v19 = vpop.eup %6484 }
 0x8cd   :  { %v6487_v3 = vpop.eup %6486  ;;  %v1921_v37 = vadd.f32 1.0, %v6485_v19 }
 0x8ce   :  { %v1922_v0 = vadd.f32 1.0, %v6487_v3  ;;  %v6489_v38 = vpop.eup %6488 }
 0x8cf   :  { %6490 = vrcp.f32 %v1921_v37 }
 0x8d0   :  { %6492 = vrcp.f32 %v1922_v0 }
 0x8d9   :  { %v6491_v39 = vpop.eup %6490 }
 0x8da   :  { %v6493_v41 = vpop.eup %6492  ;;  %v1931_v42 = vmul.f32 %v6491_v39, %v6489_v38 }
 0x8db   :  { %v1930_v43 = vmul.f32 %v6493_v41, %v7771_v36 }
 0x8dd   :  { %v1932_v46 = vadd.f32 %v1931_v42, %v1930_v43  ;;  %v1903_v48 = vpop.f32.mrb[56].mxu0 }
 0x8de   :  { %v1911_v63 = vadd.f32 %v1903_v48, %v592_v45  ;;  %v5670_v15 = vpop.f32.mrb[57].mxu0 }
 0x8df   :  { %v1906_v11 = vpop.f32.mrb[58].mxu0 }
 0x8e0   :  { %v4945_v2 = vmul.f32 -1.442695, %v1911_v63  ;;  %v5671_v12 = vpop.f32.mrb[59].mxu0 }
 0x8e2   :  { %6494 = vpow2.f32 %v4945_v2 }
 0x8e3   :  { %6496 = vtanh.f32 %v1932_v46 }
 0x8ec   :  { %v6495_v17 = vpop.eup %6494 }
 0x8ed   :  { %v1923_v4 = vadd.f32 1.0, %v6495_v17  ;;  %v6497_v1 = vpop.eup %6496 }
 0x8ef   :  { %6498 = vrcp.f32 %v1923_v4 }
 0x8f9   :  { %v6499_v25 = vpop.eup %6498 }
 0x8fa   :  { %v7804_v24 = vmul.f32 %v6499_v25, %v6497_v1 }
 0x8fb   :  { %6900 = dma.done.wait [#allocation8], 4096 }
 0x8fc   :  { %6901 = vsyncadd [#allocation8], 4294963200 }
 0x8fd   :  { %6902 = dma.done.wait [#allocation8 + $0x1], 4096 }
 0x8fe   :  { %6903 = vsyncadd [#allocation8 + $0x1], 4294963200  ;;  %2041 = vmatprep.mubr.bf16.mxu1 %v9285_v10  ;;  %2114 = vmatprep.mubr.bf16.mxu0 %v9285_v10  ;;  %v1956_v9 = vld [vmem:[#allocation4 + $0x8] sm:$0xff]  ;;  %v1955_v21 = vld [vmem:[#allocation4] sm:$0xff]  ;;  %v1952_v39 = vpack.c.bf16 %v7504_v23, %v7435_v22  ;;  %v1953_v45 = vpack.c.bf16 %v7690_v7, %v7573_v16  ;;  %v1954_v11 = vpack.c.bf16 %v7804_v24, %v7774_v50 }
 0x8ff   :  { %v1960_v36 = vld [vmem:[#allocation4 + $0x28] sm:$0xff]  ;;  %2009 = vmatprep.subr.bf16.mxu1 %v1956_v9  ;;  %v1958_v26 = vld [vmem:[#allocation4 + $0x18] sm:$0xff]  ;;  %v1957_v49 = vld [vmem:[#allocation4 + $0x10] sm:$0xff] }
 0x900   :  { %2010 = vmatpush1.bf16.msra.mxu1 %v1955_v21  ;;  %v1959_v51 = vld [vmem:[#allocation4 + $0x20] sm:$0xff]  ;;  %2082 = vmatprep.subr.bf16.mxu0 %v1958_v26  ;;  %v1962_v52 = vld [vmem:[#allocation4 + $0x38] sm:$0xff]  ;;  %v1964_v53 = vld [vmem:[#allocation4 + $0x48] sm:$0xff] }
 0x901   :  { %2011 = vmatprep.subr.bf16.mxu1 %v1960_v36  ;;  %2083 = vmatpush1.bf16.msra.mxu0 %v1957_v49  ;;  %v1961_v55 = vld [vmem:[#allocation4 + $0x30] sm:$0xff]  ;;  %v1966_v56 = vld [vmem:[#allocation4 + $0x58] sm:$0xff]  ;;  %v1963_v57 = vld [vmem:[#allocation4 + $0x40] sm:$0xff] }
 0x902   :  { %2084 = vmatprep.subr.bf16.mxu0 %v1962_v52  ;;  %v1968_v58 = vld [vmem:[#allocation4 + $0x68] sm:$0xff]  ;;  %v1965_v59 = vld [vmem:[#allocation4 + $0x50] sm:$0xff]  ;;  %v1970_v60 = vld [vmem:[#allocation4 + $0x78] sm:$0xff] }
 0x903   :  { %v1967_v61 = vld [vmem:[#allocation4 + $0x60] sm:$0xff]  ;;  %v1972_v13 = vld [vmem:[#allocation4 + $0x88] sm:$0xff]  ;;  %v1969_v18 = vld [vmem:[#allocation4 + $0x70] sm:$0xff] }
 0x904   :  { %2012 = vmatpush1.bf16.msra.mxu1 %v1959_v51  ;;  %v1974_v20 = vld [vmem:[#allocation4 + $0x98] sm:$0xff]  ;;  %v1971_v32 = vld [vmem:[#allocation4 + $0x80] sm:$0xff]  ;;  %v1976_v28 = vld [vmem:[#allocation4 + $0xa8] sm:$0xff] }
 0x905   :  { %2013 = vmatprep.subr.bf16.mxu1 %v1964_v53  ;;  %2085 = vmatpush1.bf16.msra.mxu0 %v1961_v55  ;;  %v1973_v29 = vld [vmem:[#allocation4 + $0x90] sm:$0xff]  ;;  %v1978_v31 = vld [vmem:[#allocation4 + $0xb8] sm:$0xff]  ;;  %v1975_v47 = vld [vmem:[#allocation4 + $0xa0] sm:$0xff] }
 0x906   :  { %2086 = vmatprep.subr.bf16.mxu0 %v1966_v56  ;;  %v1980_v54 = vld [vmem:[#allocation4 + $0xc8] sm:$0xff]  ;;  %v1977_v62 = vld [vmem:[#allocation4 + $0xb0] sm:$0xff]  ;;  %v1982_v33 = vld [vmem:[#allocation4 + $0xd8] sm:$0xff] }
 0x907   :  { %v1979_v30 = vld [vmem:[#allocation4 + $0xc0] sm:$0xff]  ;;  %v1984_v5 = vld [vmem:[#allocation4 + $0xe8] sm:$0xff]  ;;  %v1981_v14 = vld [vmem:[#allocation4 + $0xd0] sm:$0xff] }
 0x908   :  { %2014 = vmatpush1.bf16.msra.mxu1 %v1963_v57  ;;  %v1986_v40 = vld [vmem:[#allocation4 + $0xf8] sm:$0xff]  ;;  %v1983_v6 = vld [vmem:[#allocation4 + $0xe0] sm:$0xff]  ;;  %v1985_v19 = vld [vmem:[#allocation4 + $0xf0] sm:$0xff] }
 0x909   :  { %2015 = vmatprep.subr.bf16.mxu1 %v1968_v58  ;;  %2087 = vmatpush1.bf16.msra.mxu0 %v1965_v59  ;;  %v9304_v34 = vld [vmem:[#allocation30_spill] sm:$0xff]  ;;  %v7813_v3 = vld [vmem:[#allocation5] sm:$0xff]  ;;  %v7815_v37 = vld [vmem:[#allocation5 + $0x10] sm:$0xff] }
 0x90a   :  { %2088 = vmatprep.subr.bf16.mxu0 %v1970_v60  ;;  %v1951_v35 = vpack.c.bf16 %v7366_v27, %v9304_v34  ;;  %v7819_v27 = vld [vmem:[#allocation5 + $0x8] sm:$0xff]  ;;  %v7823_v0 = vld [vmem:[#allocation5 + $0x20] sm:$0xff]  ;;  %v7825_v38 = vld [vmem:[#allocation5 + $0x30] sm:$0xff] }
 0x90b   :  { %v7831_v41 = vld [vmem:[#allocation5 + $0x28] sm:$0xff]  ;;  %v7835_v42 = vld [vmem:[#allocation5 + $0x40] sm:$0xff]  ;;  %v7837_v43 = vld [vmem:[#allocation5 + $0x50] sm:$0xff] }
 0x90c   :  { %2016 = vmatpush1.bf16.msra.mxu1 %v1967_v61  ;;  %v7843_v22 = vld [vmem:[#allocation5 + $0x48] sm:$0xff]  ;;  %v7847_v23 = vld [vmem:[#allocation5 + $0x60] sm:$0xff]  ;;  %v7849_v44 = vld [vmem:[#allocation5 + $0x70] sm:$0xff] }
 0x90d   :  { %2017 = vmatprep.subr.bf16.mxu1 %v1972_v13  ;;  %2089 = vmatpush1.bf16.msra.mxu0 %v1969_v18  ;;  %v7855_v46 = vld [vmem:[#allocation5 + $0x68] sm:$0xff]  ;;  %v7859_v48 = vld [vmem:[#allocation5 + $0x80] sm:$0xff]  ;;  %v7861_v63 = vld [vmem:[#allocation5 + $0x90] sm:$0xff] }
 0x90e   :  { %2090 = vmatprep.subr.bf16.mxu0 %v1974_v20  ;;  %v7867_v16 = vld [vmem:[#allocation5 + $0x88] sm:$0xff]  ;;  %v7871_v7 = vld [vmem:[#allocation5 + $0xa0] sm:$0xff]  ;;  %v7873_v15 = vld [vmem:[#allocation5 + $0xb0] sm:$0xff] }
 0x90f   :  { %v7878_v2 = vld [vmem:[#allocation5 + $0xa8] sm:$0xff]  ;;  %v7881_v12 = vld [vmem:[#allocation5 + $0xd0] sm:$0xff]  ;;  %v7884_v17 = vld [vmem:[#allocation5 + $0xc0] sm:$0xff] }
 0x910   :  { %2018 = vmatpush1.bf16.msra.mxu1 %v1971_v32  ;;  %v7887_v4 = vld [vmem:[#allocation5 + $0xc8] sm:$0xff]  ;;  %v7890_v50 = vld [vmem:[#allocation5 + $0xf0] sm:$0xff]  ;;  %v7898_v1 = vld [vmem:[#allocation5 + $0xe0] sm:$0xff] }
 0x911   :  { %2019 = vmatprep.subr.bf16.mxu1 %v1976_v28  ;;  %2091 = vmatpush1.bf16.msra.mxu0 %v1973_v29  ;;  %v7901_v25 = vld [vmem:[#allocation5 + $0xe8] sm:$0xff]  ;;  %v7910_v24 = vld [vmem:[%s9240_s6] sm:$0xf]  ;;  %v9307_v18 = vld [vmem:[#allocation29_spill] sm:$0xff] }
 0x912   :  { %2092 = vmatprep.subr.bf16.mxu0 %v1978_v31  ;;  %v9305_v9 = vld [vmem:[#allocation27_spill] sm:$0xff]  ;;  %v9306_v49 = vld [vmem:[#allocation28_spill] sm:$0xff]  ;;  %v7932_v20 = vrot.slane %v7910_v24, %v9307_v18  ;;  %v7948_v34 = vld [vmem:[#allocation5 + $0x38] sm:$0xff] }
 0x913   :  { %v7914_v21 = vrot.slane %v7910_v24, %v9305_v9  ;;  %v7918_v51 = vrot.slane %v7910_v24, %v9306_v49 }
 0x914   :  { %2020 = vmatpush1.bf16.msra.mxu1 %v1975_v47 }
 0x915   :  { %2021 = vmatprep.subr.bf16.mxu1 %v1980_v54  ;;  %2093 = vmatpush1.bf16.msra.mxu0 %v1977_v62 }
 0x916   :  { %2094 = vmatprep.subr.bf16.mxu0 %v1982_v33 }
 0x918   :  { %2022 = vmatpush1.bf16.msra.mxu1 %v1979_v30 }
 0x919   :  { %2023 = vmatprep.subr.bf16.mxu1 %v1984_v5  ;;  %2095 = vmatpush1.bf16.msra.mxu0 %v1981_v14 }
 0x91a   :  { %2096 = vmatprep.subr.bf16.mxu0 %v1986_v40 }
 0x91c   :  { %2024 = vmatpush1.bf16.msra.mxu1 %v1983_v6  ;;  %v7942_v6 = vld [vmem:[#allocation5 + $0x18] sm:$0xff] }
 0x91d   :  { %5672 = vmatprep.subr.bf16.mxu1 %v9284_v8  ;;  %2097 = vmatpush1.bf16.msra.mxu0 %v1985_v19  ;;  %v7962_v19 = vld [vmem:[#allocation5 + $0x78] sm:$0xff] }
 0x91e   :  { %2286 = vmatprep.subr.bf16.mxu0 %v7815_v37 }
 0x91f   :  { %2042 = vmatmul.mubr.bf16.vlgmr.msra.gmra.mrb[56].mxu1 %v1951_v35 }
 0x920   :  { %2051 = vmatprep.mubr.bf16.mxu1 %v9285_v10  ;;  %2115 = vmatmul.mubr.bf16.vlgmr.msra.gmra.mrb[60].mxu0 %v1951_v35  ;;  %v7956_v35 = vld [vmem:[#allocation5 + $0x58] sm:$0xff] }
 0x921   :  { %2124 = vmatprep.mubr.bf16.mxu0 %v9285_v10  ;;  %5673 = vmatpush3.bf16.msra.mxu1 %v7813_v3 }
 0x922   :  { %2287 = vmatpush1.bf16.msra.mxu0 %v7819_v27  ;;  %5674 = vmatprep.subr.bf16.mxu1 %v9284_v8 }
 0x923   :  { %2288 = vmatprep.subr.bf16.mxu0 %v7825_v38 }
 0x925   :  { %5675 = vmatpush3.bf16.msra.mxu1 %v7823_v0 }
 0x926   :  { %2289 = vmatpush1.bf16.msra.mxu0 %v7831_v41  ;;  %5676 = vmatprep.subr.bf16.mxu1 %v9284_v8 }
 0x927   :  { %2052 = vmatmul.mubr.bf16.gmra.mrb[60].mxu1 %v1952_v39  ;;  %2290 = vmatprep.subr.bf16.mxu0 %v7837_v43 }
 0x928   :  { %2125 = vmatmul.mubr.bf16.gmra.mrb[64].mxu0 %v1952_v39  ;;  %2061 = vmatprep.mubr.bf16.mxu1 %v9285_v10  ;;  %v7968_v39 = vld [vmem:[#allocation5 + $0x98] sm:$0xff] }
 0x929   :  { %2134 = vmatprep.mubr.bf16.mxu0 %v9285_v10  ;;  %5677 = vmatpush3.bf16.msra.mxu1 %v7835_v42 }
 0x92a   :  { %2291 = vmatpush1.bf16.msra.mxu0 %v7843_v22  ;;  %5678 = vmatprep.subr.bf16.mxu1 %v9284_v8 }
 0x92b   :  { %2292 = vmatprep.subr.bf16.mxu0 %v7849_v44 }
 0x92d   :  { %5679 = vmatpush3.bf16.msra.mxu1 %v7847_v23 }
 0x92e   :  { %2293 = vmatpush1.bf16.msra.mxu0 %v7855_v46  ;;  %5680 = vmatprep.subr.bf16.mxu1 %v9284_v8 }
 0x92f   :  { %2062 = vmatmul.mubr.bf16.gmra.mrb[64].mxu1 %v1953_v45  ;;  %2294 = vmatprep.subr.bf16.mxu0 %v7861_v63 }
 0x930   :  { %2135 = vmatmul.mubr.bf16.gmra.mrb[68].mxu0 %v1953_v45  ;;  %2071 = vmatprep.mubr.bf16.mxu1 %v9285_v10  ;;  %v7974_v45 = vld [vmem:[#allocation5 + $0xb8] sm:$0xff] }
 0x931   :  { %2144 = vmatprep.mubr.bf16.mxu0 %v9285_v10  ;;  %5681 = vmatpush3.bf16.msra.mxu1 %v7859_v48 }
 0x932   :  { %2295 = vmatpush1.bf16.msra.mxu0 %v7867_v16  ;;  %5682 = vmatprep.subr.bf16.mxu1 %v9284_v8 }
 0x933   :  { %2296 = vmatprep.subr.bf16.mxu0 %v7873_v15 }
 0x935   :  { %5683 = vmatpush3.bf16.msra.mxu1 %v7871_v7 }
 0x936   :  { %2297 = vmatpush1.bf16.msra.mxu0 %v7878_v2  ;;  %5684 = vmatprep.subr.bf16.mxu1 %v9284_v8 }
 0x937   :  { %2072 = vmatmul.mubr.bf16.gmra.mrb[68].mxu1 %v1954_v11  ;;  %2298 = vmatprep.subr.bf16.mxu0 %v7881_v12 }
 0x938   :  { %2145 = vmatmul.mubr.bf16.gmra.mrb[72].mxu0 %v1954_v11  ;;  %5688 = vmatprep.mubr.msk.bf16.mxu1 %vm6931_vm0, %v9284_v8  ;;  %v7980_v11 = vld [vmem:[#allocation5 + $0xd8] sm:$0xff] }
 0x939   :  { %5685 = vmatpush3.bf16.msra.mxu1 %v7884_v17  ;;  %2318 = vmatprep.mubr.bf16.mxu0 %v9285_v10 }
 0x93a   :  { %2299 = vmatpush1.bf16.msra.mxu0 %v7887_v4  ;;  %5686 = vmatprep.subr.bf16.mxu1 %v9284_v8 }
 0x93b   :  { %2300 = vmatprep.subr.bf16.mxu0 %v7890_v50 }
 0x93d   :  { %5687 = vmatpush3.bf16.msra.mxu1 %v7898_v1 }
 0x93e   :  { %2301 = vmatpush1.bf16.msra.mxu0 %v7901_v25  ;;  %5692 = vmatprep.subr.bf16.mxu1 %v9284_v8 }
 0x93f   :  { %5712 = vmatprep.subr.bf16.mxu0 %v9284_v8 }
 0x9f2   :  { %v2043_v36 = vpop.f32.mrb[56].mxu1 }
 0x9f3   :  { %v2045_v26 = vpop.f32.mrb[57].mxu1  ;;  %v2116_v55 = vpop.f32.mrb[60].mxu0  ;;  %v2044_v32 = vadd.f32 %v2043_v36, %v7932_v20  ;;  %v7986_v36 = vld [vmem:[#allocation5 + $0xf8] sm:$0xff] }
 0x9f4   :  { %v2046_v52 = vadd.f32 %v2045_v26, %v7914_v21  ;;  %v7921_v53 = vpop.f32.mrb[58].mxu1  ;;  %v2118_v57 = vpop.f32.mrb[61].mxu0 }
 0x9f5   :  { %v7923_v56 = vpop.f32.mrb[59].mxu1  ;;  %v7925_v59 = vpop.f32.mrb[62].mxu0  ;;  %v2119_v60 = vadd.f32 %v2118_v57, %v7918_v51 }
 0x9f6   :  { %v4946_v58 = vmul.f32 -1.442695, %v2046_v52  ;;  %v7928_v61 = vpop.f32.mrb[63].mxu0 }
 0x9f7   :  { %v4947_v13 = vmul.f32 -1.442695, %v2119_v60 }
 0x9f8   :  { %6532 = vpow2.f32 %v4946_v58 }
 0x9f9   :  { %6534 = vpow2.f32 %v4947_v13 }
 0x9fa   :  { %6536 = vtanh.f32 %v2044_v32  ;;  %v8007_v26 = vpop.f32.mrb[60].mxu1 }
 0x9fb   :  { %v8009_v52 = vpop.f32.mrb[61].mxu1  ;;  %v8011_v55 = vpop.f32.mrb[64].mxu0 }
 0x9fc   :  { %v8014_v57 = vpop.f32.mrb[62].mxu1  ;;  %v8016_v58 = vpop.f32.mrb[65].mxu0 }
 0x9fd   :  { %9309 = vst [vmem:[#allocation32_spill] sm:$0xff] %v8014_v57  ;;  %v8019_v60 = vpop.f32.mrb[63].mxu1  ;;  %v8021_v13 = vpop.f32.mrb[66].mxu0 }
 0x9fe   :  { %9310 = vst [vmem:[#allocation33_spill] sm:$0xff] %v8019_v60  ;;  %9311 = vst [vmem:[#allocation34_spill] sm:$0xff] %v8021_v13  ;;  %v8023_v32 = vpop.f32.mrb[67].mxu0 }
 0x9ff   :  { %9312 = vst [vmem:[#allocation35_spill] sm:$0xff] %v8023_v32 }
 0xa02   :  { %v6533_v28 = vpop.eup %6532 }
 0xa03   :  { %v2229_v29 = vadd.f32 1.0, %v6533_v28  ;;  %v6535_v31 = vpop.eup %6534  ;;  %v8027_v28 = vpop.f32.mrb[64].mxu1 }
 0xa04   :  { %v2230_v47 = vadd.f32 1.0, %v6535_v31  ;;  %v6537_v54 = vpop.eup %6536  ;;  %9313 = vst [vmem:[#allocation37_spill] sm:$0xff] %v8027_v28  ;;  %v8031_v31 = vpop.f32.mrb[68].mxu0 }
 0xa05   :  { %6538 = vrcp.f32 %v2229_v29  ;;  %v8029_v29 = vpop.f32.mrb[65].mxu1  ;;  %9315 = vst [vmem:[#allocation38_spill] sm:$0xff] %v8031_v31 }
 0xa06   :  { %6540 = vrcp.f32 %v2230_v47  ;;  %9314 = vst [vmem:[#allocation36_spill] sm:$0xff] %v8029_v29  ;;  %v8033_v47 = vpop.f32.mrb[66].mxu1 }
 0xa07   :  { %9316 = vst [vmem:[#allocation39_spill] sm:$0xff] %v8033_v47 }
 0xa0f   :  { %v6539_v62 = vpop.eup %6538 }
 0xa10   :  { %v7935_v33 = vmul.f32 %v6539_v62, %v6537_v54  ;;  %v6541_v30 = vpop.eup %6540  ;;  %v8035_v54 = vpop.f32.mrb[69].mxu0 }
 0xa11   :  { %9317 = vst [vmem:[#allocation40_spill] sm:$0xff] %v8035_v54  ;;  %v8037_v62 = vpop.f32.mrb[67].mxu1 }
 0xa12   :  { %6542 = vtanh.f32 %v7935_v33  ;;  %9318 = vst [vmem:[#allocation41_spill] sm:$0xff] %v8037_v62  ;;  %v9329_v62 = vld [vmem:[#allocation49_spill] sm:$0xff] }
 0xa1c   :  { %v6543_v5 = vpop.eup %6542 }
 0xa1d   :  { %v7938_v14 = vmul.f32 %v6543_v5, %v6541_v30  ;;  %v8039_v30 = vpop.f32.mrb[70].mxu0 }
 0xa1e   :  { %9319 = vst [vmem:[#allocation42_spill] sm:$0xff] %v8039_v30  ;;  %v8041_v5 = vpop.f32.mrb[71].mxu0  ;;  %v8061_v30 = vrot.slane %v7910_v24, %v9329_v62 }
 0xa1f   :  { %9308 = vst [vmem:[#allocation31_spill] sm:$0xff] %v7938_v14  ;;  %v2239_v40 = vpack.c.bf16 %v7938_v14, %v7938_v14  ;;  %9320 = vst [vmem:[#allocation43_spill] sm:$0xff] %v8041_v5  ;;  %v8047_v49 = vpop.f32.mrb[72].mxu0 }
 0xa20   :  { %9323 = vst [vmem:[#allocation46_spill] sm:$0xff] %v8047_v49  ;;  %v8051_v14 = vpop.f32.mrb[73].mxu0  ;;  %v2050_v49 = vadd.f32 %v7923_v56, %v7914_v21 }
 0xa21   :  { %5689 = vmatmul.mubr.bf16.vlgmr.msra.gmra.mrb[72].mxu1 %v2239_v40  ;;  %2319 = vmatmul.mubr.bf16.vlgmr.msra.gmra.mrb[76].mxu0 %v2239_v40  ;;  %9325 = vst [vmem:[#allocation48_spill] sm:$0xff] %v8051_v14  ;;  %v8055_v47 = vpop.f32.mrb[74].mxu0 }
 0xa22   :  { %5693 = vmatpush3.bf16.msra.mxu1 %v7942_v6  ;;  %5708 = vmatprep.mubr.msk.bf16.mxu1 %vm6931_vm0, %v9284_v8  ;;  %9327 = vst [vmem:[#allocation50_spill] sm:$0xff] %v8055_v47  ;;  %v8057_v54 = vpop.f32.mrb[75].mxu0 }
 0xa23   :  { %5694 = vmatprep.subr.bf16.mxu1 %v9284_v8  ;;  %5713 = vmatpush3.bf16.msra.mxu0 %v7813_v3  ;;  %9328 = vst [vmem:[#allocation51_spill] sm:$0xff] %v8057_v54 }
 0xa24   :  { %5714 = vmatprep.subr.bf16.mxu0 %v9284_v8  ;;  %5728 = vmatprep.mubr.msk.bf16.mxu0 %vm6931_vm0, %v9284_v8 }
 0xa26   :  { %5695 = vmatpush3.bf16.msra.mxu1 %v7948_v34 }
 0xa27   :  { %5696 = vmatprep.subr.bf16.mxu1 %v9284_v8  ;;  %5715 = vmatpush3.bf16.msra.mxu0 %v7823_v0 }
 0xa28   :  { %5716 = vmatprep.subr.bf16.mxu0 %v9284_v8 }
 0xa2a   :  { %5697 = vmatpush3.bf16.msra.mxu1 %v7956_v35 }
 0xa2b   :  { %5698 = vmatprep.subr.bf16.mxu1 %v9284_v8  ;;  %5717 = vmatpush3.bf16.msra.mxu0 %v7835_v42 }
 0xa2c   :  { %5718 = vmatprep.subr.bf16.mxu0 %v9284_v8 }
 0xa2e   :  { %5699 = vmatpush3.bf16.msra.mxu1 %v7962_v19 }
 0xa2f   :  { %5700 = vmatprep.subr.bf16.mxu1 %v9284_v8  ;;  %5719 = vmatpush3.bf16.msra.mxu0 %v7847_v23 }
 0xa30   :  { %5720 = vmatprep.subr.bf16.mxu0 %v9284_v8 }
 0xa32   :  { %5701 = vmatpush3.bf16.msra.mxu1 %v7968_v39 }
 0xa33   :  { %5702 = vmatprep.subr.bf16.mxu1 %v9284_v8  ;;  %5721 = vmatpush3.bf16.msra.mxu0 %v7859_v48 }
 0xa34   :  { %5722 = vmatprep.subr.bf16.mxu0 %v9284_v8 }
 0xa36   :  { %5703 = vmatpush3.bf16.msra.mxu1 %v7974_v45 }
 0xa37   :  { %5704 = vmatprep.subr.bf16.mxu1 %v9284_v8  ;;  %5723 = vmatpush3.bf16.msra.mxu0 %v7871_v7 }
 0xa38   :  { %5724 = vmatprep.subr.bf16.mxu0 %v9284_v8 }
 0xa3a   :  { %5705 = vmatpush3.bf16.msra.mxu1 %v7980_v11 }
 0xa3b   :  { %5706 = vmatprep.subr.bf16.mxu1 %v9284_v8  ;;  %5725 = vmatpush3.bf16.msra.mxu0 %v7884_v17 }
 0xa3c   :  { %5726 = vmatprep.subr.bf16.mxu0 %v9284_v8 }
 0xa3e   :  { %5707 = vmatpush3.bf16.msra.mxu1 %v7986_v36 }
 0xa3f   :  { %2441 = vmatprep.subr.bf16.mxu1 %v7815_v37  ;;  %5727 = vmatpush3.bf16.msra.mxu0 %v7898_v1 }
 0xa40   :  { %5732 = vmatprep.subr.bf16.mxu0 %v9284_v8 }
 0xa41   :  { %5709 = vmatmul.mubr.bf16.vlgmr.msra.gmra.mrb[76].mxu1 %v2239_v40  ;;  %v8043_v40 = vpop.f32.mrb[68].mxu1 }
 0xa42   :  { %2442 = vmatpush1.bf16.msra.mxu1 %v7819_v27  ;;  %2473 = vmatprep.mubr.bf16.mxu1 %v9285_v10  ;;  %9321 = vst [vmem:[#allocation45_spill] sm:$0xff] %v8043_v40  ;;  %v8045_v18 = vpop.f32.mrb[69].mxu1  ;;  %v2048_v40 = vadd.f32 %v7921_v53, %v7932_v20 }
 0xa43   :  { %2443 = vmatprep.subr.bf16.mxu1 %v7825_v38  ;;  %9322 = vst [vmem:[#allocation44_spill] sm:$0xff] %v8045_v18  ;;  %v8049_v9 = vpop.f32.mrb[70].mxu1 }
 0xa44   :  { %9324 = vst [vmem:[#allocation47_spill] sm:$0xff] %v8049_v9  ;;  %v8053_v31 = vpop.f32.mrb[71].mxu1  ;;  %v2121_v9 = vadd.f32 %v7925_v59, %v8061_v30 }
 0xa45   :  { %9326 = vst [vmem:[#allocation30_spill] sm:$0xff] %v8053_v31 }
 0xa46   :  { %2444 = vmatpush1.bf16.msra.mxu1 %v7831_v41 }
 0xa47   :  { %2445 = vmatprep.subr.bf16.mxu1 %v7837_v43 }
 0xa4a   :  { %2446 = vmatpush1.bf16.msra.mxu1 %v7843_v22 }
 0xa4b   :  { %2447 = vmatprep.subr.bf16.mxu1 %v7849_v44 }
 0xa4e   :  { %2448 = vmatpush1.bf16.msra.mxu1 %v7855_v46 }
 0xa4f   :  { %2449 = vmatprep.subr.bf16.mxu1 %v7861_v63 }
 0xa52   :  { %2450 = vmatpush1.bf16.msra.mxu1 %v7867_v16 }
 0xa53   :  { %2451 = vmatprep.subr.bf16.mxu1 %v7873_v15 }
 0xa56   :  { %2452 = vmatpush1.bf16.msra.mxu1 %v7878_v2 }
 0xa57   :  { %2453 = vmatprep.subr.bf16.mxu1 %v7881_v12 }
 0xa5a   :  { %2454 = vmatpush1.bf16.msra.mxu1 %v7887_v4 }
 0xa5b   :  { %2455 = vmatprep.subr.bf16.mxu1 %v7890_v50 }
 0xa5e   :  { %2456 = vmatpush1.bf16.msra.mxu1 %v7901_v25 }
 0xa5f   :  { %5752 = vmatprep.subr.bf16.mxu1 %v9284_v8 }
 0xaf4   :  { %v2278_v14 = vpop.f32.mrb[72].mxu1  ;;  %v2320_v18 = vpop.f32.mrb[76].mxu0 }
 0xaf5   :  { %v2284_v31 = vadd.f32 %v2278_v14, %v2048_v40  ;;  %v2367_v5 = vadd.f32 %v2320_v18, %v2050_v49  ;;  %v5690_v47 = vpop.f32.mrb[73].mxu1  ;;  %v2322_v29 = vpop.f32.mrb[77].mxu0 }
 0xaf6   :  { %v2368_v54 = vadd.f32 %v2322_v29, %v2121_v9  ;;  %v2281_v28 = vpop.f32.mrb[74].mxu1  ;;  %v2324_v32 = vpop.f32.mrb[78].mxu0 }
 0xaf7   :  { %v4948_v24 = vmul.f32 -1.442695, %v2367_v5  ;;  %v5691_v62 = vpop.f32.mrb[75].mxu1  ;;  %v2325_v13 = vpop.f32.mrb[79].mxu0  ;;  %v2123_v32 = vadd.f32 %v7928_v61, %v7918_v51 }
 0xaf8   :  { %v4949_v60 = vmul.f32 -1.442695, %v2368_v54 }
 0xaf9   :  { %6544 = vpow2.f32 %v4948_v24 }
 0xafa   :  { %6546 = vpow2.f32 %v4949_v60 }
 0xafb   :  { %6548 = vtanh.f32 %v2284_v31 }
 0xb03   :  { %v6545_v53 = vpop.eup %6544 }
 0xb04   :  { %v6547_v56 = vpop.eup %6546  ;;  %v2379_v57 = vadd.f32 1.0, %v6545_v53  ;;  %v2054_v53 = vadd.f32 %v8007_v26, %v7932_v20 }
 0xb05   :  { %v2380_v59 = vadd.f32 1.0, %v6547_v56  ;;  %v6549_v14 = vpop.eup %6548  ;;  %v2056_v56 = vadd.f32 %v8009_v52, %v7914_v21 }
 0xb06   :  { %6550 = vrcp.f32 %v2379_v57 }
 0xb07   :  { %6552 = vrcp.f32 %v2380_v59  ;;  %v2127_v59 = vadd.f32 %v8011_v55, %v8061_v30 }
 0xb10   :  { %v6551_v49 = vpop.eup %6550 }
 0xb11   :  { %v6553_v18 = vpop.eup %6552  ;;  %v2389_v47 = vmul.f32 %v6551_v49, %v6549_v14 }
 0xb12   :  { %v2388_v9 = vmul.f32 %v6553_v18, %v7935_v33 }
 0xb14   :  { %v8072_v13 = vadd.f32 %v2389_v47, %v2388_v9  ;;  %v2361_v28 = vpop.f32.mrb[76].mxu1 }
 0xb15   :  { %v2369_v60 = vadd.f32 %v2361_v28, %v2123_v32  ;;  %v5710_v29 = vpop.f32.mrb[77].mxu1 }
 0xb16   :  { %v2364_v54 = vpop.f32.mrb[78].mxu1 }
 0xb17   :  { %v4950_v62 = vmul.f32 -1.442695, %v2369_v60  ;;  %v5711_v31 = vpop.f32.mrb[79].mxu1 }
 0xb19   :  { %6554 = vpow2.f32 %v4950_v62 }
 0xb1a   :  { %6556 = vtanh.f32 %v8072_v13 }
 0xb23   :  { %v6555_v57 = vpop.eup %6554 }
 0xb24   :  { %v2381_v5 = vadd.f32 1.0, %v6555_v57  ;;  %v6557_v40 = vpop.eup %6556 }
 0xb26   :  { %6558 = vrcp.f32 %v2381_v5 }
 0xb30   :  { %v6559_v24 = vpop.eup %6558 }
 0xb31   :  { %v8075_v33 = vmul.f32 %v6559_v24, %v6557_v40 }
 0xb33   :  { %v2394_v61 = vpack.c.bf16 %v8075_v33, %v8075_v33 }
 0xb35   :  { %5729 = vmatmul.mubr.bf16.vlgmr.msra.gmra.mrb[80].mxu0 %v2394_v61  ;;  %2474 = vmatmul.mubr.bf16.vlgmr.msra.gmra.mrb[80].mxu1 %v2394_v61 }
 0xb36   :  { %5733 = vmatpush3.bf16.msra.mxu0 %v7942_v6  ;;  %5748 = vmatprep.mubr.msk.bf16.mxu0 %vm6931_vm0, %v9284_v8 }
 0xb37   :  { %5734 = vmatprep.subr.bf16.mxu0 %v9284_v8  ;;  %5753 = vmatpush3.bf16.msra.mxu1 %v7813_v3 }
 0xb38   :  { %5754 = vmatprep.subr.bf16.mxu1 %v9284_v8  ;;  %5768 = vmatprep.mubr.msk.bf16.mxu1 %vm6931_vm0, %v9284_v8 }
 0xb3a   :  { %5735 = vmatpush3.bf16.msra.mxu0 %v7948_v34 }
 0xb3b   :  { %5736 = vmatprep.subr.bf16.mxu0 %v9284_v8  ;;  %5755 = vmatpush3.bf16.msra.mxu1 %v7823_v0 }
 0xb3c   :  { %5756 = vmatprep.subr.bf16.mxu1 %v9284_v8 }
 0xb3e   :  { %5737 = vmatpush3.bf16.msra.mxu0 %v7956_v35 }
 0xb3f   :  { %5738 = vmatprep.subr.bf16.mxu0 %v9284_v8  ;;  %5757 = vmatpush3.bf16.msra.mxu1 %v7835_v42 }
 0xb40   :  { %5758 = vmatprep.subr.bf16.mxu1 %v9284_v8 }
 0xb42   :  { %5739 = vmatpush3.bf16.msra.mxu0 %v7962_v19 }
 0xb43   :  { %5740 = vmatprep.subr.bf16.mxu0 %v9284_v8  ;;  %5759 = vmatpush3.bf16.msra.mxu1 %v7847_v23 }
 0xb44   :  { %5760 = vmatprep.subr.bf16.mxu1 %v9284_v8 }
 0xb46   :  { %5741 = vmatpush3.bf16.msra.mxu0 %v7968_v39 }
 0xb47   :  { %5742 = vmatprep.subr.bf16.mxu0 %v9284_v8  ;;  %5761 = vmatpush3.bf16.msra.mxu1 %v7859_v48 }
 0xb48   :  { %5762 = vmatprep.subr.bf16.mxu1 %v9284_v8 }
 0xb4a   :  { %5743 = vmatpush3.bf16.msra.mxu0 %v7974_v45 }
 0xb4b   :  { %5744 = vmatprep.subr.bf16.mxu0 %v9284_v8  ;;  %5763 = vmatpush3.bf16.msra.mxu1 %v7871_v7 }
 0xb4c   :  { %5764 = vmatprep.subr.bf16.mxu1 %v9284_v8 }
 0xb4e   :  { %5745 = vmatpush3.bf16.msra.mxu0 %v7980_v11 }
 0xb4f   :  { %5746 = vmatprep.subr.bf16.mxu0 %v9284_v8  ;;  %5765 = vmatpush3.bf16.msra.mxu1 %v7884_v17 }
 0xb50   :  { %5766 = vmatprep.subr.bf16.mxu1 %v9284_v8 }
 0xb52   :  { %5747 = vmatpush3.bf16.msra.mxu0 %v7986_v36 }
 0xb53   :  { %2596 = vmatprep.subr.bf16.mxu0 %v7815_v37  ;;  %5767 = vmatpush3.bf16.msra.mxu1 %v7898_v1 }
 0xb54   :  { %5772 = vmatprep.subr.bf16.mxu1 %v9284_v8 }
 0xb55   :  { %5749 = vmatmul.mubr.bf16.vlgmr.msra.gmra.mrb[84].mxu0 %v2394_v61 }
 0xb56   :  { %2597 = vmatpush1.bf16.msra.mxu0 %v7819_v27  ;;  %2628 = vmatprep.mubr.bf16.mxu0 %v9285_v10 }
 0xb57   :  { %2598 = vmatprep.subr.bf16.mxu0 %v7825_v38 }
 0xb5a   :  { %2599 = vmatpush1.bf16.msra.mxu0 %v7831_v41 }
 0xb5b   :  { %2600 = vmatprep.subr.bf16.mxu0 %v7837_v43 }
 0xb5e   :  { %2601 = vmatpush1.bf16.msra.mxu0 %v7843_v22 }
 0xb5f   :  { %2602 = vmatprep.subr.bf16.mxu0 %v7849_v44 }
 0xb62   :  { %2603 = vmatpush1.bf16.msra.mxu0 %v7855_v46 }
 0xb63   :  { %2604 = vmatprep.subr.bf16.mxu0 %v7861_v63 }
 0xb66   :  { %2605 = vmatpush1.bf16.msra.mxu0 %v7867_v16 }
 0xb67   :  { %2606 = vmatprep.subr.bf16.mxu0 %v7873_v15 }
 0xb6a   :  { %2607 = vmatpush1.bf16.msra.mxu0 %v7878_v2 }
 0xb6b   :  { %2608 = vmatprep.subr.bf16.mxu0 %v7881_v12 }
 0xb6e   :  { %2609 = vmatpush1.bf16.msra.mxu0 %v7887_v4 }
 0xb6f   :  { %2610 = vmatprep.subr.bf16.mxu0 %v7890_v50 }
 0xb72   :  { %2611 = vmatpush1.bf16.msra.mxu0 %v7901_v25 }
 0xb73   :  { %5792 = vmatprep.subr.bf16.mxu0 %v9284_v8 }
 0xc08   :  { %v2433_v14 = vpop.f32.mrb[80].mxu0  ;;  %v2475_v49 = vpop.f32.mrb[80].mxu1 }
 0xc09   :  { %v2439_v18 = vadd.f32 %v2433_v14, %v2054_v53  ;;  %v2522_v47 = vadd.f32 %v2475_v49, %v2056_v56  ;;  %v5730_v9 = vpop.f32.mrb[81].mxu0  ;;  %v2477_v32 = vpop.f32.mrb[81].mxu1 }
 0xc0a   :  { %v2523_v28 = vadd.f32 %v2477_v32, %v2127_v59  ;;  %v2436_v60 = vpop.f32.mrb[82].mxu0  ;;  %v2479_v29 = vpop.f32.mrb[82].mxu1  ;;  %v2129_v59 = vadd.f32 %v8016_v58, %v7918_v51 }
 0xc0b   :  { %v4951_v54 = vmul.f32 -1.442695, %v2522_v47  ;;  %v5731_v62 = vpop.f32.mrb[83].mxu0  ;;  %v2480_v31 = vpop.f32.mrb[83].mxu1 }
 0xc0c   :  { %v4952_v57 = vmul.f32 -1.442695, %v2523_v28  ;;  %v9330_v31 = vld [vmem:[#allocation32_spill] sm:$0xff] }
 0xc0d   :  { %6560 = vpow2.f32 %v4951_v54 }
 0xc0e   :  { %6562 = vpow2.f32 %v4952_v57  ;;  %v2058_v57 = vadd.f32 %v9330_v31, %v7932_v20 }
 0xc0f   :  { %6564 = vtanh.f32 %v2439_v18 }
 0xc17   :  { %v6561_v26 = vpop.eup %6560 }
 0xc18   :  { %v6563_v52 = vpop.eup %6562  ;;  %v2534_v5 = vadd.f32 1.0, %v6561_v26  ;;  %v9331_v26 = vld [vmem:[#allocation33_spill] sm:$0xff] }
 0xc19   :  { %v2535_v55 = vadd.f32 1.0, %v6563_v52  ;;  %v6565_v40 = vpop.eup %6564  ;;  %v2060_v52 = vadd.f32 %v9331_v26, %v7914_v21 }
 0xc1a   :  { %6566 = vrcp.f32 %v2534_v5  ;;  %v9332_v5 = vld [vmem:[#allocation34_spill] sm:$0xff] }
 0xc1b   :  { %6568 = vrcp.f32 %v2535_v55  ;;  %v2131_v55 = vadd.f32 %v9332_v5, %v8061_v30 }
 0xc24   :  { %v6567_v24 = vpop.eup %6566 }
 0xc25   :  { %v6569_v61 = vpop.eup %6568  ;;  %v2544_v53 = vmul.f32 %v6567_v24, %v6565_v40 }
 0xc26   :  { %v2543_v56 = vmul.f32 %v6569_v61, %v8072_v13 }
 0xc28   :  { %v8141_v14 = vadd.f32 %v2544_v53, %v2543_v56  ;;  %v2516_v49 = vpop.f32.mrb[84].mxu0 }
 0xc29   :  { %v2524_v47 = vadd.f32 %v2516_v49, %v2129_v59  ;;  %v5750_v9 = vpop.f32.mrb[85].mxu0 }
 0xc2a   :  { %v2519_v32 = vpop.f32.mrb[86].mxu0 }
 0xc2b   :  { %v4953_v28 = vmul.f32 -1.442695, %v2524_v47  ;;  %v5751_v18 = vpop.f32.mrb[87].mxu0 }
 0xc2d   :  { %6570 = vpow2.f32 %v4953_v28 }
 0xc2e   :  { %6572 = vtanh.f32 %v8141_v14 }
 0xc37   :  { %v6571_v60 = vpop.eup %6570 }
 0xc38   :  { %v2536_v29 = vadd.f32 1.0, %v6571_v60  ;;  %v6573_v54 = vpop.eup %6572 }
 0xc3a   :  { %6574 = vrcp.f32 %v2536_v29 }
 0xc44   :  { %v6575_v62 = vpop.eup %6574 }
 0xc45   :  { %v8144_v13 = vmul.f32 %v6575_v62, %v6573_v54 }
 0xc47   :  { %v2549_v58 = vpack.c.bf16 %v8144_v13, %v8144_v13 }
 0xc49   :  { %5769 = vmatmul.mubr.bf16.vlgmr.msra.gmra.mrb[84].mxu1 %v2549_v58  ;;  %2629 = vmatmul.mubr.bf16.vlgmr.msra.gmra.mrb[88].mxu0 %v2549_v58 }
 0xc4a   :  { %5773 = vmatpush3.bf16.msra.mxu1 %v7942_v6  ;;  %5788 = vmatprep.mubr.msk.bf16.mxu1 %vm6931_vm0, %v9284_v8 }
 0xc4b   :  { %5774 = vmatprep.subr.bf16.mxu1 %v9284_v8  ;;  %5793 = vmatpush3.bf16.msra.mxu0 %v7813_v3 }
 0xc4c   :  { %5794 = vmatprep.subr.bf16.mxu0 %v9284_v8  ;;  %5808 = vmatprep.mubr.msk.bf16.mxu0 %vm6931_vm0, %v9284_v8 }
 0xc4e   :  { %5775 = vmatpush3.bf16.msra.mxu1 %v7948_v34 }
 0xc4f   :  { %5776 = vmatprep.subr.bf16.mxu1 %v9284_v8  ;;  %5795 = vmatpush3.bf16.msra.mxu0 %v7823_v0 }
 0xc50   :  { %5796 = vmatprep.subr.bf16.mxu0 %v9284_v8 }
 0xc52   :  { %5777 = vmatpush3.bf16.msra.mxu1 %v7956_v35 }
 0xc53   :  { %5778 = vmatprep.subr.bf16.mxu1 %v9284_v8  ;;  %5797 = vmatpush3.bf16.msra.mxu0 %v7835_v42 }
 0xc54   :  { %5798 = vmatprep.subr.bf16.mxu0 %v9284_v8 }
 0xc56   :  { %5779 = vmatpush3.bf16.msra.mxu1 %v7962_v19 }
 0xc57   :  { %5780 = vmatprep.subr.bf16.mxu1 %v9284_v8  ;;  %5799 = vmatpush3.bf16.msra.mxu0 %v7847_v23 }
 0xc58   :  { %5800 = vmatprep.subr.bf16.mxu0 %v9284_v8 }
 0xc5a   :  { %5781 = vmatpush3.bf16.msra.mxu1 %v7968_v39 }
 0xc5b   :  { %5782 = vmatprep.subr.bf16.mxu1 %v9284_v8  ;;  %5801 = vmatpush3.bf16.msra.mxu0 %v7859_v48 }
 0xc5c   :  { %5802 = vmatprep.subr.bf16.mxu0 %v9284_v8 }
 0xc5e   :  { %5783 = vmatpush3.bf16.msra.mxu1 %v7974_v45 }
 0xc5f   :  { %5784 = vmatprep.subr.bf16.mxu1 %v9284_v8  ;;  %5803 = vmatpush3.bf16.msra.mxu0 %v7871_v7 }
 0xc60   :  { %5804 = vmatprep.subr.bf16.mxu0 %v9284_v8 }
 0xc62   :  { %5785 = vmatpush3.bf16.msra.mxu1 %v7980_v11 }
 0xc63   :  { %5786 = vmatprep.subr.bf16.mxu1 %v9284_v8  ;;  %5805 = vmatpush3.bf16.msra.mxu0 %v7884_v17 }
 0xc64   :  { %5806 = vmatprep.subr.bf16.mxu0 %v9284_v8 }
 0xc66   :  { %5787 = vmatpush3.bf16.msra.mxu1 %v7986_v36 }
 0xc67   :  { %2751 = vmatprep.subr.bf16.mxu1 %v7815_v37  ;;  %5807 = vmatpush3.bf16.msra.mxu0 %v7898_v1 }
 0xc68   :  { %5812 = vmatprep.subr.bf16.mxu0 %v9284_v8 }
 0xc69   :  { %5789 = vmatmul.mubr.bf16.vlgmr.msra.gmra.mrb[88].mxu1 %v2549_v58 }
 0xc6a   :  { %2752 = vmatpush1.bf16.msra.mxu1 %v7819_v27  ;;  %2783 = vmatprep.mubr.bf16.mxu1 %v9285_v10 }
 0xc6b   :  { %2753 = vmatprep.subr.bf16.mxu1 %v7825_v38 }
 0xc6e   :  { %2754 = vmatpush1.bf16.msra.mxu1 %v7831_v41 }
 0xc6f   :  { %2755 = vmatprep.subr.bf16.mxu1 %v7837_v43 }
 0xc72   :  { %2756 = vmatpush1.bf16.msra.mxu1 %v7843_v22 }
 0xc73   :  { %2757 = vmatprep.subr.bf16.mxu1 %v7849_v44 }
 0xc76   :  { %2758 = vmatpush1.bf16.msra.mxu1 %v7855_v46 }
 0xc77   :  { %2759 = vmatprep.subr.bf16.mxu1 %v7861_v63 }
 0xc7a   :  { %2760 = vmatpush1.bf16.msra.mxu1 %v7867_v16 }
 0xc7b   :  { %2761 = vmatprep.subr.bf16.mxu1 %v7873_v15 }
 0xc7e   :  { %2762 = vmatpush1.bf16.msra.mxu1 %v7878_v2 }
 0xc7f   :  { %2763 = vmatprep.subr.bf16.mxu1 %v7881_v12 }
 0xc82   :  { %2764 = vmatpush1.bf16.msra.mxu1 %v7887_v4 }
 0xc83   :  { %2765 = vmatprep.subr.bf16.mxu1 %v7890_v50 }
 0xc86   :  { %2766 = vmatpush1.bf16.msra.mxu1 %v7901_v25 }
 0xc87   :  { %5832 = vmatprep.subr.bf16.mxu1 %v9284_v8 }
 0xd1c   :  { %v2588_v40 = vpop.f32.mrb[84].mxu1  ;;  %v2630_v24 = vpop.f32.mrb[88].mxu0 }
 0xd1d   :  { %v2594_v61 = vadd.f32 %v2588_v40, %v2058_v57  ;;  %v2677_v53 = vadd.f32 %v2630_v24, %v2060_v52  ;;  %v5770_v56 = vpop.f32.mrb[85].mxu1  ;;  %v2632_v59 = vpop.f32.mrb[89].mxu0 }
 0xd1e   :  { %v2678_v49 = vadd.f32 %v2632_v59, %v2131_v55  ;;  %v2591_v47 = vpop.f32.mrb[86].mxu1  ;;  %v2634_v9 = vpop.f32.mrb[90].mxu0  ;;  %v9333_v55 = vld [vmem:[#allocation35_spill] sm:$0xff] }
 0xd1f   :  { %v4954_v32 = vmul.f32 -1.442695, %v2677_v53  ;;  %v5771_v28 = vpop.f32.mrb[87].mxu1  ;;  %v2635_v18 = vpop.f32.mrb[91].mxu0  ;;  %v2133_v40 = vadd.f32 %v9333_v55, %v7918_v51 }
 0xd20   :  { %v4955_v60 = vmul.f32 -1.442695, %v2678_v49 }
 0xd21   :  { %6576 = vpow2.f32 %v4954_v32 }
 0xd22   :  { %6578 = vpow2.f32 %v4955_v60 }
 0xd23   :  { %6580 = vtanh.f32 %v2594_v61 }
 0xd2b   :  { %v6577_v29 = vpop.eup %6576 }
 0xd2c   :  { %v6579_v54 = vpop.eup %6578  ;;  %v2689_v62 = vadd.f32 1.0, %v6577_v29 }
 0xd2d   :  { %v2690_v58 = vadd.f32 1.0, %v6579_v54  ;;  %v6581_v31 = vpop.eup %6580 }
 0xd2e   :  { %6582 = vrcp.f32 %v2689_v62 }
 0xd2f   :  { %6584 = vrcp.f32 %v2690_v58 }
 0xd38   :  { %v6583_v57 = vpop.eup %6582 }
 0xd39   :  { %v6585_v26 = vpop.eup %6584  ;;  %v2699_v52 = vmul.f32 %v6583_v57, %v6581_v31  ;;  %v9337_v31 = vld [vmem:[#allocation40_spill] sm:$0xff] }
 0xd3a   :  { %v2698_v5 = vmul.f32 %v6585_v26, %v8141_v14  ;;  %v2139_v57 = vadd.f32 %v9337_v31, %v7918_v51 }
 0xd3c   :  { %v8210_v24 = vadd.f32 %v2699_v52, %v2698_v5  ;;  %v2671_v53 = vpop.f32.mrb[88].mxu1 }
 0xd3d   :  { %v2679_v56 = vadd.f32 %v2671_v53, %v2133_v40  ;;  %v5790_v59 = vpop.f32.mrb[89].mxu1 }
 0xd3e   :  { %v2674_v49 = vpop.f32.mrb[90].mxu1 }
 0xd3f   :  { %v4956_v47 = vmul.f32 -1.442695, %v2679_v56  ;;  %v5791_v61 = vpop.f32.mrb[91].mxu1 }
 0xd41   :  { %6586 = vpow2.f32 %v4956_v47 }
 0xd42   :  { %6588 = vtanh.f32 %v8210_v24 }
 0xd4b   :  { %v6587_v9 = vpop.eup %6586 }
 0xd4c   :  { %v2691_v32 = vadd.f32 1.0, %v6587_v9  ;;  %v6589_v28 = vpop.eup %6588 }
 0xd4e   :  { %6590 = vrcp.f32 %v2691_v32  ;;  %v8290_v32 = vld [vmem:[#allocation5] sm:$0xff] }
 0xd58   :  { %v6591_v18 = vpop.eup %6590 }
 0xd59   :  { %v8213_v14 = vmul.f32 %v6591_v18, %v6589_v28  ;;  %v8298_v28 = vld [vmem:[#allocation5 + $0x20] sm:$0xff] }
 0xd5a   :  { %v8336_v18 = vld [vmem:[#allocation5 + $0xe0] sm:$0xff] }
 0xd5b   :  { %v2704_v60 = vpack.c.bf16 %v8213_v14, %v8213_v14 }
 0xd5d   :  { %5809 = vmatmul.mubr.bf16.vlgmr.msra.gmra.mrb[92].mxu0 %v2704_v60  ;;  %2784 = vmatmul.mubr.bf16.vlgmr.msra.gmra.mrb[92].mxu1 %v2704_v60 }
 0xd5e   :  { %5813 = vmatpush3.bf16.msra.mxu0 %v7942_v6  ;;  %5828 = vmatprep.mubr.msk.bf16.mxu0 %vm6931_vm0, %v9284_v8 }
 0xd5f   :  { %5814 = vmatprep.subr.bf16.mxu0 %v9284_v8  ;;  %5833 = vmatpush3.bf16.msra.mxu1 %v7813_v3  ;;  %v9334_v3 = vld [vmem:[#allocation37_spill] sm:$0xff] }
 0xd60   :  { %5834 = vmatprep.subr.bf16.mxu1 %v9284_v8  ;;  %5848 = vmatprep.mubr.msk.bf16.mxu1 %vm6931_vm0, %v9284_v8 }
 0xd62   :  { %5815 = vmatpush3.bf16.msra.mxu0 %v7948_v34 }
 0xd63   :  { %5816 = vmatprep.subr.bf16.mxu0 %v9284_v8  ;;  %5835 = vmatpush3.bf16.msra.mxu1 %v7823_v0 }
 0xd64   :  { %5836 = vmatprep.subr.bf16.mxu1 %v9284_v8 }
 0xd66   :  { %5817 = vmatpush3.bf16.msra.mxu0 %v7956_v35 }
 0xd67   :  { %5818 = vmatprep.subr.bf16.mxu0 %v9284_v8  ;;  %5837 = vmatpush3.bf16.msra.mxu1 %v7835_v42 }
 0xd68   :  { %5838 = vmatprep.subr.bf16.mxu1 %v9284_v8 }
 0xd6a   :  { %5819 = vmatpush3.bf16.msra.mxu0 %v7962_v19 }
 0xd6b   :  { %5820 = vmatprep.subr.bf16.mxu0 %v9284_v8  ;;  %5839 = vmatpush3.bf16.msra.mxu1 %v7847_v23 }
 0xd6c   :  { %5840 = vmatprep.subr.bf16.mxu1 %v9284_v8 }
 0xd6e   :  { %5821 = vmatpush3.bf16.msra.mxu0 %v7968_v39 }
 0xd6f   :  { %5822 = vmatprep.subr.bf16.mxu0 %v9284_v8  ;;  %5841 = vmatpush3.bf16.msra.mxu1 %v7859_v48 }
 0xd70   :  { %5842 = vmatprep.subr.bf16.mxu1 %v9284_v8 }
 0xd72   :  { %5823 = vmatpush3.bf16.msra.mxu0 %v7974_v45 }
 0xd73   :  { %5824 = vmatprep.subr.bf16.mxu0 %v9284_v8  ;;  %5843 = vmatpush3.bf16.msra.mxu1 %v7871_v7 }
 0xd74   :  { %5844 = vmatprep.subr.bf16.mxu1 %v9284_v8 }
 0xd76   :  { %5825 = vmatpush3.bf16.msra.mxu0 %v7980_v11 }
 0xd77   :  { %5826 = vmatprep.subr.bf16.mxu0 %v9284_v8  ;;  %5845 = vmatpush3.bf16.msra.mxu1 %v7884_v17 }
 0xd78   :  { %5846 = vmatprep.subr.bf16.mxu1 %v9284_v8 }
 0xd7a   :  { %5827 = vmatpush3.bf16.msra.mxu0 %v7986_v36 }
 0xd7b   :  { %2906 = vmatprep.subr.bf16.mxu0 %v7815_v37  ;;  %5847 = vmatpush3.bf16.msra.mxu1 %v7898_v1  ;;  %v2064_v37 = vadd.f32 %v9334_v3, %v7932_v20  ;;  %v8350_v3 = vld [vmem:[#allocation5 + $0x50] sm:$0xff] }
 0xd7c   :  { %5852 = vmatprep.subr.bf16.mxu1 %v9284_v8 }
 0xd7d   :  { %5829 = vmatmul.mubr.bf16.vlgmr.msra.gmra.mrb[96].mxu0 %v2704_v60  ;;  %v8344_v60 = vld [vmem:[#allocation5 + $0x30] sm:$0xff] }
 0xd7e   :  { %2907 = vmatpush1.bf16.msra.mxu0 %v7819_v27  ;;  %2938 = vmatprep.mubr.bf16.mxu0 %v9285_v10  ;;  %v9335_v27 = vld [vmem:[#allocation36_spill] sm:$0xff] }
 0xd7f   :  { %2908 = vmatprep.subr.bf16.mxu0 %v7825_v38  ;;  %v2066_v0 = vadd.f32 %v9335_v27, %v7914_v21  ;;  %v9336_v38 = vld [vmem:[#allocation38_spill] sm:$0xff]  ;;  %v8356_v27 = vld [vmem:[#allocation5 + $0x70] sm:$0xff] }
 0xd82   :  { %2909 = vmatpush1.bf16.msra.mxu0 %v7831_v41  ;;  %v2137_v41 = vadd.f32 %v9336_v38, %v8061_v30  ;;  %v8362_v38 = vld [vmem:[#allocation5 + $0x90] sm:$0xff] }
 0xd83   :  { %2910 = vmatprep.subr.bf16.mxu0 %v7837_v43 }
 0xd86   :  { %2911 = vmatpush1.bf16.msra.mxu0 %v7843_v22 }
 0xd87   :  { %2912 = vmatprep.subr.bf16.mxu0 %v7849_v44 }
 0xd8a   :  { %2913 = vmatpush1.bf16.msra.mxu0 %v7855_v46 }
 0xd8b   :  { %2914 = vmatprep.subr.bf16.mxu0 %v7861_v63 }
 0xd8e   :  { %2915 = vmatpush1.bf16.msra.mxu0 %v7867_v16 }
 0xd8f   :  { %2916 = vmatprep.subr.bf16.mxu0 %v7873_v15 }
 0xd92   :  { %2917 = vmatpush1.bf16.msra.mxu0 %v7878_v2 }
 0xd93   :  { %2918 = vmatprep.subr.bf16.mxu0 %v7881_v12 }
 0xd96   :  { %2919 = vmatpush1.bf16.msra.mxu0 %v7887_v4 }
 0xd97   :  { %2920 = vmatprep.subr.bf16.mxu0 %v7890_v50 }
 0xd9a   :  { %2921 = vmatpush1.bf16.msra.mxu0 %v7901_v25 }
 0xd9b   :  { %5872 = vmatprep.subr.bf16.mxu0 %v9284_v8 }
 0xe30   :  { %v2743_v42 = vpop.f32.mrb[92].mxu0  ;;  %v2785_v43 = vpop.f32.mrb[92].mxu1 }
 0xe31   :  { %v2749_v22 = vadd.f32 %v2743_v42, %v2064_v37  ;;  %v2832_v23 = vadd.f32 %v2785_v43, %v2066_v0  ;;  %v5810_v44 = vpop.f32.mrb[93].mxu0  ;;  %v2787_v46 = vpop.f32.mrb[93].mxu1  ;;  %v8353_v37 = vld [vmem:[#allocation5 + $0x48] sm:$0xff]  ;;  %v8368_v42 = vld [vmem:[#allocation5 + $0xb0] sm:$0xff] }
 0xe32   :  { %v2833_v48 = vadd.f32 %v2787_v46, %v2137_v41  ;;  %v2746_v63 = vpop.f32.mrb[94].mxu0  ;;  %v2789_v16 = vpop.f32.mrb[94].mxu1  ;;  %v8359_v0 = vld [vmem:[#allocation5 + $0x68] sm:$0xff]  ;;  %v8380_v44 = vld [vmem:[#allocation5 + $0xf0] sm:$0xff] }
 0xe33   :  { %v4957_v7 = vmul.f32 -1.442695, %v2832_v23  ;;  %v5811_v15 = vpop.f32.mrb[95].mxu0  ;;  %v2790_v2 = vpop.f32.mrb[95].mxu1  ;;  %v8365_v41 = vld [vmem:[#allocation5 + $0x88] sm:$0xff]  ;;  %v9339_v16 = vld [vmem:[#allocation41_spill] sm:$0xff] }
 0xe34   :  { %v4958_v12 = vmul.f32 -1.442695, %v2833_v48  ;;  %v8371_v43 = vld [vmem:[#allocation5 + $0xa8] sm:$0xff]  ;;  %v9338_v48 = vld [vmem:[#allocation39_spill] sm:$0xff]  ;;  %v9340_v15 = vld [vmem:[#allocation42_spill] sm:$0xff] }
 0xe35   :  { %6592 = vpow2.f32 %v4957_v7  ;;  %v8377_v23 = vld [vmem:[#allocation5 + $0xc8] sm:$0xff]  ;;  %v2068_v63 = vadd.f32 %v9338_v48, %v7932_v20  ;;  %v2070_v7 = vadd.f32 %v9339_v16, %v7914_v21  ;;  %v2141_v2 = vadd.f32 %v9340_v15, %v8061_v30 }
 0xe36   :  { %6594 = vpow2.f32 %v4958_v12  ;;  %v8383_v46 = vld [vmem:[#allocation5 + $0xe8] sm:$0xff] }
 0xe37   :  { %6596 = vtanh.f32 %v2749_v22  ;;  %v8374_v22 = vld [vmem:[#allocation5 + $0xd0] sm:$0xff] }
 0xe3f   :  { %v6593_v17 = vpop.eup %6592 }
 0xe40   :  { %v6595_v4 = vpop.eup %6594  ;;  %v2844_v50 = vadd.f32 1.0, %v6593_v17 }
 0xe41   :  { %v2845_v1 = vadd.f32 1.0, %v6595_v4  ;;  %v6597_v25 = vpop.eup %6596 }
 0xe42   :  { %6598 = vrcp.f32 %v2844_v50 }
 0xe43   :  { %6600 = vrcp.f32 %v2845_v1 }
 0xe4c   :  { %v6599_v29 = vpop.eup %6598 }
 0xe4d   :  { %v6601_v54 = vpop.eup %6600  ;;  %v2854_v62 = vmul.f32 %v6599_v29, %v6597_v25 }
 0xe4e   :  { %v2853_v58 = vmul.f32 %v6601_v54, %v8210_v24 }
 0xe50   :  { %v8279_v26 = vadd.f32 %v2854_v62, %v2853_v58  ;;  %v2826_v52 = vpop.f32.mrb[96].mxu0 }
 0xe51   :  { %v2834_v5 = vadd.f32 %v2826_v52, %v2139_v57  ;;  %v5830_v55 = vpop.f32.mrb[97].mxu0 }
 0xe52   :  { %v2829_v40 = vpop.f32.mrb[98].mxu0 }
 0xe53   :  { %v4959_v53 = vmul.f32 -1.442695, %v2834_v5  ;;  %v5831_v56 = vpop.f32.mrb[99].mxu0 }
 0xe55   :  { %6602 = vpow2.f32 %v4959_v53 }
 0xe56   :  { %6604 = vtanh.f32 %v8279_v26 }
 0xe5f   :  { %v6603_v59 = vpop.eup %6602 }
 0xe60   :  { %v2846_v49 = vadd.f32 1.0, %v6603_v59  ;;  %v6605_v47 = vpop.eup %6604 }
 0xe62   :  { %6606 = vrcp.f32 %v2846_v49 }
 0xe6c   :  { %v6607_v61 = vpop.eup %6606 }
 0xe6d   :  { %v8282_v24 = vmul.f32 %v6607_v61, %v6605_v47 }
 0xe6f   :  { %v2859_v9 = vpack.c.bf16 %v8282_v24, %v8282_v24 }
 0xe71   :  { %5849 = vmatmul.mubr.bf16.vlgmr.msra.gmra.mrb[96].mxu1 %v2859_v9  ;;  %2939 = vmatmul.mubr.bf16.vlgmr.msra.gmra.mrb[100].mxu0 %v2859_v9 }
 0xe72   :  { %5853 = vmatpush3.bf16.msra.mxu1 %v7942_v6  ;;  %5868 = vmatprep.mubr.msk.bf16.mxu1 %vm6931_vm0, %v9284_v8  ;;  %v8304_v6 = vld [vmem:[#allocation5 + $0x40] sm:$0xff] }
 0xe73   :  { %5854 = vmatprep.subr.bf16.mxu1 %v9284_v8  ;;  %5873 = vmatpush3.bf16.msra.mxu0 %v8290_v32 }
 0xe74   :  { %5874 = vmatprep.subr.bf16.mxu0 %v9284_v8  ;;  %5888 = vmatprep.mubr.msk.bf16.mxu0 %vm6931_vm0, %v9284_v8 }
 0xe76   :  { %5855 = vmatpush3.bf16.msra.mxu1 %v7948_v34  ;;  %v8310_v34 = vld [vmem:[#allocation5 + $0x60] sm:$0xff] }
 0xe77   :  { %5856 = vmatprep.subr.bf16.mxu1 %v9284_v8  ;;  %5875 = vmatpush3.bf16.msra.mxu0 %v8298_v28 }
 0xe78   :  { %5876 = vmatprep.subr.bf16.mxu0 %v9284_v8 }
 0xe7a   :  { %5857 = vmatpush3.bf16.msra.mxu1 %v7956_v35  ;;  %v8316_v35 = vld [vmem:[#allocation5 + $0x80] sm:$0xff] }
 0xe7b   :  { %5858 = vmatprep.subr.bf16.mxu1 %v9284_v8  ;;  %5877 = vmatpush3.bf16.msra.mxu0 %v8304_v6 }
 0xe7c   :  { %5878 = vmatprep.subr.bf16.mxu0 %v9284_v8 }
 0xe7e   :  { %5859 = vmatpush3.bf16.msra.mxu1 %v7962_v19  ;;  %v8322_v19 = vld [vmem:[#allocation5 + $0xa0] sm:$0xff] }
 0xe7f   :  { %5860 = vmatprep.subr.bf16.mxu1 %v9284_v8  ;;  %5879 = vmatpush3.bf16.msra.mxu0 %v8310_v34 }
 0xe80   :  { %5880 = vmatprep.subr.bf16.mxu0 %v9284_v8 }
 0xe82   :  { %5861 = vmatpush3.bf16.msra.mxu1 %v7968_v39  ;;  %v8328_v39 = vld [vmem:[#allocation5 + $0xc0] sm:$0xff] }
 0xe83   :  { %5862 = vmatprep.subr.bf16.mxu1 %v9284_v8  ;;  %5881 = vmatpush3.bf16.msra.mxu0 %v8316_v35 }
 0xe84   :  { %5882 = vmatprep.subr.bf16.mxu0 %v9284_v8 }
 0xe86   :  { %5863 = vmatpush3.bf16.msra.mxu1 %v7974_v45  ;;  %v8333_v45 = vld [vmem:[#allocation5 + $0x10] sm:$0xff] }
 0xe87   :  { %5864 = vmatprep.subr.bf16.mxu1 %v9284_v8  ;;  %5883 = vmatpush3.bf16.msra.mxu0 %v8322_v19 }
 0xe88   :  { %5884 = vmatprep.subr.bf16.mxu0 %v9284_v8 }
 0xe8a   :  { %5865 = vmatpush3.bf16.msra.mxu1 %v7980_v11  ;;  %v8340_v11 = vld [vmem:[#allocation5 + $0x8] sm:$0xff] }
 0xe8b   :  { %5866 = vmatprep.subr.bf16.mxu1 %v9284_v8  ;;  %5885 = vmatpush3.bf16.msra.mxu0 %v8328_v39 }
 0xe8c   :  { %5886 = vmatprep.subr.bf16.mxu0 %v9284_v8 }
 0xe8e   :  { %5867 = vmatpush3.bf16.msra.mxu1 %v7986_v36  ;;  %v8347_v36 = vld [vmem:[#allocation5 + $0x28] sm:$0xff] }
 0xe8f   :  { %3061 = vmatprep.subr.bf16.mxu1 %v8333_v45  ;;  %5887 = vmatpush3.bf16.msra.mxu0 %v8336_v18 }
 0xe90   :  { %5892 = vmatprep.subr.bf16.mxu0 %v9284_v8 }
 0xe91   :  { %5869 = vmatmul.mubr.bf16.vlgmr.msra.gmra.mrb[100].mxu1 %v2859_v9  ;;  %v9341_v9 = vld [vmem:[#allocation43_spill] sm:$0xff] }
 0xe92   :  { %3062 = vmatpush1.bf16.msra.mxu1 %v8340_v11  ;;  %3093 = vmatprep.mubr.bf16.mxu1 %v9285_v10  ;;  %v2143_v48 = vadd.f32 %v9341_v9, %v7918_v51 }
 0xe93   :  { %3063 = vmatprep.subr.bf16.mxu1 %v8344_v60 }
 0xe96   :  { %3064 = vmatpush1.bf16.msra.mxu1 %v8347_v36 }
 0xe97   :  { %3065 = vmatprep.subr.bf16.mxu1 %v8350_v3 }
 0xe9a   :  { %3066 = vmatpush1.bf16.msra.mxu1 %v8353_v37 }
 0xe9b   :  { %3067 = vmatprep.subr.bf16.mxu1 %v8356_v27 }
 0xe9e   :  { %3068 = vmatpush1.bf16.msra.mxu1 %v8359_v0 }
 0xe9f   :  { %3069 = vmatprep.subr.bf16.mxu1 %v8362_v38 }
 0xea2   :  { %3070 = vmatpush1.bf16.msra.mxu1 %v8365_v41 }
 0xea3   :  { %3071 = vmatprep.subr.bf16.mxu1 %v8368_v42 }
 0xea6   :  { %3072 = vmatpush1.bf16.msra.mxu1 %v8371_v43 }
 0xea7   :  { %3073 = vmatprep.subr.bf16.mxu1 %v8374_v22 }
 0xeaa   :  { %3074 = vmatpush1.bf16.msra.mxu1 %v8377_v23 }
 0xeab   :  { %3075 = vmatprep.subr.bf16.mxu1 %v8380_v44 }
 0xeae   :  { %3076 = vmatpush1.bf16.msra.mxu1 %v8383_v46 }
 0xeaf   :  { %5912 = vmatprep.subr.bf16.mxu1 %v9284_v8 }
 0xf44   :  { %v2898_v12 = vpop.f32.mrb[96].mxu1  ;;  %v2940_v17 = vpop.f32.mrb[100].mxu0 }
 0xf45   :  { %v2904_v4 = vadd.f32 %v2898_v12, %v2068_v63  ;;  %v2987_v50 = vadd.f32 %v2940_v17, %v2070_v7  ;;  %v5850_v1 = vpop.f32.mrb[97].mxu1  ;;  %v2942_v25 = vpop.f32.mrb[101].mxu0 }
 0xf46   :  { %v2988_v29 = vadd.f32 %v2942_v25, %v2141_v2  ;;  %v2901_v54 = vpop.f32.mrb[98].mxu1  ;;  %v2944_v62 = vpop.f32.mrb[102].mxu0 }
 0xf47   :  { %v4960_v58 = vmul.f32 -1.442695, %v2987_v50  ;;  %v5851_v31 = vpop.f32.mrb[99].mxu1  ;;  %v2945_v57 = vpop.f32.mrb[103].mxu0  ;;  %v8403_v54 = vld [vmem:[#allocation5 + $0x18] sm:$0xff] }
 0xf48   :  { %v4961_v52 = vmul.f32 -1.442695, %v2988_v29  ;;  %v8413_v62 = vld [vmem:[#allocation5 + $0x38] sm:$0xff] }
 0xf49   :  { %6608 = vpow2.f32 %v4960_v58  ;;  %v8419_v58 = vld [vmem:[#allocation5 + $0x58] sm:$0xff] }
 0xf4a   :  { %6610 = vpow2.f32 %v4961_v52 }
 0xf4b   :  { %6612 = vtanh.f32 %v2904_v4 }
 0xf53   :  { %v6609_v5 = vpop.eup %6608 }
 0xf54   :  { %v6611_v55 = vpop.eup %6610  ;;  %v2999_v40 = vadd.f32 1.0, %v6609_v5 }
 0xf55   :  { %v3000_v53 = vadd.f32 1.0, %v6611_v55  ;;  %v6613_v56 = vpop.eup %6612 }
 0xf56   :  { %6614 = vrcp.f32 %v2999_v40 }
 0xf57   :  { %6616 = vrcp.f32 %v3000_v53 }
 0xf60   :  { %v6615_v59 = vpop.eup %6614 }
 0xf61   :  { %v6617_v49 = vpop.eup %6616  ;;  %v3009_v47 = vmul.f32 %v6615_v59, %v6613_v56 }
 0xf62   :  { %v3008_v61 = vmul.f32 %v6617_v49, %v8279_v26  ;;  %v9345_v49 = vld [vmem:[#allocation48_spill] sm:$0xff] }
 0xf64   :  { %v8396_v63 = vadd.f32 %v3009_v47, %v3008_v61  ;;  %v2981_v16 = vpop.f32.mrb[100].mxu1  ;;  %v2149_v47 = vadd.f32 %v9345_v49, %v7918_v51 }
 0xf65   :  { %v2989_v7 = vadd.f32 %v2981_v16, %v2143_v48  ;;  %v5870_v15 = vpop.f32.mrb[101].mxu1 }
 0xf66   :  { %v2984_v2 = vpop.f32.mrb[102].mxu1 }
 0xf67   :  { %v4962_v12 = vmul.f32 -1.442695, %v2989_v7  ;;  %v5871_v17 = vpop.f32.mrb[103].mxu1 }
 0xf69   :  { %6618 = vpow2.f32 %v4962_v12 }
 0xf6a   :  { %6620 = vtanh.f32 %v8396_v63 }
 0xf73   :  { %v6619_v4 = vpop.eup %6618 }
 0xf74   :  { %v3001_v50 = vadd.f32 1.0, %v6619_v4  ;;  %v6621_v1 = vpop.eup %6620 }
 0xf76   :  { %6622 = vrcp.f32 %v3001_v50 }
 0xf80   :  { %v6623_v25 = vpop.eup %6622 }
 0xf81   :  { %v8399_v26 = vmul.f32 %v6623_v25, %v6621_v1  ;;  %v9346_v25 = vld [vmem:[#allocation47_spill] sm:$0xff] }
 0xf83   :  { %v3014_v29 = vpack.c.bf16 %v8399_v26, %v8399_v26 }
 0xf85   :  { %5889 = vmatmul.mubr.bf16.vlgmr.msra.gmra.mrb[104].mxu0 %v3014_v29  ;;  %3094 = vmatmul.mubr.bf16.vlgmr.msra.gmra.mrb[104].mxu1 %v3014_v29 }
 0xf86   :  { %5893 = vmatpush3.bf16.msra.mxu0 %v8403_v54  ;;  %5908 = vmatprep.mubr.msk.bf16.mxu0 %vm6931_vm0, %v9284_v8 }
 0xf87   :  { %5894 = vmatprep.subr.bf16.mxu0 %v9284_v8  ;;  %5913 = vmatpush3.bf16.msra.mxu1 %v8290_v32  ;;  %v8425_v32 = vld [vmem:[#allocation5 + $0x78] sm:$0xff] }
 0xf88   :  { %5914 = vmatprep.subr.bf16.mxu1 %v9284_v8  ;;  %5928 = vmatprep.mubr.msk.bf16.mxu1 %vm6931_vm0, %v9284_v8 }
 0xf8a   :  { %5895 = vmatpush3.bf16.msra.mxu0 %v8413_v62 }
 0xf8b   :  { %5896 = vmatprep.subr.bf16.mxu0 %v9284_v8  ;;  %5915 = vmatpush3.bf16.msra.mxu1 %v8298_v28  ;;  %v8431_v28 = vld [vmem:[#allocation5 + $0x98] sm:$0xff] }
 0xf8c   :  { %5916 = vmatprep.subr.bf16.mxu1 %v9284_v8 }
 0xf8e   :  { %5897 = vmatpush3.bf16.msra.mxu0 %v8419_v58 }
 0xf8f   :  { %5898 = vmatprep.subr.bf16.mxu0 %v9284_v8  ;;  %5917 = vmatpush3.bf16.msra.mxu1 %v8304_v6  ;;  %v8437_v6 = vld [vmem:[#allocation5 + $0xb8] sm:$0xff] }
 0xf90   :  { %5918 = vmatprep.subr.bf16.mxu1 %v9284_v8 }
 0xf92   :  { %5899 = vmatpush3.bf16.msra.mxu0 %v8425_v32 }
 0xf93   :  { %5900 = vmatprep.subr.bf16.mxu0 %v9284_v8  ;;  %5919 = vmatpush3.bf16.msra.mxu1 %v8310_v34  ;;  %v8443_v34 = vld [vmem:[#allocation5 + $0xd8] sm:$0xff] }
 0xf94   :  { %5920 = vmatprep.subr.bf16.mxu1 %v9284_v8 }
 0xf96   :  { %5901 = vmatpush3.bf16.msra.mxu0 %v8431_v28 }
 0xf97   :  { %5902 = vmatprep.subr.bf16.mxu0 %v9284_v8  ;;  %5921 = vmatpush3.bf16.msra.mxu1 %v8316_v35  ;;  %v8449_v35 = vld [vmem:[#allocation5 + $0xf8] sm:$0xff] }
 0xf98   :  { %5922 = vmatprep.subr.bf16.mxu1 %v9284_v8 }
 0xf9a   :  { %5903 = vmatpush3.bf16.msra.mxu0 %v8437_v6 }
 0xf9b   :  { %5904 = vmatprep.subr.bf16.mxu0 %v9284_v8  ;;  %5923 = vmatpush3.bf16.msra.mxu1 %v8322_v19  ;;  %v9342_v19 = vld [vmem:[#allocation45_spill] sm:$0xff] }
 0xf9c   :  { %5924 = vmatprep.subr.bf16.mxu1 %v9284_v8 }
 0xf9e   :  { %5905 = vmatpush3.bf16.msra.mxu0 %v8443_v34 }
 0xf9f   :  { %5906 = vmatprep.subr.bf16.mxu0 %v9284_v8  ;;  %5925 = vmatpush3.bf16.msra.mxu1 %v8328_v39  ;;  %v2074_v39 = vadd.f32 %v9342_v19, %v7932_v20 }
 0xfa0   :  { %5926 = vmatprep.subr.bf16.mxu1 %v9284_v8 }
 0xfa2   :  { %5907 = vmatpush3.bf16.msra.mxu0 %v8449_v35 }
 0xfa3   :  { %3216 = vmatprep.subr.bf16.mxu0 %v8333_v45  ;;  %5927 = vmatpush3.bf16.msra.mxu1 %v8336_v18  ;;  %v9343_v45 = vld [vmem:[#allocation44_spill] sm:$0xff] }
 0xfa4   :  { %5932 = vmatprep.subr.bf16.mxu1 %v9284_v8  ;;  %v2076_v18 = vadd.f32 %v9343_v45, %v7914_v21 }
 0xfa5   :  { %5909 = vmatmul.mubr.bf16.vlgmr.msra.gmra.mrb[108].mxu0 %v3014_v29  ;;  %v2078_v29 = vadd.f32 %v9346_v25, %v7932_v20 }
 0xfa6   :  { %3217 = vmatpush1.bf16.msra.mxu0 %v8340_v11  ;;  %3248 = vmatprep.mubr.bf16.mxu0 %v9285_v10  ;;  %v9344_v11 = vld [vmem:[#allocation46_spill] sm:$0xff] }
 0xfa7   :  { %3218 = vmatprep.subr.bf16.mxu0 %v8344_v60  ;;  %v2147_v60 = vadd.f32 %v9344_v11, %v8061_v30 }
 0xfaa   :  { %3219 = vmatpush1.bf16.msra.mxu0 %v8347_v36 }
 0xfab   :  { %3220 = vmatprep.subr.bf16.mxu0 %v8350_v3 }
 0xfae   :  { %3221 = vmatpush1.bf16.msra.mxu0 %v8353_v37 }
 0xfaf   :  { %3222 = vmatprep.subr.bf16.mxu0 %v8356_v27 }
 0xfb2   :  { %3223 = vmatpush1.bf16.msra.mxu0 %v8359_v0 }
 0xfb3   :  { %3224 = vmatprep.subr.bf16.mxu0 %v8362_v38 }
 0xfb6   :  { %3225 = vmatpush1.bf16.msra.mxu0 %v8365_v41 }
 0xfb7   :  { %3226 = vmatprep.subr.bf16.mxu0 %v8368_v42 }
 0xfba   :  { %3227 = vmatpush1.bf16.msra.mxu0 %v8371_v43 }
 0xfbb   :  { %3228 = vmatprep.subr.bf16.mxu0 %v8374_v22 }
 0xfbe   :  { %3229 = vmatpush1.bf16.msra.mxu0 %v8377_v23 }
 0xfbf   :  { %3230 = vmatprep.subr.bf16.mxu0 %v8380_v44 }
 0xfc2   :  { %3231 = vmatpush1.bf16.msra.mxu0 %v8383_v46 }
0x1058   :  { %v3053_v36 = vpop.f32.mrb[104].mxu0  ;;  %v3095_v3 = vpop.f32.mrb[104].mxu1 }
0x1059   :  { %v3059_v37 = vadd.f32 %v3053_v36, %v2074_v39  ;;  %v3142_v27 = vadd.f32 %v3095_v3, %v2076_v18  ;;  %v5890_v0 = vpop.f32.mrb[105].mxu0  ;;  %v3097_v38 = vpop.f32.mrb[105].mxu1 }
0x105a   :  { %v3143_v41 = vadd.f32 %v3097_v38, %v2147_v60  ;;  %v3056_v42 = vpop.f32.mrb[106].mxu0  ;;  %v3099_v43 = vpop.f32.mrb[106].mxu1 }
0x105b   :  { %v4963_v22 = vmul.f32 -1.442695, %v3142_v27  ;;  %v5891_v23 = vpop.f32.mrb[107].mxu0  ;;  %v3100_v44 = vpop.f32.mrb[107].mxu1 }
0x105c   :  { %v4964_v46 = vmul.f32 -1.442695, %v3143_v41 }
0x105d   :  { %6624 = vpow2.f32 %v4963_v22  ;;  %v9349_v22 = vld [vmem:[#allocation51_spill] sm:$0xff] }
0x105e   :  { %6626 = vpow2.f32 %v4964_v46  ;;  %v2153_v23 = vadd.f32 %v9349_v22, %v7918_v51 }
0x105f   :  { %6628 = vtanh.f32 %v3059_v37 }
0x1067   :  { %v6625_v31 = vpop.eup %6624 }
0x1068   :  { %v6627_v57 = vpop.eup %6626  ;;  %v3154_v52 = vadd.f32 1.0, %v6625_v31 }
0x1069   :  { %v3155_v5 = vadd.f32 1.0, %v6627_v57  ;;  %v6629_v55 = vpop.eup %6628 }
0x106a   :  { %6630 = vrcp.f32 %v3154_v52 }
0x106b   :  { %6632 = vrcp.f32 %v3155_v5 }
0x1074   :  { %v6631_v40 = vpop.eup %6630 }
0x1075   :  { %v6633_v53 = vpop.eup %6632  ;;  %v3164_v56 = vmul.f32 %v6631_v40, %v6629_v55 }
0x1076   :  { %v3163_v59 = vmul.f32 %v6633_v53, %v8396_v63 }
0x1078   :  { %v8480_v61 = vadd.f32 %v3164_v56, %v3163_v59  ;;  %v3136_v9 = vpop.f32.mrb[108].mxu0 }
0x1079   :  { %v3144_v48 = vadd.f32 %v3136_v9, %v2149_v47  ;;  %v5910_v16 = vpop.f32.mrb[109].mxu0 }
0x107a   :  { %v3139_v7 = vpop.f32.mrb[110].mxu0 }
0x107b   :  { %v4965_v15 = vmul.f32 -1.442695, %v3144_v48  ;;  %v5911_v2 = vpop.f32.mrb[111].mxu0 }
0x107d   :  { %6634 = vpow2.f32 %v4965_v15 }
0x107e   :  { %6636 = vtanh.f32 %v8480_v61 }
0x1087   :  { %v6635_v12 = vpop.eup %6634 }
0x1088   :  { %v3156_v17 = vadd.f32 1.0, %v6635_v12  ;;  %v6637_v4 = vpop.eup %6636 }
0x108a   :  { %6638 = vrcp.f32 %v3156_v17 }
0x1094   :  { %v6639_v50 = vpop.eup %6638 }
0x1095   :  { %v8483_v63 = vmul.f32 %v6639_v50, %v6637_v4 }
0x1097   :  { %v3169_v1 = vpack.c.bf16 %v8483_v63, %v8483_v63 }
0x1099   :  { %5929 = vmatmul.mubr.bf16.vlgmr.msra.gmra.mrb[108].mxu1 %v3169_v1  ;;  %3249 = vmatmul.mubr.bf16.vlgmr.msra.gmra.mrb[112].mxu0 %v3169_v1 }
0x109a   :  { %5933 = vmatpush3.bf16.msra.mxu1 %v8403_v54  ;;  %5948 = vmatprep.mubr.msk.bf16.mxu1 %vm6931_vm0, %v9284_v8  ;;  %v9347_v54 = vld [vmem:[#allocation30_spill] sm:$0xff] }
0x109b   :  { %5934 = vmatprep.subr.bf16.mxu1 %v9284_v8 }
0x109e   :  { %5935 = vmatpush3.bf16.msra.mxu1 %v8413_v62  ;;  %v2080_v62 = vadd.f32 %v9347_v54, %v7914_v21 }
0x109f   :  { %5936 = vmatprep.subr.bf16.mxu1 %v9284_v8 }
0x10a2   :  { %5937 = vmatpush3.bf16.msra.mxu1 %v8419_v58  ;;  %v9348_v58 = vld [vmem:[#allocation50_spill] sm:$0xff] }
0x10a3   :  { %5938 = vmatprep.subr.bf16.mxu1 %v9284_v8 }
0x10a6   :  { %5939 = vmatpush3.bf16.msra.mxu1 %v8425_v32  ;;  %v2151_v32 = vadd.f32 %v9348_v58, %v8061_v30 }
0x10a7   :  { %5940 = vmatprep.subr.bf16.mxu1 %v9284_v8 }
0x10aa   :  { %5941 = vmatpush3.bf16.msra.mxu1 %v8431_v28 }
0x10ab   :  { %5942 = vmatprep.subr.bf16.mxu1 %v9284_v8 }
0x10ae   :  { %5943 = vmatpush3.bf16.msra.mxu1 %v8437_v6 }
0x10af   :  { %5944 = vmatprep.subr.bf16.mxu1 %v9284_v8 }
0x10b2   :  { %5945 = vmatpush3.bf16.msra.mxu1 %v8443_v34 }
0x10b3   :  { %5946 = vmatprep.subr.bf16.mxu1 %v9284_v8 }
0x10b6   :  { %5947 = vmatpush3.bf16.msra.mxu1 %v8449_v35 }
0x10b9   :  { %5949 = vmatmul.mubr.bf16.vlgmr.msra.gmra.mrb[112].mxu1 %v3169_v1 }
0x116c   :  { %v3208_v28 = vpop.f32.mrb[108].mxu1  ;;  %v3250_v6 = vpop.f32.mrb[112].mxu0 }
0x116d   :  { %v3214_v19 = vadd.f32 %v3208_v28, %v2078_v29  ;;  %v3297_v39 = vadd.f32 %v3250_v6, %v2080_v62  ;;  %v5930_v45 = vpop.f32.mrb[109].mxu1  ;;  %v3252_v34 = vpop.f32.mrb[113].mxu0 }
0x116e   :  { %v3298_v18 = vadd.f32 %v3252_v34, %v2151_v32  ;;  %v3211_v11 = vpop.f32.mrb[110].mxu1  ;;  %v3254_v60 = vpop.f32.mrb[114].mxu0 }
0x116f   :  { %v4966_v35 = vmul.f32 -1.442695, %v3297_v39  ;;  %v5931_v36 = vpop.f32.mrb[111].mxu1  ;;  %v3255_v3 = vpop.f32.mrb[115].mxu0 }
0x1170   :  { %v4967_v37 = vmul.f32 -1.442695, %v3298_v18 }
0x1171   :  { %6640 = vpow2.f32 %v4966_v35 }
0x1172   :  { %6642 = vpow2.f32 %v4967_v37 }
0x1173   :  { %6644 = vtanh.f32 %v3214_v19 }
0x117b   :  { %v6641_v20 = vpop.eup %6640 }
0x117c   :  { %v6643_v21 = vpop.eup %6642  ;;  %v3309_v27 = vadd.f32 1.0, %v6641_v20 }
0x117d   :  { %v3310_v30 = vadd.f32 1.0, %v6643_v21  ;;  %v6645_v0 = vpop.eup %6644 }
0x117e   :  { %6646 = vrcp.f32 %v3309_v27 }
0x117f   :  { %6648 = vrcp.f32 %v3310_v30 }
0x1188   :  { %v6647_v38 = vpop.eup %6646 }
0x1189   :  { %v6649_v41 = vpop.eup %6648  ;;  %v3319_v42 = vmul.f32 %v6647_v38, %v6645_v0 }
0x118a   :  { %v3318_v43 = vmul.f32 %v6649_v41, %v8480_v61 }
0x118c   :  { %v3320_v44 = vadd.f32 %v3319_v42, %v3318_v43  ;;  %v3291_v46 = vpop.f32.mrb[112].mxu1 }
0x118d   :  { %v3299_v31 = vadd.f32 %v3291_v46, %v2153_v23  ;;  %v5950_v57 = vpop.f32.mrb[113].mxu1 }
0x118e   :  { %v3294_v52 = vpop.f32.mrb[114].mxu1 }
0x118f   :  { %v4968_v5 = vmul.f32 -1.442695, %v3299_v31  ;;  %v5951_v55 = vpop.f32.mrb[115].mxu1 }
0x1191   :  { %6650 = vpow2.f32 %v4968_v5 }
0x1192   :  { %6652 = vtanh.f32 %v3320_v44 }
0x119b   :  { %v6651_v40 = vpop.eup %6650 }
0x119c   :  { %v3311_v53 = vadd.f32 1.0, %v6651_v40  ;;  %v6653_v56 = vpop.eup %6652 }
0x119e   :  { %6654 = vrcp.f32 %v3311_v53 }
0x11a8   :  { %v6655_v59 = vpop.eup %6654 }
0x11a9   :  { %v8513_v49 = vmul.f32 %v6655_v59, %v6653_v56 }
0x11aa   :  { %6904 = dma.done.wait [#allocation8 + $0x2], 4096 }
0x11ab   :  { %6905 = vsyncadd [#allocation8 + $0x2], 4294963200 }
0x11ac   :  { %6906 = dma.done.wait [#allocation8 + $0x3], 4096 }
0x11ad   :  { %6907 = vsyncadd [#allocation8 + $0x3], 4294963200  ;;  %3426 = vmatprep.mubr.bf16.mxu0 %v9285_v10  ;;  %3499 = vmatprep.mubr.bf16.mxu1 %v9285_v10  ;;  %v3341_v51 = vld [vmem:[#allocation6 + $0x8] sm:$0xff]  ;;  %v3340_v47 = vld [vmem:[#allocation6] sm:$0xff]  ;;  %v3337_v38 = vpack.c.bf16 %v8213_v14, %v8144_v13  ;;  %v3338_v23 = vpack.c.bf16 %v8399_v26, %v8282_v24  ;;  %v3339_v52 = vpack.c.bf16 %v8513_v49, %v8483_v63 }
0x11ae   :  { %v3345_v61 = vld [vmem:[#allocation6 + $0x28] sm:$0xff]  ;;  %3394 = vmatprep.subr.bf16.mxu0 %v3341_v51  ;;  %v3343_v9 = vld [vmem:[#allocation6 + $0x18] sm:$0xff]  ;;  %v3342_v48 = vld [vmem:[#allocation6 + $0x10] sm:$0xff] }
0x11af   :  { %3395 = vmatpush1.bf16.msra.mxu0 %v3340_v47  ;;  %v3344_v16 = vld [vmem:[#allocation6 + $0x20] sm:$0xff]  ;;  %3467 = vmatprep.subr.bf16.mxu1 %v3343_v9  ;;  %v3347_v7 = vld [vmem:[#allocation6 + $0x38] sm:$0xff]  ;;  %v3349_v15 = vld [vmem:[#allocation6 + $0x48] sm:$0xff] }
0x11b0   :  { %3396 = vmatprep.subr.bf16.mxu0 %v3345_v61  ;;  %3468 = vmatpush1.bf16.msra.mxu1 %v3342_v48  ;;  %v3346_v2 = vld [vmem:[#allocation6 + $0x30] sm:$0xff]  ;;  %v3351_v12 = vld [vmem:[#allocation6 + $0x58] sm:$0xff]  ;;  %v3348_v17 = vld [vmem:[#allocation6 + $0x40] sm:$0xff] }
0x11b1   :  { %3469 = vmatprep.subr.bf16.mxu1 %v3347_v7  ;;  %v3353_v4 = vld [vmem:[#allocation6 + $0x68] sm:$0xff]  ;;  %v3350_v50 = vld [vmem:[#allocation6 + $0x50] sm:$0xff]  ;;  %v3352_v1 = vld [vmem:[#allocation6 + $0x60] sm:$0xff] }
0x11b2   :  { %v3357_v25 = vld [vmem:[#allocation6 + $0x88] sm:$0xff]  ;;  %v3355_v29 = vld [vmem:[#allocation6 + $0x78] sm:$0xff]  ;;  %v3354_v54 = vld [vmem:[#allocation6 + $0x70] sm:$0xff] }
0x11b3   :  { %3397 = vmatpush1.bf16.msra.mxu0 %v3344_v16  ;;  %v3359_v62 = vld [vmem:[#allocation6 + $0x98] sm:$0xff]  ;;  %v3356_v58 = vld [vmem:[#allocation6 + $0x80] sm:$0xff]  ;;  %v3361_v32 = vld [vmem:[#allocation6 + $0xa8] sm:$0xff] }
0x11b4   :  { %3398 = vmatprep.subr.bf16.mxu0 %v3349_v15  ;;  %3470 = vmatpush1.bf16.msra.mxu1 %v3346_v2  ;;  %v3358_v28 = vld [vmem:[#allocation6 + $0x90] sm:$0xff]  ;;  %v3363_v6 = vld [vmem:[#allocation6 + $0xb8] sm:$0xff]  ;;  %v3360_v19 = vld [vmem:[#allocation6 + $0xa0] sm:$0xff] }
0x11b5   :  { %3471 = vmatprep.subr.bf16.mxu1 %v3351_v12  ;;  %v3365_v39 = vld [vmem:[#allocation6 + $0xc8] sm:$0xff]  ;;  %v3362_v45 = vld [vmem:[#allocation6 + $0xb0] sm:$0xff]  ;;  %v3367_v34 = vld [vmem:[#allocation6 + $0xd8] sm:$0xff] }
0x11b6   :  { %v3364_v18 = vld [vmem:[#allocation6 + $0xc0] sm:$0xff]  ;;  %v3369_v11 = vld [vmem:[#allocation6 + $0xe8] sm:$0xff]  ;;  %v3366_v60 = vld [vmem:[#allocation6 + $0xd0] sm:$0xff] }
0x11b7   :  { %3399 = vmatpush1.bf16.msra.mxu0 %v3348_v17  ;;  %v3371_v35 = vld [vmem:[#allocation6 + $0xf8] sm:$0xff]  ;;  %v3368_v36 = vld [vmem:[#allocation6 + $0xe0] sm:$0xff]  ;;  %v3370_v20 = vld [vmem:[#allocation6 + $0xf0] sm:$0xff] }
0x11b8   :  { %3400 = vmatprep.subr.bf16.mxu0 %v3353_v4  ;;  %3472 = vmatpush1.bf16.msra.mxu1 %v3350_v50  ;;  %v9350_v3 = vld [vmem:[#allocation31_spill] sm:$0xff]  ;;  %v8524_v27 = vld [vmem:[#allocation7 + $0x10] sm:$0xff]  ;;  %v8540_v41 = vld [vmem:[#allocation7 + $0x28] sm:$0xff] }
0x11b9   :  { %3473 = vmatprep.subr.bf16.mxu1 %v3355_v29  ;;  %v3336_v37 = vpack.c.bf16 %v8075_v33, %v9350_v3  ;;  %v8522_v21 = vld [vmem:[#allocation7] sm:$0xff]  ;;  %v8528_v33 = vld [vmem:[#allocation7 + $0x8] sm:$0xff]  ;;  %v8534_v0 = vld [vmem:[#allocation7 + $0x30] sm:$0xff] }
0x11ba   :  { %v8532_v30 = vld [vmem:[#allocation7 + $0x20] sm:$0xff]  ;;  %v8546_v43 = vld [vmem:[#allocation7 + $0x50] sm:$0xff]  ;;  %v8552_v13 = vld [vmem:[#allocation7 + $0x48] sm:$0xff] }
0x11bb   :  { %3401 = vmatpush1.bf16.msra.mxu0 %v3352_v1  ;;  %v8544_v42 = vld [vmem:[#allocation7 + $0x40] sm:$0xff]  ;;  %v8558_v22 = vld [vmem:[#allocation7 + $0x70] sm:$0xff]  ;;  %v8564_v44 = vld [vmem:[#allocation7 + $0x68] sm:$0xff] }
0x11bc   :  { %3402 = vmatprep.subr.bf16.mxu0 %v3357_v25  ;;  %3474 = vmatpush1.bf16.msra.mxu1 %v3354_v54  ;;  %v8556_v14 = vld [vmem:[#allocation7 + $0x60] sm:$0xff]  ;;  %v8570_v31 = vld [vmem:[#allocation7 + $0x90] sm:$0xff]  ;;  %v8576_v24 = vld [vmem:[#allocation7 + $0x88] sm:$0xff] }
0x11bd   :  { %3475 = vmatprep.subr.bf16.mxu1 %v3359_v62  ;;  %v8568_v46 = vld [vmem:[#allocation7 + $0x80] sm:$0xff]  ;;  %v8582_v57 = vld [vmem:[#allocation7 + $0xb0] sm:$0xff]  ;;  %v8587_v5 = vld [vmem:[#allocation7 + $0xa8] sm:$0xff] }
0x11be   :  { %v8580_v26 = vld [vmem:[#allocation7 + $0xa0] sm:$0xff]  ;;  %v8590_v55 = vld [vmem:[#allocation7 + $0xd0] sm:$0xff]  ;;  %v8596_v53 = vld [vmem:[#allocation7 + $0xc8] sm:$0xff] }
0x11bf   :  { %3403 = vmatpush1.bf16.msra.mxu0 %v3356_v58  ;;  %v8593_v40 = vld [vmem:[#allocation7 + $0xc0] sm:$0xff]  ;;  %v8599_v63 = vld [vmem:[#allocation7 + $0xf0] sm:$0xff]  ;;  %v8610_v59 = vld [vmem:[#allocation7 + $0xe8] sm:$0xff] }
0x11c0   :  { %3404 = vmatprep.subr.bf16.mxu0 %v3361_v32  ;;  %3476 = vmatpush1.bf16.msra.mxu1 %v3358_v28  ;;  %v8607_v56 = vld [vmem:[#allocation7 + $0xe0] sm:$0xff]  ;;  %v9352_v48 = vld [vmem:[#allocation28_spill] sm:$0xff]  ;;  %v9353_v54 = vld [vmem:[#allocation29_spill] sm:$0xff] }
0x11c1   :  { %3477 = vmatprep.subr.bf16.mxu1 %v3363_v6  ;;  %v8619_v49 = vld [vmem:[%s9243_s9] sm:$0xf]  ;;  %v8653_v3 = vld [vmem:[#allocation7 + $0x38] sm:$0xff] }
0x11c2   :  { %v9351_v51 = vld [vmem:[#allocation27_spill] sm:$0xff]  ;;  %v8627_v16 = vrot.slane %v8619_v49, %v9352_v48  ;;  %v8641_v62 = vrot.slane %v8619_v49, %v9353_v54 }
0x11c3   :  { %3405 = vmatpush1.bf16.msra.mxu0 %v3360_v19  ;;  %v8623_v47 = vrot.slane %v8619_v49, %v9351_v51  ;;  %v8691_v51 = vld [vmem:[#allocation7 + $0xf8] sm:$0xff] }
0x11c4   :  { %3406 = vmatprep.subr.bf16.mxu0 %v3365_v39  ;;  %3478 = vmatpush1.bf16.msra.mxu1 %v3362_v45 }
0x11c5   :  { %3479 = vmatprep.subr.bf16.mxu1 %v3367_v34 }
0x11c7   :  { %3407 = vmatpush1.bf16.msra.mxu0 %v3364_v18 }
0x11c8   :  { %3408 = vmatprep.subr.bf16.mxu0 %v3369_v11  ;;  %3480 = vmatpush1.bf16.msra.mxu1 %v3366_v60 }
0x11c9   :  { %3481 = vmatprep.subr.bf16.mxu1 %v3371_v35 }
0x11cb   :  { %3409 = vmatpush1.bf16.msra.mxu0 %v3368_v36  ;;  %v8647_v36 = vld [vmem:[#allocation7 + $0x18] sm:$0xff] }
0x11cc   :  { %5952 = vmatprep.subr.bf16.mxu0 %v9284_v8  ;;  %3482 = vmatpush1.bf16.msra.mxu1 %v3370_v20  ;;  %v8667_v20 = vld [vmem:[#allocation7 + $0x78] sm:$0xff] }
0x11cd   :  { %3670 = vmatprep.subr.bf16.mxu1 %v8524_v27 }
0x11ce   :  { %3427 = vmatmul.mubr.bf16.vlgmr.msra.gmra.mrb[116].mxu0 %v3336_v37 }
0x11cf   :  { %3436 = vmatprep.mubr.bf16.mxu0 %v9285_v10  ;;  %3500 = vmatmul.mubr.bf16.vlgmr.msra.gmra.mrb[116].mxu1 %v3336_v37  ;;  %v8661_v37 = vld [vmem:[#allocation7 + $0x58] sm:$0xff] }
0x11d0   :  { %3509 = vmatprep.mubr.bf16.mxu1 %v9285_v10  ;;  %5953 = vmatpush3.bf16.msra.mxu0 %v8522_v21 }
0x11d1   :  { %3671 = vmatpush1.bf16.msra.mxu1 %v8528_v33  ;;  %5954 = vmatprep.subr.bf16.mxu0 %v9284_v8 }
0x11d2   :  { %3672 = vmatprep.subr.bf16.mxu1 %v8534_v0 }
0x11d4   :  { %5955 = vmatpush3.bf16.msra.mxu0 %v8532_v30 }
0x11d5   :  { %3673 = vmatpush1.bf16.msra.mxu1 %v8540_v41  ;;  %5956 = vmatprep.subr.bf16.mxu0 %v9284_v8 }
0x11d6   :  { %3437 = vmatmul.mubr.bf16.gmra.mrb[120].mxu0 %v3337_v38  ;;  %3674 = vmatprep.subr.bf16.mxu1 %v8546_v43 }
0x11d7   :  { %3510 = vmatmul.mubr.bf16.gmra.mrb[120].mxu1 %v3337_v38  ;;  %3446 = vmatprep.mubr.bf16.mxu0 %v9285_v10  ;;  %v8673_v38 = vld [vmem:[#allocation7 + $0x98] sm:$0xff] }
0x11d8   :  { %3519 = vmatprep.mubr.bf16.mxu1 %v9285_v10  ;;  %5957 = vmatpush3.bf16.msra.mxu0 %v8544_v42 }
0x11d9   :  { %3675 = vmatpush1.bf16.msra.mxu1 %v8552_v13  ;;  %5958 = vmatprep.subr.bf16.mxu0 %v9284_v8 }
0x11da   :  { %3676 = vmatprep.subr.bf16.mxu1 %v8558_v22 }
0x11dc   :  { %5959 = vmatpush3.bf16.msra.mxu0 %v8556_v14 }
0x11dd   :  { %3677 = vmatpush1.bf16.msra.mxu1 %v8564_v44  ;;  %5960 = vmatprep.subr.bf16.mxu0 %v9284_v8 }
0x11de   :  { %3447 = vmatmul.mubr.bf16.gmra.mrb[124].mxu0 %v3338_v23  ;;  %3678 = vmatprep.subr.bf16.mxu1 %v8570_v31 }
0x11df   :  { %3520 = vmatmul.mubr.bf16.gmra.mrb[124].mxu1 %v3338_v23  ;;  %3456 = vmatprep.mubr.bf16.mxu0 %v9285_v10  ;;  %v8679_v23 = vld [vmem:[#allocation7 + $0xb8] sm:$0xff] }
0x11e0   :  { %3529 = vmatprep.mubr.bf16.mxu1 %v9285_v10  ;;  %5961 = vmatpush3.bf16.msra.mxu0 %v8568_v46 }
0x11e1   :  { %3679 = vmatpush1.bf16.msra.mxu1 %v8576_v24  ;;  %5962 = vmatprep.subr.bf16.mxu0 %v9284_v8 }
0x11e2   :  { %3680 = vmatprep.subr.bf16.mxu1 %v8582_v57 }
0x11e4   :  { %5963 = vmatpush3.bf16.msra.mxu0 %v8580_v26 }
0x11e5   :  { %3681 = vmatpush1.bf16.msra.mxu1 %v8587_v5  ;;  %5964 = vmatprep.subr.bf16.mxu0 %v9284_v8 }
0x11e6   :  { %3457 = vmatmul.mubr.bf16.gmra.mrb[128].mxu0 %v3339_v52  ;;  %3682 = vmatprep.subr.bf16.mxu1 %v8590_v55 }
0x11e7   :  { %3530 = vmatmul.mubr.bf16.gmra.mrb[128].mxu1 %v3339_v52  ;;  %5968 = vmatprep.mubr.msk.bf16.mxu0 %vm6931_vm0, %v9284_v8  ;;  %v8685_v52 = vld [vmem:[#allocation7 + $0xd8] sm:$0xff] }
0x11e8   :  { %5965 = vmatpush3.bf16.msra.mxu0 %v8593_v40  ;;  %3702 = vmatprep.mubr.bf16.mxu1 %v9285_v10 }
0x11e9   :  { %3683 = vmatpush1.bf16.msra.mxu1 %v8596_v53  ;;  %5966 = vmatprep.subr.bf16.mxu0 %v9284_v8 }
0x11ea   :  { %3684 = vmatprep.subr.bf16.mxu1 %v8599_v63 }
0x11ec   :  { %5967 = vmatpush3.bf16.msra.mxu0 %v8607_v56 }
0x11ed   :  { %3685 = vmatpush1.bf16.msra.mxu1 %v8610_v59  ;;  %5972 = vmatprep.subr.bf16.mxu0 %v9284_v8 }
0x11ee   :  { %5992 = vmatprep.subr.bf16.mxu1 %v9284_v8 }
0x12a1   :  { %v3428_v61 = vpop.f32.mrb[116].mxu0 }
0x12a2   :  { %v3430_v9 = vpop.f32.mrb[117].mxu0  ;;  %v3501_v2 = vpop.f32.mrb[116].mxu1  ;;  %v3429_v58 = vadd.f32 %v3428_v61, %v8641_v62 }
0x12a3   :  { %v3431_v7 = vadd.f32 %v3430_v9, %v8623_v47  ;;  %v8630_v15 = vpop.f32.mrb[118].mxu0  ;;  %v3503_v17 = vpop.f32.mrb[117].mxu1 }
0x12a4   :  { %v8632_v12 = vpop.f32.mrb[119].mxu0  ;;  %v8634_v50 = vpop.f32.mrb[118].mxu1  ;;  %v3504_v1 = vadd.f32 %v3503_v17, %v8627_v16 }
0x12a5   :  { %v4969_v4 = vmul.f32 -1.442695, %v3431_v7  ;;  %v8637_v25 = vpop.f32.mrb[119].mxu1 }
0x12a6   :  { %v4970_v29 = vmul.f32 -1.442695, %v3504_v1 }
0x12a7   :  { %6696 = vpow2.f32 %v4969_v4 }
0x12a8   :  { %6698 = vpow2.f32 %v4970_v29 }
0x12a9   :  { %6700 = vtanh.f32 %v3429_v58  ;;  %v8712_v61 = vpop.f32.mrb[120].mxu0 }
0x12aa   :  { %v8714_v9 = vpop.f32.mrb[121].mxu0  ;;  %v8716_v48 = vpop.f32.mrb[120].mxu1 }
0x12ab   :  { %v8719_v7 = vpop.f32.mrb[122].mxu0  ;;  %v8721_v2 = vpop.f32.mrb[121].mxu1 }
0x12ac   :  { %9354 = vst [vmem:[#allocation32_spill] sm:$0xff] %v8719_v7  ;;  %v8724_v17 = vpop.f32.mrb[123].mxu0  ;;  %v8726_v4 = vpop.f32.mrb[122].mxu1 }
0x12ad   :  { %9355 = vst [vmem:[#allocation33_spill] sm:$0xff] %v8724_v17  ;;  %9356 = vst [vmem:[#allocation34_spill] sm:$0xff] %v8726_v4  ;;  %v8728_v1 = vpop.f32.mrb[123].mxu1 }
0x12ae   :  { %9357 = vst [vmem:[#allocation35_spill] sm:$0xff] %v8728_v1 }
0x12b1   :  { %v6697_v32 = vpop.eup %6696  ;;  %v8732_v29 = vpop.f32.mrb[124].mxu0 }
0x12b2   :  { %v3614_v28 = vadd.f32 1.0, %v6697_v32  ;;  %v6699_v6 = vpop.eup %6698  ;;  %9358 = vst [vmem:[#allocation37_spill] sm:$0xff] %v8732_v29  ;;  %v8734_v54 = vpop.f32.mrb[125].mxu0 }
0x12b3   :  { %v3615_v19 = vadd.f32 1.0, %v6699_v6  ;;  %v6701_v39 = vpop.eup %6700  ;;  %9359 = vst [vmem:[#allocation36_spill] sm:$0xff] %v8734_v54  ;;  %v8736_v58 = vpop.f32.mrb[124].mxu1 }
0x12b4   :  { %6702 = vrcp.f32 %v3614_v28  ;;  %9360 = vst [vmem:[#allocation38_spill] sm:$0xff] %v8736_v58  ;;  %v8738_v32 = vpop.f32.mrb[126].mxu0  ;;  %v8740_v28 = vpop.f32.mrb[125].mxu1 }
0x12b5   :  { %6704 = vrcp.f32 %v3615_v19  ;;  %9361 = vst [vmem:[#allocation40_spill] sm:$0xff] %v8738_v32  ;;  %9362 = vst [vmem:[#allocation39_spill] sm:$0xff] %v8740_v28  ;;  %v8742_v6 = vpop.f32.mrb[127].mxu0  ;;  %v8744_v19 = vpop.f32.mrb[126].mxu1 }
0x12b6   :  { %9363 = vst [vmem:[#allocation41_spill] sm:$0xff] %v8742_v6  ;;  %9364 = vst [vmem:[#allocation42_spill] sm:$0xff] %v8744_v19  ;;  %v9374_v6 = vld [vmem:[#allocation49_spill] sm:$0xff] }
0x12b7   :  { %v8766_v19 = vrot.slane %v8619_v49, %v9374_v6 }
0x12be   :  { %v6703_v45 = vpop.eup %6702 }
0x12bf   :  { %v8644_v34 = vmul.f32 %v6703_v45, %v6701_v39  ;;  %v6705_v18 = vpop.eup %6704  ;;  %v8746_v39 = vpop.f32.mrb[127].mxu1 }
0x12c0   :  { %9365 = vst [vmem:[#allocation43_spill] sm:$0xff] %v8746_v39  ;;  %v8748_v45 = vpop.f32.mrb[128].mxu0 }
0x12c1   :  { %6706 = vtanh.f32 %v8644_v34  ;;  %9366 = vst [vmem:[#allocation45_spill] sm:$0xff] %v8748_v45  ;;  %v3433_v45 = vadd.f32 %v8630_v15, %v8641_v62 }
0x12cb   :  { %v6707_v11 = vpop.eup %6706 }
0x12cc   :  { %v3622_v60 = vmul.f32 %v6707_v11, %v6705_v18  ;;  %v8750_v18 = vpop.f32.mrb[129].mxu0  ;;  %v8752_v11 = vpop.f32.mrb[128].mxu1 }
0x12cd   :  { %9367 = vst [vmem:[#allocation44_spill] sm:$0xff] %v8750_v18  ;;  %9368 = vst [vmem:[#allocation46_spill] sm:$0xff] %v8752_v11  ;;  %v3435_v11 = vadd.f32 %v8632_v12, %v8623_v47 }
0x12ce   :  { %v3623_v35 = vpack.c.bf16 %v3622_v60, %v3622_v60  ;;  %v8754_v60 = vpop.f32.mrb[130].mxu0 }
0x12cf   :  { %9369 = vst [vmem:[#allocation48_spill] sm:$0xff] %v8754_v60  ;;  %v8758_v58 = vpop.f32.mrb[131].mxu0  ;;  %v3506_v60 = vadd.f32 %v8634_v50, %v8766_v19 }
0x12d0   :  { %5969 = vmatmul.mubr.bf16.vlgmr.msra.gmra.mrb[132].mxu0 %v3623_v35  ;;  %3703 = vmatmul.mubr.bf16.vlgmr.msra.gmra.mrb[132].mxu1 %v3623_v35  ;;  %9371 = vst [vmem:[#allocation30_spill] sm:$0xff] %v8758_v58 }
0x12d1   :  { %5973 = vmatpush3.bf16.msra.mxu0 %v8647_v36  ;;  %5988 = vmatprep.mubr.msk.bf16.mxu0 %vm6931_vm0, %v9284_v8 }
0x12d2   :  { %5974 = vmatprep.subr.bf16.mxu0 %v9284_v8  ;;  %5993 = vmatpush3.bf16.msra.mxu1 %v8522_v21 }
0x12d3   :  { %5994 = vmatprep.subr.bf16.mxu1 %v9284_v8  ;;  %6008 = vmatprep.mubr.msk.bf16.mxu1 %vm6931_vm0, %v9284_v8 }
0x12d5   :  { %5975 = vmatpush3.bf16.msra.mxu0 %v8653_v3 }
0x12d6   :  { %5976 = vmatprep.subr.bf16.mxu0 %v9284_v8  ;;  %5995 = vmatpush3.bf16.msra.mxu1 %v8532_v30 }
0x12d7   :  { %5996 = vmatprep.subr.bf16.mxu1 %v9284_v8 }
0x12d9   :  { %5977 = vmatpush3.bf16.msra.mxu0 %v8661_v37 }
0x12da   :  { %5978 = vmatprep.subr.bf16.mxu0 %v9284_v8  ;;  %5997 = vmatpush3.bf16.msra.mxu1 %v8544_v42 }
0x12db   :  { %5998 = vmatprep.subr.bf16.mxu1 %v9284_v8 }
0x12dd   :  { %5979 = vmatpush3.bf16.msra.mxu0 %v8667_v20 }
0x12de   :  { %5980 = vmatprep.subr.bf16.mxu0 %v9284_v8  ;;  %5999 = vmatpush3.bf16.msra.mxu1 %v8556_v14 }
0x12df   :  { %6000 = vmatprep.subr.bf16.mxu1 %v9284_v8 }
0x12e1   :  { %5981 = vmatpush3.bf16.msra.mxu0 %v8673_v38 }
0x12e2   :  { %5982 = vmatprep.subr.bf16.mxu0 %v9284_v8  ;;  %6001 = vmatpush3.bf16.msra.mxu1 %v8568_v46 }
0x12e3   :  { %6002 = vmatprep.subr.bf16.mxu1 %v9284_v8 }
0x12e5   :  { %5983 = vmatpush3.bf16.msra.mxu0 %v8679_v23 }
0x12e6   :  { %5984 = vmatprep.subr.bf16.mxu0 %v9284_v8  ;;  %6003 = vmatpush3.bf16.msra.mxu1 %v8580_v26 }
0x12e7   :  { %6004 = vmatprep.subr.bf16.mxu1 %v9284_v8 }
0x12e9   :  { %5985 = vmatpush3.bf16.msra.mxu0 %v8685_v52 }
0x12ea   :  { %5986 = vmatprep.subr.bf16.mxu0 %v9284_v8  ;;  %6005 = vmatpush3.bf16.msra.mxu1 %v8593_v40 }
0x12eb   :  { %6006 = vmatprep.subr.bf16.mxu1 %v9284_v8 }
0x12ed   :  { %5987 = vmatpush3.bf16.msra.mxu0 %v8691_v51 }
0x12ee   :  { %3824 = vmatprep.subr.bf16.mxu0 %v8524_v27  ;;  %6007 = vmatpush3.bf16.msra.mxu1 %v8607_v56 }
0x12ef   :  { %6012 = vmatprep.subr.bf16.mxu1 %v9284_v8 }
0x12f0   :  { %5989 = vmatmul.mubr.bf16.vlgmr.msra.gmra.mrb[136].mxu0 %v3623_v35  ;;  %v8756_v35 = vpop.f32.mrb[129].mxu1 }
0x12f1   :  { %3825 = vmatpush1.bf16.msra.mxu0 %v8528_v33  ;;  %3856 = vmatprep.mubr.bf16.mxu0 %v9285_v10  ;;  %9370 = vst [vmem:[#allocation47_spill] sm:$0xff] %v8756_v35  ;;  %v8760_v32 = vpop.f32.mrb[130].mxu1 }
0x12f2   :  { %3826 = vmatprep.subr.bf16.mxu0 %v8534_v0  ;;  %9372 = vst [vmem:[#allocation50_spill] sm:$0xff] %v8760_v32  ;;  %v8762_v28 = vpop.f32.mrb[131].mxu1 }
0x12f3   :  { %9373 = vst [vmem:[#allocation51_spill] sm:$0xff] %v8762_v28 }
0x12f5   :  { %3827 = vmatpush1.bf16.msra.mxu0 %v8540_v41 }
0x12f6   :  { %3828 = vmatprep.subr.bf16.mxu0 %v8546_v43 }
0x12f9   :  { %3829 = vmatpush1.bf16.msra.mxu0 %v8552_v13 }
0x12fa   :  { %3830 = vmatprep.subr.bf16.mxu0 %v8558_v22 }
0x12fd   :  { %3831 = vmatpush1.bf16.msra.mxu0 %v8564_v44 }
0x12fe   :  { %3832 = vmatprep.subr.bf16.mxu0 %v8570_v31 }
0x1301   :  { %3833 = vmatpush1.bf16.msra.mxu0 %v8576_v24 }
0x1302   :  { %3834 = vmatprep.subr.bf16.mxu0 %v8582_v57 }
0x1305   :  { %3835 = vmatpush1.bf16.msra.mxu0 %v8587_v5 }
0x1306   :  { %3836 = vmatprep.subr.bf16.mxu0 %v8590_v55 }
0x1309   :  { %3837 = vmatpush1.bf16.msra.mxu0 %v8596_v53 }
0x130a   :  { %3838 = vmatprep.subr.bf16.mxu0 %v8599_v63 }
0x130d   :  { %3839 = vmatpush1.bf16.msra.mxu0 %v8610_v59 }
0x130e   :  { %6032 = vmatprep.subr.bf16.mxu0 %v9284_v8 }
0x13a3   :  { %v3662_v35 = vpop.f32.mrb[132].mxu0  ;;  %v3704_v18 = vpop.f32.mrb[132].mxu1 }
0x13a4   :  { %v3668_v58 = vadd.f32 %v3662_v35, %v3433_v45  ;;  %v3751_v39 = vadd.f32 %v3704_v18, %v3435_v11  ;;  %v5970_v32 = vpop.f32.mrb[133].mxu0  ;;  %v3706_v54 = vpop.f32.mrb[133].mxu1 }
0x13a5   :  { %v3752_v28 = vadd.f32 %v3706_v54, %v3506_v60  ;;  %v3665_v29 = vpop.f32.mrb[134].mxu0  ;;  %v3708_v1 = vpop.f32.mrb[134].mxu1 }
0x13a6   :  { %v4971_v49 = vmul.f32 -1.442695, %v3751_v39  ;;  %v5971_v6 = vpop.f32.mrb[135].mxu0  ;;  %v3709_v4 = vpop.f32.mrb[135].mxu1  ;;  %v3508_v1 = vadd.f32 %v8637_v25, %v8627_v16  ;;  %v3439_v25 = vadd.f32 %v8712_v61, %v8641_v62 }
0x13a7   :  { %v4972_v17 = vmul.f32 -1.442695, %v3752_v28 }
0x13a8   :  { %6708 = vpow2.f32 %v4971_v49 }
0x13a9   :  { %6710 = vpow2.f32 %v4972_v17 }
0x13aa   :  { %6712 = vtanh.f32 %v3668_v58 }
0x13b2   :  { %v6709_v15 = vpop.eup %6708 }
0x13b3   :  { %v6711_v12 = vpop.eup %6710  ;;  %v3763_v7 = vadd.f32 1.0, %v6709_v15 }
0x13b4   :  { %v3764_v50 = vadd.f32 1.0, %v6711_v12  ;;  %v6713_v45 = vpop.eup %6712  ;;  %v3441_v12 = vadd.f32 %v8714_v9, %v8623_v47 }
0x13b5   :  { %6714 = vrcp.f32 %v3763_v7 }
0x13b6   :  { %6716 = vrcp.f32 %v3764_v50  ;;  %v3512_v50 = vadd.f32 %v8716_v48, %v8766_v19 }
0x13bf   :  { %v6715_v18 = vpop.eup %6714 }
0x13c0   :  { %v6717_v32 = vpop.eup %6716  ;;  %v3773_v11 = vmul.f32 %v6715_v18, %v6713_v45 }
0x13c1   :  { %v3772_v29 = vmul.f32 %v6717_v32, %v8644_v34 }
0x13c3   :  { %v8777_v4 = vadd.f32 %v3773_v11, %v3772_v29  ;;  %v3745_v54 = vpop.f32.mrb[136].mxu0 }
0x13c4   :  { %v3753_v17 = vadd.f32 %v3745_v54, %v3508_v1  ;;  %v5990_v28 = vpop.f32.mrb[137].mxu0 }
0x13c5   :  { %v3748_v39 = vpop.f32.mrb[138].mxu0 }
0x13c6   :  { %v4973_v60 = vmul.f32 -1.442695, %v3753_v17  ;;  %v5991_v58 = vpop.f32.mrb[139].mxu0 }
0x13c8   :  { %6718 = vpow2.f32 %v4973_v60 }
0x13c9   :  { %6720 = vtanh.f32 %v8777_v4 }
0x13d2   :  { %v6719_v7 = vpop.eup %6718 }
0x13d3   :  { %v3765_v35 = vadd.f32 1.0, %v6719_v7  ;;  %v6721_v49 = vpop.eup %6720 }
0x13d5   :  { %6722 = vrcp.f32 %v3765_v35 }
0x13df   :  { %v6723_v6 = vpop.eup %6722 }
0x13e0   :  { %v3776_v34 = vmul.f32 %v6723_v6, %v6721_v49 }
0x13e2   :  { %v3777_v15 = vpack.c.bf16 %v3776_v34, %v3776_v34 }
0x13e4   :  { %6009 = vmatmul.mubr.bf16.vlgmr.msra.gmra.mrb[136].mxu1 %v3777_v15  ;;  %3857 = vmatmul.mubr.bf16.vlgmr.msra.gmra.mrb[140].mxu0 %v3777_v15 }
0x13e5   :  { %6013 = vmatpush3.bf16.msra.mxu1 %v8647_v36  ;;  %6028 = vmatprep.mubr.msk.bf16.mxu1 %vm6931_vm0, %v9284_v8 }
0x13e6   :  { %6014 = vmatprep.subr.bf16.mxu1 %v9284_v8  ;;  %6033 = vmatpush3.bf16.msra.mxu0 %v8522_v21 }
0x13e7   :  { %6034 = vmatprep.subr.bf16.mxu0 %v9284_v8  ;;  %6048 = vmatprep.mubr.msk.bf16.mxu0 %vm6931_vm0, %v9284_v8 }
0x13e9   :  { %6015 = vmatpush3.bf16.msra.mxu1 %v8653_v3 }
0x13ea   :  { %6016 = vmatprep.subr.bf16.mxu1 %v9284_v8  ;;  %6035 = vmatpush3.bf16.msra.mxu0 %v8532_v30 }
0x13eb   :  { %6036 = vmatprep.subr.bf16.mxu0 %v9284_v8 }
0x13ed   :  { %6017 = vmatpush3.bf16.msra.mxu1 %v8661_v37 }
0x13ee   :  { %6018 = vmatprep.subr.bf16.mxu1 %v9284_v8  ;;  %6037 = vmatpush3.bf16.msra.mxu0 %v8544_v42 }
0x13ef   :  { %6038 = vmatprep.subr.bf16.mxu0 %v9284_v8 }
0x13f1   :  { %6019 = vmatpush3.bf16.msra.mxu1 %v8667_v20 }
0x13f2   :  { %6020 = vmatprep.subr.bf16.mxu1 %v9284_v8  ;;  %6039 = vmatpush3.bf16.msra.mxu0 %v8556_v14 }
0x13f3   :  { %6040 = vmatprep.subr.bf16.mxu0 %v9284_v8 }
0x13f5   :  { %6021 = vmatpush3.bf16.msra.mxu1 %v8673_v38 }
0x13f6   :  { %6022 = vmatprep.subr.bf16.mxu1 %v9284_v8  ;;  %6041 = vmatpush3.bf16.msra.mxu0 %v8568_v46 }
0x13f7   :  { %6042 = vmatprep.subr.bf16.mxu0 %v9284_v8 }
0x13f9   :  { %6023 = vmatpush3.bf16.msra.mxu1 %v8679_v23 }
0x13fa   :  { %6024 = vmatprep.subr.bf16.mxu1 %v9284_v8  ;;  %6043 = vmatpush3.bf16.msra.mxu0 %v8580_v26 }
0x13fb   :  { %6044 = vmatprep.subr.bf16.mxu0 %v9284_v8 }
0x13fd   :  { %6025 = vmatpush3.bf16.msra.mxu1 %v8685_v52 }
0x13fe   :  { %6026 = vmatprep.subr.bf16.mxu1 %v9284_v8  ;;  %6045 = vmatpush3.bf16.msra.mxu0 %v8593_v40 }
0x13ff   :  { %6046 = vmatprep.subr.bf16.mxu0 %v9284_v8 }
0x1401   :  { %6027 = vmatpush3.bf16.msra.mxu1 %v8691_v51 }
0x1402   :  { %3978 = vmatprep.subr.bf16.mxu1 %v8524_v27  ;;  %6047 = vmatpush3.bf16.msra.mxu0 %v8607_v56 }
0x1403   :  { %6052 = vmatprep.subr.bf16.mxu0 %v9284_v8 }
0x1404   :  { %6029 = vmatmul.mubr.bf16.vlgmr.msra.gmra.mrb[140].mxu1 %v3777_v15 }
0x1405   :  { %3979 = vmatpush1.bf16.msra.mxu1 %v8528_v33  ;;  %4010 = vmatprep.mubr.bf16.mxu1 %v9285_v10 }
0x1406   :  { %3980 = vmatprep.subr.bf16.mxu1 %v8534_v0 }
0x1409   :  { %3981 = vmatpush1.bf16.msra.mxu1 %v8540_v41 }
0x140a   :  { %3982 = vmatprep.subr.bf16.mxu1 %v8546_v43 }
0x140d   :  { %3983 = vmatpush1.bf16.msra.mxu1 %v8552_v13 }
0x140e   :  { %3984 = vmatprep.subr.bf16.mxu1 %v8558_v22 }
0x1411   :  { %3985 = vmatpush1.bf16.msra.mxu1 %v8564_v44 }
0x1412   :  { %3986 = vmatprep.subr.bf16.mxu1 %v8570_v31 }
0x1415   :  { %3987 = vmatpush1.bf16.msra.mxu1 %v8576_v24 }
0x1416   :  { %3988 = vmatprep.subr.bf16.mxu1 %v8582_v57 }
0x1419   :  { %3989 = vmatpush1.bf16.msra.mxu1 %v8587_v5 }
0x141a   :  { %3990 = vmatprep.subr.bf16.mxu1 %v8590_v55 }
0x141d   :  { %3991 = vmatpush1.bf16.msra.mxu1 %v8596_v53 }
0x141e   :  { %3992 = vmatprep.subr.bf16.mxu1 %v8599_v63 }
0x1421   :  { %3993 = vmatpush1.bf16.msra.mxu1 %v8610_v59 }
0x1422   :  { %6072 = vmatprep.subr.bf16.mxu1 %v9284_v8 }
0x14b7   :  { %v3816_v45 = vpop.f32.mrb[136].mxu1  ;;  %v3858_v18 = vpop.f32.mrb[140].mxu0 }
0x14b8   :  { %v3822_v32 = vadd.f32 %v3816_v45, %v3439_v25  ;;  %v3905_v11 = vadd.f32 %v3858_v18, %v3441_v12  ;;  %v6010_v29 = vpop.f32.mrb[137].mxu1  ;;  %v3860_v1 = vpop.f32.mrb[141].mxu0  ;;  %v3514_v12 = vadd.f32 %v8721_v2, %v8627_v16  ;;  %v9375_v2 = vld [vmem:[#allocation32_spill] sm:$0xff] }
0x14b9   :  { %v3906_v54 = vadd.f32 %v3860_v1, %v3512_v50  ;;  %v3819_v17 = vpop.f32.mrb[138].mxu1  ;;  %v3862_v28 = vpop.f32.mrb[142].mxu0 }
0x14ba   :  { %v4974_v39 = vmul.f32 -1.442695, %v3905_v11  ;;  %v6011_v60 = vpop.f32.mrb[139].mxu1  ;;  %v3863_v58 = vpop.f32.mrb[143].mxu0 }
0x14bb   :  { %v4975_v7 = vmul.f32 -1.442695, %v3906_v54  ;;  %v3443_v58 = vadd.f32 %v9375_v2, %v8641_v62 }
0x14bc   :  { %6724 = vpow2.f32 %v4974_v39 }
0x14bd   :  { %6726 = vpow2.f32 %v4975_v7  ;;  %v9376_v7 = vld [vmem:[#allocation33_spill] sm:$0xff] }
0x14be   :  { %6728 = vtanh.f32 %v3822_v32 }
0x14c6   :  { %v6725_v61 = vpop.eup %6724 }
0x14c7   :  { %v6727_v9 = vpop.eup %6726  ;;  %v3917_v35 = vadd.f32 1.0, %v6725_v61  ;;  %v3445_v61 = vadd.f32 %v9376_v7, %v8623_v47 }
0x14c8   :  { %v3918_v48 = vadd.f32 1.0, %v6727_v9  ;;  %v6729_v49 = vpop.eup %6728  ;;  %v9377_v9 = vld [vmem:[#allocation34_spill] sm:$0xff] }
0x14c9   :  { %6730 = vrcp.f32 %v3917_v35  ;;  %v3516_v35 = vadd.f32 %v9377_v9, %v8766_v19 }
0x14ca   :  { %6732 = vrcp.f32 %v3918_v48 }
0x14d3   :  { %v6731_v6 = vpop.eup %6730 }
0x14d4   :  { %v6733_v34 = vpop.eup %6732  ;;  %v3927_v15 = vmul.f32 %v6731_v6, %v6729_v49 }
0x14d5   :  { %v3926_v25 = vmul.f32 %v6733_v34, %v8777_v4 }
0x14d7   :  { %v8842_v50 = vadd.f32 %v3927_v15, %v3926_v25  ;;  %v3899_v45 = vpop.f32.mrb[140].mxu1 }
0x14d8   :  { %v3907_v18 = vadd.f32 %v3899_v45, %v3514_v12  ;;  %v6030_v11 = vpop.f32.mrb[141].mxu1 }
0x14d9   :  { %v3902_v29 = vpop.f32.mrb[142].mxu1 }
0x14da   :  { %v4976_v1 = vmul.f32 -1.442695, %v3907_v18  ;;  %v6031_v32 = vpop.f32.mrb[143].mxu1 }
0x14dc   :  { %6734 = vpow2.f32 %v4976_v1 }
0x14dd   :  { %6736 = vtanh.f32 %v8842_v50 }
0x14e6   :  { %v6735_v54 = vpop.eup %6734 }
0x14e7   :  { %v3919_v17 = vadd.f32 1.0, %v6735_v54  ;;  %v6737_v28 = vpop.eup %6736 }
0x14e9   :  { %6738 = vrcp.f32 %v3919_v17 }
0x14f3   :  { %v6739_v39 = vpop.eup %6738 }
0x14f4   :  { %v3930_v4 = vmul.f32 %v6739_v39, %v6737_v28 }
0x14f6   :  { %v3931_v60 = vpack.c.bf16 %v3930_v4, %v3930_v4 }
0x14f8   :  { %6049 = vmatmul.mubr.bf16.vlgmr.msra.gmra.mrb[144].mxu0 %v3931_v60  ;;  %4011 = vmatmul.mubr.bf16.vlgmr.msra.gmra.mrb[144].mxu1 %v3931_v60 }
0x14f9   :  { %6053 = vmatpush3.bf16.msra.mxu0 %v8647_v36  ;;  %6068 = vmatprep.mubr.msk.bf16.mxu0 %vm6931_vm0, %v9284_v8 }
0x14fa   :  { %6054 = vmatprep.subr.bf16.mxu0 %v9284_v8  ;;  %6073 = vmatpush3.bf16.msra.mxu1 %v8522_v21 }
0x14fb   :  { %6074 = vmatprep.subr.bf16.mxu1 %v9284_v8  ;;  %6088 = vmatprep.mubr.msk.bf16.mxu1 %vm6931_vm0, %v9284_v8 }
0x14fd   :  { %6055 = vmatpush3.bf16.msra.mxu0 %v8653_v3 }
0x14fe   :  { %6056 = vmatprep.subr.bf16.mxu0 %v9284_v8  ;;  %6075 = vmatpush3.bf16.msra.mxu1 %v8532_v30 }
0x14ff   :  { %6076 = vmatprep.subr.bf16.mxu1 %v9284_v8 }
0x1501   :  { %6057 = vmatpush3.bf16.msra.mxu0 %v8661_v37 }
0x1502   :  { %6058 = vmatprep.subr.bf16.mxu0 %v9284_v8  ;;  %6077 = vmatpush3.bf16.msra.mxu1 %v8544_v42 }
0x1503   :  { %6078 = vmatprep.subr.bf16.mxu1 %v9284_v8 }
0x1505   :  { %6059 = vmatpush3.bf16.msra.mxu0 %v8667_v20 }
0x1506   :  { %6060 = vmatprep.subr.bf16.mxu0 %v9284_v8  ;;  %6079 = vmatpush3.bf16.msra.mxu1 %v8556_v14 }
0x1507   :  { %6080 = vmatprep.subr.bf16.mxu1 %v9284_v8 }
0x1509   :  { %6061 = vmatpush3.bf16.msra.mxu0 %v8673_v38 }
0x150a   :  { %6062 = vmatprep.subr.bf16.mxu0 %v9284_v8  ;;  %6081 = vmatpush3.bf16.msra.mxu1 %v8568_v46 }
0x150b   :  { %6082 = vmatprep.subr.bf16.mxu1 %v9284_v8 }
0x150d   :  { %6063 = vmatpush3.bf16.msra.mxu0 %v8679_v23 }
0x150e   :  { %6064 = vmatprep.subr.bf16.mxu0 %v9284_v8  ;;  %6083 = vmatpush3.bf16.msra.mxu1 %v8580_v26 }
0x150f   :  { %6084 = vmatprep.subr.bf16.mxu1 %v9284_v8 }
0x1511   :  { %6065 = vmatpush3.bf16.msra.mxu0 %v8685_v52 }
0x1512   :  { %6066 = vmatprep.subr.bf16.mxu0 %v9284_v8  ;;  %6085 = vmatpush3.bf16.msra.mxu1 %v8593_v40 }
0x1513   :  { %6086 = vmatprep.subr.bf16.mxu1 %v9284_v8 }
0x1515   :  { %6067 = vmatpush3.bf16.msra.mxu0 %v8691_v51 }
0x1516   :  { %4132 = vmatprep.subr.bf16.mxu0 %v8524_v27  ;;  %6087 = vmatpush3.bf16.msra.mxu1 %v8607_v56 }
0x1517   :  { %6092 = vmatprep.subr.bf16.mxu1 %v9284_v8 }
0x1518   :  { %6069 = vmatmul.mubr.bf16.vlgmr.msra.gmra.mrb[148].mxu0 %v3931_v60 }
0x1519   :  { %4133 = vmatpush1.bf16.msra.mxu0 %v8528_v33  ;;  %4164 = vmatprep.mubr.bf16.mxu0 %v9285_v10 }
0x151a   :  { %4134 = vmatprep.subr.bf16.mxu0 %v8534_v0 }
0x151d   :  { %4135 = vmatpush1.bf16.msra.mxu0 %v8540_v41 }
0x151e   :  { %4136 = vmatprep.subr.bf16.mxu0 %v8546_v43 }
0x1521   :  { %4137 = vmatpush1.bf16.msra.mxu0 %v8552_v13 }
0x1522   :  { %4138 = vmatprep.subr.bf16.mxu0 %v8558_v22 }
0x1525   :  { %4139 = vmatpush1.bf16.msra.mxu0 %v8564_v44 }
0x1526   :  { %4140 = vmatprep.subr.bf16.mxu0 %v8570_v31 }
0x1529   :  { %4141 = vmatpush1.bf16.msra.mxu0 %v8576_v24 }
0x152a   :  { %4142 = vmatprep.subr.bf16.mxu0 %v8582_v57 }
0x152d   :  { %4143 = vmatpush1.bf16.msra.mxu0 %v8587_v5 }
0x152e   :  { %4144 = vmatprep.subr.bf16.mxu0 %v8590_v55 }
0x1531   :  { %4145 = vmatpush1.bf16.msra.mxu0 %v8596_v53 }
0x1532   :  { %4146 = vmatprep.subr.bf16.mxu0 %v8599_v63 }
0x1535   :  { %4147 = vmatpush1.bf16.msra.mxu0 %v8610_v59 }
0x1536   :  { %6112 = vmatprep.subr.bf16.mxu0 %v9284_v8 }
0x15cb   :  { %v3970_v48 = vpop.f32.mrb[144].mxu0  ;;  %v4012_v49 = vpop.f32.mrb[144].mxu1 }
0x15cc   :  { %v3976_v6 = vadd.f32 %v3970_v48, %v3443_v58  ;;  %v4059_v34 = vadd.f32 %v4012_v49, %v3445_v61  ;;  %v6050_v15 = vpop.f32.mrb[145].mxu0  ;;  %v4014_v25 = vpop.f32.mrb[145].mxu1  ;;  %v9378_v61 = vld [vmem:[#allocation35_spill] sm:$0xff] }
0x15cd   :  { %v4060_v12 = vadd.f32 %v4014_v25, %v3516_v35  ;;  %v3973_v45 = vpop.f32.mrb[146].mxu0  ;;  %v4016_v18 = vpop.f32.mrb[146].mxu1  ;;  %v3518_v9 = vadd.f32 %v9378_v61, %v8627_v16 }
0x15ce   :  { %v4977_v11 = vmul.f32 -1.442695, %v4059_v34  ;;  %v6051_v29 = vpop.f32.mrb[147].mxu0  ;;  %v4017_v1 = vpop.f32.mrb[147].mxu1 }
0x15cf   :  { %v4978_v32 = vmul.f32 -1.442695, %v4060_v12 }
0x15d0   :  { %6740 = vpow2.f32 %v4977_v11 }
0x15d1   :  { %6742 = vpow2.f32 %v4978_v32 }
0x15d2   :  { %6744 = vtanh.f32 %v3976_v6 }
0x15da   :  { %v6741_v54 = vpop.eup %6740 }
0x15db   :  { %v6743_v17 = vpop.eup %6742  ;;  %v4071_v28 = vadd.f32 1.0, %v6741_v54 }
0x15dc   :  { %v4072_v39 = vadd.f32 1.0, %v6743_v17  ;;  %v6745_v4 = vpop.eup %6744 }
0x15dd   :  { %6746 = vrcp.f32 %v4071_v28  ;;  %v9382_v28 = vld [vmem:[#allocation39_spill] sm:$0xff] }
0x15de   :  { %6748 = vrcp.f32 %v4072_v39  ;;  %v3524_v39 = vadd.f32 %v9382_v28, %v8627_v16 }
0x15e7   :  { %v6747_v60 = vpop.eup %6746 }
0x15e8   :  { %v6749_v2 = vpop.eup %6748  ;;  %v4081_v58 = vmul.f32 %v6747_v60, %v6745_v4 }
0x15e9   :  { %v4080_v7 = vmul.f32 %v6749_v2, %v8842_v50 }
0x15eb   :  { %v8907_v35 = vadd.f32 %v4081_v58, %v4080_v7  ;;  %v4053_v48 = vpop.f32.mrb[148].mxu0 }
0x15ec   :  { %v4061_v49 = vadd.f32 %v4053_v48, %v3518_v9  ;;  %v6070_v34 = vpop.f32.mrb[149].mxu0 }
0x15ed   :  { %v4056_v15 = vpop.f32.mrb[150].mxu0 }
0x15ee   :  { %v4979_v25 = vmul.f32 -1.442695, %v4061_v49  ;;  %v6071_v6 = vpop.f32.mrb[151].mxu0 }
0x15ef   :  { %v8979_v6 = vld [vmem:[#allocation7] sm:$0xff] }
0x15f0   :  { %6750 = vpow2.f32 %v4979_v25 }
0x15f1   :  { %6752 = vtanh.f32 %v8907_v35 }
0x15fa   :  { %v6751_v12 = vpop.eup %6750 }
0x15fb   :  { %v4073_v45 = vadd.f32 1.0, %v6751_v12  ;;  %v6753_v18 = vpop.eup %6752  ;;  %v8987_v12 = vld [vmem:[#allocation7 + $0x20] sm:$0xff] }
0x15fd   :  { %6754 = vrcp.f32 %v4073_v45  ;;  %v9025_v45 = vld [vmem:[#allocation7 + $0xe0] sm:$0xff] }
0x1607   :  { %v6755_v11 = vpop.eup %6754 }
0x1608   :  { %v4084_v50 = vmul.f32 %v6755_v11, %v6753_v18  ;;  %v9033_v18 = vld [vmem:[#allocation7 + $0x30] sm:$0xff] }
0x1609   :  { %v9039_v11 = vld [vmem:[#allocation7 + $0x50] sm:$0xff] }
0x160a   :  { %v4085_v29 = vpack.c.bf16 %v4084_v50, %v4084_v50  ;;  %v9042_v50 = vld [vmem:[#allocation7 + $0x48] sm:$0xff] }
0x160c   :  { %6089 = vmatmul.mubr.bf16.vlgmr.msra.gmra.mrb[148].mxu1 %v4085_v29  ;;  %4165 = vmatmul.mubr.bf16.vlgmr.msra.gmra.mrb[152].mxu0 %v4085_v29 }
0x160d   :  { %6093 = vmatpush3.bf16.msra.mxu1 %v8647_v36  ;;  %6108 = vmatprep.mubr.msk.bf16.mxu1 %vm6931_vm0, %v9284_v8 }
0x160e   :  { %6094 = vmatprep.subr.bf16.mxu1 %v9284_v8  ;;  %6113 = vmatpush3.bf16.msra.mxu0 %v8522_v21  ;;  %v9379_v21 = vld [vmem:[#allocation37_spill] sm:$0xff] }
0x160f   :  { %6114 = vmatprep.subr.bf16.mxu0 %v9284_v8  ;;  %6128 = vmatprep.mubr.msk.bf16.mxu0 %vm6931_vm0, %v9284_v8 }
0x1611   :  { %6095 = vmatpush3.bf16.msra.mxu1 %v8653_v3 }
0x1612   :  { %6096 = vmatprep.subr.bf16.mxu1 %v9284_v8  ;;  %6115 = vmatpush3.bf16.msra.mxu0 %v8532_v30 }
0x1613   :  { %6116 = vmatprep.subr.bf16.mxu0 %v9284_v8 }
0x1615   :  { %6097 = vmatpush3.bf16.msra.mxu1 %v8661_v37 }
0x1616   :  { %6098 = vmatprep.subr.bf16.mxu1 %v9284_v8  ;;  %6117 = vmatpush3.bf16.msra.mxu0 %v8544_v42 }
0x1617   :  { %6118 = vmatprep.subr.bf16.mxu0 %v9284_v8 }
0x1619   :  { %6099 = vmatpush3.bf16.msra.mxu1 %v8667_v20 }
0x161a   :  { %6100 = vmatprep.subr.bf16.mxu1 %v9284_v8  ;;  %6119 = vmatpush3.bf16.msra.mxu0 %v8556_v14 }
0x161b   :  { %6120 = vmatprep.subr.bf16.mxu0 %v9284_v8 }
0x161d   :  { %6101 = vmatpush3.bf16.msra.mxu1 %v8673_v38 }
0x161e   :  { %6102 = vmatprep.subr.bf16.mxu1 %v9284_v8  ;;  %6121 = vmatpush3.bf16.msra.mxu0 %v8568_v46 }
0x161f   :  { %6122 = vmatprep.subr.bf16.mxu0 %v9284_v8 }
0x1621   :  { %6103 = vmatpush3.bf16.msra.mxu1 %v8679_v23 }
0x1622   :  { %6104 = vmatprep.subr.bf16.mxu1 %v9284_v8  ;;  %6123 = vmatpush3.bf16.msra.mxu0 %v8580_v26 }
0x1623   :  { %6124 = vmatprep.subr.bf16.mxu0 %v9284_v8 }
0x1625   :  { %6105 = vmatpush3.bf16.msra.mxu1 %v8685_v52 }
0x1626   :  { %6106 = vmatprep.subr.bf16.mxu1 %v9284_v8  ;;  %6125 = vmatpush3.bf16.msra.mxu0 %v8593_v40 }
0x1627   :  { %6126 = vmatprep.subr.bf16.mxu0 %v9284_v8 }
0x1629   :  { %6107 = vmatpush3.bf16.msra.mxu1 %v8691_v51 }
0x162a   :  { %4286 = vmatprep.subr.bf16.mxu1 %v8524_v27  ;;  %6127 = vmatpush3.bf16.msra.mxu0 %v8607_v56  ;;  %v3449_v27 = vadd.f32 %v9379_v21, %v8641_v62  ;;  %v9048_v21 = vld [vmem:[#allocation7 + $0x68] sm:$0xff] }
0x162b   :  { %6132 = vmatprep.subr.bf16.mxu0 %v9284_v8 }
0x162c   :  { %6109 = vmatmul.mubr.bf16.vlgmr.msra.gmra.mrb[152].mxu1 %v4085_v29  ;;  %v9045_v29 = vld [vmem:[#allocation7 + $0x70] sm:$0xff] }
0x162d   :  { %4287 = vmatpush1.bf16.msra.mxu1 %v8528_v33  ;;  %4318 = vmatprep.mubr.bf16.mxu1 %v9285_v10  ;;  %v9380_v33 = vld [vmem:[#allocation36_spill] sm:$0xff] }
0x162e   :  { %4288 = vmatprep.subr.bf16.mxu1 %v8534_v0  ;;  %v3451_v30 = vadd.f32 %v9380_v33, %v8623_v47  ;;  %v9381_v0 = vld [vmem:[#allocation38_spill] sm:$0xff]  ;;  %v9054_v33 = vld [vmem:[#allocation7 + $0x88] sm:$0xff] }
0x1631   :  { %4289 = vmatpush1.bf16.msra.mxu1 %v8540_v41  ;;  %v3522_v41 = vadd.f32 %v9381_v0, %v8766_v19  ;;  %v9060_v0 = vld [vmem:[#allocation7 + $0xa8] sm:$0xff] }
0x1632   :  { %4290 = vmatprep.subr.bf16.mxu1 %v8546_v43 }
0x1635   :  { %4291 = vmatpush1.bf16.msra.mxu1 %v8552_v13 }
0x1636   :  { %4292 = vmatprep.subr.bf16.mxu1 %v8558_v22 }
0x1639   :  { %4293 = vmatpush1.bf16.msra.mxu1 %v8564_v44 }
0x163a   :  { %4294 = vmatprep.subr.bf16.mxu1 %v8570_v31 }
0x163d   :  { %4295 = vmatpush1.bf16.msra.mxu1 %v8576_v24 }
0x163e   :  { %4296 = vmatprep.subr.bf16.mxu1 %v8582_v57 }
0x1641   :  { %4297 = vmatpush1.bf16.msra.mxu1 %v8587_v5 }
0x1642   :  { %4298 = vmatprep.subr.bf16.mxu1 %v8590_v55 }
0x1645   :  { %4299 = vmatpush1.bf16.msra.mxu1 %v8596_v53 }
0x1646   :  { %4300 = vmatprep.subr.bf16.mxu1 %v8599_v63 }
0x1649   :  { %4301 = vmatpush1.bf16.msra.mxu1 %v8610_v59 }
0x164a   :  { %6152 = vmatprep.subr.bf16.mxu1 %v9284_v8 }
0x16df   :  { %v4124_v42 = vpop.f32.mrb[148].mxu1  ;;  %v4166_v43 = vpop.f32.mrb[152].mxu0 }
0x16e0   :  { %v4130_v13 = vadd.f32 %v4124_v42, %v3449_v27  ;;  %v4213_v14 = vadd.f32 %v4166_v43, %v3451_v30  ;;  %v6090_v22 = vpop.f32.mrb[149].mxu1  ;;  %v4168_v44 = vpop.f32.mrb[153].mxu0  ;;  %v9051_v27 = vld [vmem:[#allocation7 + $0x90] sm:$0xff]  ;;  %v9066_v42 = vld [vmem:[#allocation7 + $0xc8] sm:$0xff] }
0x16e1   :  { %v4214_v46 = vadd.f32 %v4168_v44, %v3522_v41  ;;  %v4127_v31 = vpop.f32.mrb[150].mxu1  ;;  %v4170_v24 = vpop.f32.mrb[154].mxu0  ;;  %v9057_v30 = vld [vmem:[#allocation7 + $0xb0] sm:$0xff] }
0x16e2   :  { %v4980_v26 = vmul.f32 -1.442695, %v4213_v14  ;;  %v6091_v57 = vpop.f32.mrb[151].mxu1  ;;  %v4171_v5 = vpop.f32.mrb[155].mxu0  ;;  %v9063_v41 = vld [vmem:[#allocation7 + $0xd0] sm:$0xff]  ;;  %v9383_v14 = vld [vmem:[#allocation40_spill] sm:$0xff] }
0x16e3   :  { %v4981_v55 = vmul.f32 -1.442695, %v4214_v46  ;;  %v9069_v43 = vld [vmem:[#allocation7 + $0xf0] sm:$0xff]  ;;  %v3453_v22 = vadd.f32 %v9383_v14, %v8641_v62  ;;  %v9385_v31 = vld [vmem:[#allocation42_spill] sm:$0xff] }
0x16e4   :  { %6756 = vpow2.f32 %v4980_v26  ;;  %v9384_v44 = vld [vmem:[#allocation41_spill] sm:$0xff]  ;;  %v3526_v24 = vadd.f32 %v9385_v31, %v8766_v19 }
0x16e5   :  { %6758 = vpow2.f32 %v4981_v55  ;;  %v3455_v46 = vadd.f32 %v9384_v44, %v8623_v47 }
0x16e6   :  { %6760 = vtanh.f32 %v4130_v13  ;;  %v9072_v13 = vld [vmem:[#allocation7 + $0xe8] sm:$0xff] }
0x16ee   :  { %v6757_v40 = vpop.eup %6756 }
0x16ef   :  { %v6759_v53 = vpop.eup %6758  ;;  %v4225_v63 = vadd.f32 1.0, %v6757_v40 }
0x16f0   :  { %v4226_v56 = vadd.f32 1.0, %v6759_v53  ;;  %v6761_v59 = vpop.eup %6760 }
0x16f1   :  { %6762 = vrcp.f32 %v4225_v63 }
0x16f2   :  { %6764 = vrcp.f32 %v4226_v56 }
0x16fb   :  { %v6763_v1 = vpop.eup %6762 }
0x16fc   :  { %v6765_v32 = vpop.eup %6764  ;;  %v4235_v54 = vmul.f32 %v6763_v1, %v6761_v59 }
0x16fd   :  { %v4234_v17 = vmul.f32 %v6765_v32, %v8907_v35 }
0x16ff   :  { %v8972_v4 = vadd.f32 %v4235_v54, %v4234_v17  ;;  %v4207_v60 = vpop.f32.mrb[152].mxu1 }
0x1700   :  { %v4215_v2 = vadd.f32 %v4207_v60, %v3524_v39  ;;  %v6110_v58 = vpop.f32.mrb[153].mxu1 }
0x1701   :  { %v4210_v7 = vpop.f32.mrb[154].mxu1 }
0x1702   :  { %v4982_v61 = vmul.f32 -1.442695, %v4215_v2  ;;  %v6111_v9 = vpop.f32.mrb[155].mxu1 }
0x1704   :  { %6766 = vpow2.f32 %v4982_v61 }
0x1705   :  { %6768 = vtanh.f32 %v8972_v4 }
0x170e   :  { %v6767_v48 = vpop.eup %6766 }
0x170f   :  { %v4227_v49 = vadd.f32 1.0, %v6767_v48  ;;  %v6769_v34 = vpop.eup %6768 }
0x1711   :  { %6770 = vrcp.f32 %v4227_v49  ;;  %v9386_v49 = vld [vmem:[#allocation43_spill] sm:$0xff] }
0x171b   :  { %v6771_v15 = vpop.eup %6770 }
0x171c   :  { %v4238_v35 = vmul.f32 %v6771_v15, %v6769_v34  ;;  %v3528_v34 = vadd.f32 %v9386_v49, %v8627_v16 }
0x171e   :  { %v4239_v25 = vpack.c.bf16 %v4238_v35, %v4238_v35 }
0x1720   :  { %6129 = vmatmul.mubr.bf16.vlgmr.msra.gmra.mrb[156].mxu0 %v4239_v25  ;;  %4319 = vmatmul.mubr.bf16.vlgmr.msra.gmra.mrb[156].mxu1 %v4239_v25 }
0x1721   :  { %6133 = vmatpush3.bf16.msra.mxu0 %v8647_v36  ;;  %6148 = vmatprep.mubr.msk.bf16.mxu0 %vm6931_vm0, %v9284_v8  ;;  %v8993_v36 = vld [vmem:[#allocation7 + $0x40] sm:$0xff] }
0x1722   :  { %6134 = vmatprep.subr.bf16.mxu0 %v9284_v8  ;;  %6153 = vmatpush3.bf16.msra.mxu1 %v8979_v6 }
0x1723   :  { %6154 = vmatprep.subr.bf16.mxu1 %v9284_v8  ;;  %6168 = vmatprep.mubr.msk.bf16.mxu1 %vm6931_vm0, %v9284_v8 }
0x1725   :  { %6135 = vmatpush3.bf16.msra.mxu0 %v8653_v3  ;;  %v8999_v3 = vld [vmem:[#allocation7 + $0x60] sm:$0xff] }
0x1726   :  { %6136 = vmatprep.subr.bf16.mxu0 %v9284_v8  ;;  %6155 = vmatpush3.bf16.msra.mxu1 %v8987_v12 }
0x1727   :  { %6156 = vmatprep.subr.bf16.mxu1 %v9284_v8 }
0x1729   :  { %6137 = vmatpush3.bf16.msra.mxu0 %v8661_v37  ;;  %v9005_v37 = vld [vmem:[#allocation7 + $0x80] sm:$0xff] }
0x172a   :  { %6138 = vmatprep.subr.bf16.mxu0 %v9284_v8  ;;  %6157 = vmatpush3.bf16.msra.mxu1 %v8993_v36 }
0x172b   :  { %6158 = vmatprep.subr.bf16.mxu1 %v9284_v8 }
0x172d   :  { %6139 = vmatpush3.bf16.msra.mxu0 %v8667_v20  ;;  %v9011_v20 = vld [vmem:[#allocation7 + $0xa0] sm:$0xff] }
0x172e   :  { %6140 = vmatprep.subr.bf16.mxu0 %v9284_v8  ;;  %6159 = vmatpush3.bf16.msra.mxu1 %v8999_v3 }
0x172f   :  { %6160 = vmatprep.subr.bf16.mxu1 %v9284_v8 }
0x1731   :  { %6141 = vmatpush3.bf16.msra.mxu0 %v8673_v38  ;;  %v9017_v38 = vld [vmem:[#allocation7 + $0xc0] sm:$0xff] }
0x1732   :  { %6142 = vmatprep.subr.bf16.mxu0 %v9284_v8  ;;  %6161 = vmatpush3.bf16.msra.mxu1 %v9005_v37 }
0x1733   :  { %6162 = vmatprep.subr.bf16.mxu1 %v9284_v8 }
0x1735   :  { %6143 = vmatpush3.bf16.msra.mxu0 %v8679_v23  ;;  %v9022_v23 = vld [vmem:[#allocation7 + $0x10] sm:$0xff] }
0x1736   :  { %6144 = vmatprep.subr.bf16.mxu0 %v9284_v8  ;;  %6163 = vmatpush3.bf16.msra.mxu1 %v9011_v20 }
0x1737   :  { %6164 = vmatprep.subr.bf16.mxu1 %v9284_v8 }
0x1739   :  { %6145 = vmatpush3.bf16.msra.mxu0 %v8685_v52  ;;  %v9029_v52 = vld [vmem:[#allocation7 + $0x8] sm:$0xff] }
0x173a   :  { %6146 = vmatprep.subr.bf16.mxu0 %v9284_v8  ;;  %6165 = vmatpush3.bf16.msra.mxu1 %v9017_v38 }
0x173b   :  { %6166 = vmatprep.subr.bf16.mxu1 %v9284_v8 }
0x173d   :  { %6147 = vmatpush3.bf16.msra.mxu0 %v8691_v51  ;;  %v9036_v51 = vld [vmem:[#allocation7 + $0x28] sm:$0xff] }
0x173e   :  { %4440 = vmatprep.subr.bf16.mxu0 %v9022_v23  ;;  %6167 = vmatpush3.bf16.msra.mxu1 %v9025_v45 }
0x173f   :  { %6172 = vmatprep.subr.bf16.mxu1 %v9284_v8 }
0x1740   :  { %6149 = vmatmul.mubr.bf16.vlgmr.msra.gmra.mrb[160].mxu0 %v4239_v25 }
0x1741   :  { %4441 = vmatpush1.bf16.msra.mxu0 %v9029_v52  ;;  %4472 = vmatprep.mubr.bf16.mxu0 %v9285_v10 }
0x1742   :  { %4442 = vmatprep.subr.bf16.mxu0 %v9033_v18 }
0x1745   :  { %4443 = vmatpush1.bf16.msra.mxu0 %v9036_v51 }
0x1746   :  { %4444 = vmatprep.subr.bf16.mxu0 %v9039_v11 }
0x1749   :  { %4445 = vmatpush1.bf16.msra.mxu0 %v9042_v50 }
0x174a   :  { %4446 = vmatprep.subr.bf16.mxu0 %v9045_v29 }
0x174d   :  { %4447 = vmatpush1.bf16.msra.mxu0 %v9048_v21 }
0x174e   :  { %4448 = vmatprep.subr.bf16.mxu0 %v9051_v27 }
0x1751   :  { %4449 = vmatpush1.bf16.msra.mxu0 %v9054_v33 }
0x1752   :  { %4450 = vmatprep.subr.bf16.mxu0 %v9057_v30 }
0x1755   :  { %4451 = vmatpush1.bf16.msra.mxu0 %v9060_v0 }
0x1756   :  { %4452 = vmatprep.subr.bf16.mxu0 %v9063_v41 }
0x1759   :  { %4453 = vmatpush1.bf16.msra.mxu0 %v9066_v42 }
0x175a   :  { %4454 = vmatprep.subr.bf16.mxu0 %v9069_v43 }
0x175d   :  { %4455 = vmatpush1.bf16.msra.mxu0 %v9072_v13 }
0x175e   :  { %6192 = vmatprep.subr.bf16.mxu0 %v9284_v8 }
0x17f3   :  { %v4278_v26 = vpop.f32.mrb[156].mxu0  ;;  %v4320_v57 = vpop.f32.mrb[156].mxu1 }
0x17f4   :  { %v4284_v5 = vadd.f32 %v4278_v26, %v3453_v22  ;;  %v4367_v55 = vadd.f32 %v4320_v57, %v3455_v46  ;;  %v6130_v40 = vpop.f32.mrb[157].mxu0  ;;  %v4322_v53 = vpop.f32.mrb[157].mxu1 }
0x17f5   :  { %v4368_v63 = vadd.f32 %v4322_v53, %v3526_v24  ;;  %v4281_v56 = vpop.f32.mrb[158].mxu0  ;;  %v4324_v59 = vpop.f32.mrb[158].mxu1  ;;  %v9098_v40 = vld [vmem:[#allocation7 + $0x38] sm:$0xff] }
0x17f6   :  { %v4983_v1 = vmul.f32 -1.442695, %v4367_v55  ;;  %v6131_v32 = vpop.f32.mrb[159].mxu0  ;;  %v4325_v54 = vpop.f32.mrb[159].mxu1  ;;  %v9088_v55 = vld [vmem:[#allocation7 + $0x18] sm:$0xff] }
0x17f7   :  { %v4984_v17 = vmul.f32 -1.442695, %v4368_v63  ;;  %v9104_v53 = vld [vmem:[#allocation7 + $0x58] sm:$0xff] }
0x17f8   :  { %6772 = vpow2.f32 %v4983_v1 }
0x17f9   :  { %6774 = vpow2.f32 %v4984_v17 }
0x17fa   :  { %6776 = vtanh.f32 %v4284_v5 }
0x1802   :  { %v6773_v28 = vpop.eup %6772 }
0x1803   :  { %v6775_v39 = vpop.eup %6774  ;;  %v4379_v60 = vadd.f32 1.0, %v6773_v28 }
0x1804   :  { %v4380_v2 = vadd.f32 1.0, %v6775_v39  ;;  %v6777_v58 = vpop.eup %6776  ;;  %v9390_v39 = vld [vmem:[#allocation47_spill] sm:$0xff] }
0x1805   :  { %6778 = vrcp.f32 %v4379_v60  ;;  %v3534_v60 = vadd.f32 %v9390_v39, %v8627_v16 }
0x1806   :  { %6780 = vrcp.f32 %v4380_v2 }
0x180f   :  { %v6779_v7 = vpop.eup %6778 }
0x1810   :  { %v6781_v61 = vpop.eup %6780  ;;  %v4389_v9 = vmul.f32 %v6779_v7, %v6777_v58 }
0x1811   :  { %v4388_v48 = vmul.f32 %v6781_v61, %v8972_v4 }
0x1813   :  { %v9085_v15 = vadd.f32 %v4389_v9, %v4388_v48  ;;  %v4361_v35 = vpop.f32.mrb[160].mxu0 }
0x1814   :  { %v4369_v25 = vadd.f32 %v4361_v35, %v3528_v34  ;;  %v6150_v14 = vpop.f32.mrb[161].mxu0 }
0x1815   :  { %v4364_v22 = vpop.f32.mrb[162].mxu0 }
0x1816   :  { %v4985_v44 = vmul.f32 -1.442695, %v4369_v25  ;;  %v6151_v46 = vpop.f32.mrb[163].mxu0 }
0x1817   :  { %v6689_v46 = vld [vmem:[%s9244_s10 + $0x8] sm:$0xff]  }
0x1818   :  { %6782 = vpow2.f32 %v4985_v44  ;;  %v6688_v44 = vld [vmem:[%s9244_s10] sm:$0xff]  }
0x1819   :  { %6784 = vtanh.f32 %v9085_v15 }
0x1822   :  { %v6783_v31 = vpop.eup %6782 }
0x1823   :  { %v4381_v24 = vadd.f32 1.0, %v6783_v31  ;;  %v6785_v26 = vpop.eup %6784  ;;  %v6690_v31 = vld [vmem:[%s9244_s10 + $0x10] sm:$0xff]  }
0x1825   :  { %6786 = vrcp.f32 %v4381_v24  ;;  %v6691_v24 = vld [vmem:[%s9244_s10 + $0x18] sm:$0xff]  }
0x182f   :  { %v6787_v57 = vpop.eup %6786 }
0x1830   :  { %v4392_v4 = vmul.f32 %v6787_v57, %v6785_v26  ;;  %v6692_v26 = vld [vmem:[%s9244_s10 + $0x20] sm:$0xff]   ;;  %v6693_v57 = vld [vmem:[%s9244_s10 + $0x28] sm:$0xff]  }
0x1832   :  { %v4393_v5 = vpack.c.bf16 %v4392_v4, %v4392_v4  ;;  %v6694_v4 = vld [vmem:[%s9244_s10 + $0x30] sm:$0xff]  }
0x1834   :  { %6169 = vmatmul.mubr.bf16.vlgmr.msra.gmra.mrb[160].mxu1 %v4393_v5  ;;  %4473 = vmatmul.mubr.bf16.vlgmr.msra.gmra.mrb[164].mxu0 %v4393_v5 }
0x1835   :  { %6173 = vmatpush3.bf16.msra.mxu1 %v9088_v55  ;;  %6188 = vmatprep.mubr.msk.bf16.mxu1 %vm6931_vm0, %v9284_v8 }
0x1836   :  { %6174 = vmatprep.subr.bf16.mxu1 %v9284_v8  ;;  %6193 = vmatpush3.bf16.msra.mxu0 %v8979_v6  ;;  %v9110_v6 = vld [vmem:[#allocation7 + $0x78] sm:$0xff] }
0x1837   :  { %6194 = vmatprep.subr.bf16.mxu0 %v9284_v8  ;;  %6208 = vmatprep.mubr.msk.bf16.mxu0 %vm6931_vm0, %v9284_v8 }
0x1839   :  { %6175 = vmatpush3.bf16.msra.mxu1 %v9098_v40 }
0x183a   :  { %6176 = vmatprep.subr.bf16.mxu1 %v9284_v8  ;;  %6195 = vmatpush3.bf16.msra.mxu0 %v8987_v12  ;;  %v9116_v12 = vld [vmem:[#allocation7 + $0x98] sm:$0xff] }
0x183b   :  { %6196 = vmatprep.subr.bf16.mxu0 %v9284_v8 }
0x183d   :  { %6177 = vmatpush3.bf16.msra.mxu1 %v9104_v53 }
0x183e   :  { %6178 = vmatprep.subr.bf16.mxu1 %v9284_v8  ;;  %6197 = vmatpush3.bf16.msra.mxu0 %v8993_v36  ;;  %v9122_v36 = vld [vmem:[#allocation7 + $0xb8] sm:$0xff] }
0x183f   :  { %6198 = vmatprep.subr.bf16.mxu0 %v9284_v8 }
0x1841   :  { %6179 = vmatpush3.bf16.msra.mxu1 %v9110_v6 }
0x1842   :  { %6180 = vmatprep.subr.bf16.mxu1 %v9284_v8  ;;  %6199 = vmatpush3.bf16.msra.mxu0 %v8999_v3  ;;  %v9128_v3 = vld [vmem:[#allocation7 + $0xd8] sm:$0xff] }
0x1843   :  { %6200 = vmatprep.subr.bf16.mxu0 %v9284_v8 }
0x1845   :  { %6181 = vmatpush3.bf16.msra.mxu1 %v9116_v12 }
0x1846   :  { %6182 = vmatprep.subr.bf16.mxu1 %v9284_v8  ;;  %6201 = vmatpush3.bf16.msra.mxu0 %v9005_v37  ;;  %v9134_v37 = vld [vmem:[#allocation7 + $0xf8] sm:$0xff] }
0x1847   :  { %6202 = vmatprep.subr.bf16.mxu0 %v9284_v8 }
0x1849   :  { %6183 = vmatpush3.bf16.msra.mxu1 %v9122_v36 }
0x184a   :  { %6184 = vmatprep.subr.bf16.mxu1 %v9284_v8  ;;  %6203 = vmatpush3.bf16.msra.mxu0 %v9011_v20 }
0x184b   :  { %6204 = vmatprep.subr.bf16.mxu0 %v9284_v8 }
0x184d   :  { %6185 = vmatpush3.bf16.msra.mxu1 %v9128_v3 }
0x184e   :  { %6186 = vmatprep.subr.bf16.mxu1 %v9284_v8  ;;  %6205 = vmatpush3.bf16.msra.mxu0 %v9017_v38  ;;  %v9388_v38 = vld [vmem:[#allocation44_spill] sm:$0xff] }
0x184f   :  { %6206 = vmatprep.subr.bf16.mxu0 %v9284_v8 }
0x1851   :  { %6187 = vmatpush3.bf16.msra.mxu1 %v9134_v37 }
0x1852   :  { %4594 = vmatprep.subr.bf16.mxu1 %v9022_v23  ;;  %6207 = vmatpush3.bf16.msra.mxu0 %v9025_v45  ;;  %v3461_v23 = vadd.f32 %v9388_v38, %v8623_v47  ;;  %v9389_v45 = vld [vmem:[#allocation46_spill] sm:$0xff] }
0x1853   :  { %6212 = vmatprep.subr.bf16.mxu0 %v9284_v8 }
0x1854   :  { %6189 = vmatmul.mubr.bf16.vlgmr.msra.gmra.mrb[164].mxu1 %v4393_v5  ;;  %v6695_v5 = vld [vmem:[%s9244_s10 + $0x38] sm:$0xff]  }
0x1855   :  { %4595 = vmatpush1.bf16.msra.mxu1 %v9029_v52  ;;  %4626 = vmatprep.mubr.bf16.mxu1 %v9285_v10  ;;  %v9387_v10 = vld [vmem:[#allocation45_spill] sm:$0xff]  ;;  %v3532_v52 = vadd.f32 %v9389_v45, %v8766_v19 }
0x1856   :  { %4596 = vmatprep.subr.bf16.mxu1 %v9033_v18  ;;  %v3459_v20 = vadd.f32 %v9387_v10, %v8641_v62 }
0x1859   :  { %4597 = vmatpush1.bf16.msra.mxu1 %v9036_v51 }
0x185a   :  { %4598 = vmatprep.subr.bf16.mxu1 %v9039_v11 }
0x185d   :  { %4599 = vmatpush1.bf16.msra.mxu1 %v9042_v50 }
0x185e   :  { %4600 = vmatprep.subr.bf16.mxu1 %v9045_v29 }
0x1861   :  { %4601 = vmatpush1.bf16.msra.mxu1 %v9048_v21 }
0x1862   :  { %4602 = vmatprep.subr.bf16.mxu1 %v9051_v27 }
0x1865   :  { %4603 = vmatpush1.bf16.msra.mxu1 %v9054_v33 }
0x1866   :  { %4604 = vmatprep.subr.bf16.mxu1 %v9057_v30 }
0x1869   :  { %4605 = vmatpush1.bf16.msra.mxu1 %v9060_v0 }
0x186a   :  { %4606 = vmatprep.subr.bf16.mxu1 %v9063_v41 }
0x186d   :  { %4607 = vmatpush1.bf16.msra.mxu1 %v9066_v42 }
0x186e   :  { %4608 = vmatprep.subr.bf16.mxu1 %v9069_v43 }
0x1871   :  { %4609 = vmatpush1.bf16.msra.mxu1 %v9072_v13 }
0x1872   :  { %6232 = vmatprep.subr.bf16.mxu1 %v9284_v8 }
0x1907   :  { %v4432_v18 = vpop.f32.mrb[160].mxu1  ;;  %v4474_v51 = vpop.f32.mrb[164].mxu0 }
0x1908   :  { %v4438_v11 = vadd.f32 %v4432_v18, %v3459_v20  ;;  %v4521_v50 = vadd.f32 %v4474_v51, %v3461_v23  ;;  %v6170_v29 = vpop.f32.mrb[161].mxu1  ;;  %v4476_v21 = vpop.f32.mrb[165].mxu0 }
0x1909   :  { %v4522_v27 = vadd.f32 %v4476_v21, %v3532_v52  ;;  %v4435_v33 = vpop.f32.mrb[162].mxu1  ;;  %v4478_v30 = vpop.f32.mrb[166].mxu0 }
0x190a   :  { %v4986_v0 = vmul.f32 -1.442695, %v4521_v50  ;;  %v6171_v41 = vpop.f32.mrb[163].mxu1  ;;  %v4479_v42 = vpop.f32.mrb[167].mxu0 }
0x190b   :  { %v4987_v43 = vmul.f32 -1.442695, %v4522_v27  ;;  %v9394_v41 = vld [vmem:[#allocation51_spill] sm:$0xff] }
0x190c   :  { %6788 = vpow2.f32 %v4986_v0  ;;  %v3538_v42 = vadd.f32 %v9394_v41, %v8627_v16  ;;  %v4992_v16 = vld [vmem:[%s9245_s11] ss:$0 sm:$0xff] }
0x190d   :  { %6790 = vpow2.f32 %v4987_v43 }
0x190e   :  { %6792 = vtanh.f32 %v4438_v11 }
0x1916   :  { %v6789_v13 = vpop.eup %6788 }
0x1917   :  { %v6791_v63 = vpop.eup %6790  ;;  %v4533_v56 = vadd.f32 1.0, %v6789_v13 }
0x1918   :  { %v4534_v59 = vadd.f32 1.0, %v6791_v63  ;;  %v6793_v1 = vpop.eup %6792 }
0x1919   :  { %6794 = vrcp.f32 %v4533_v56 }
0x191a   :  { %6796 = vrcp.f32 %v4534_v59 }
0x1923   :  { %v6795_v32 = vpop.eup %6794 }
0x1924   :  { %v6797_v54 = vpop.eup %6796  ;;  %v4543_v17 = vmul.f32 %v6795_v32, %v6793_v1 }
0x1925   :  { %v4542_v28 = vmul.f32 %v6797_v54, %v9085_v15 }
0x1927   :  { %v9166_v2 = vadd.f32 %v4543_v17, %v4542_v28  ;;  %v4515_v58 = vpop.f32.mrb[164].mxu1 }
0x1928   :  { %v4523_v7 = vadd.f32 %v4515_v58, %v3534_v60  ;;  %v6190_v61 = vpop.f32.mrb[165].mxu1 }
0x1929   :  { %v4518_v9 = vpop.f32.mrb[166].mxu1 }
0x192a   :  { %v4988_v48 = vmul.f32 -1.442695, %v4523_v7  ;;  %v6191_v49 = vpop.f32.mrb[167].mxu1 }
0x192c   :  { %6798 = vpow2.f32 %v4988_v48 }
0x192d   :  { %6800 = vtanh.f32 %v9166_v2 }
0x1936   :  { %v6799_v34 = vpop.eup %6798 }
0x1937   :  { %v4535_v35 = vadd.f32 1.0, %v6799_v34  ;;  %v6801_v25 = vpop.eup %6800 }
0x1939   :  { %6802 = vrcp.f32 %v4535_v35 }
0x1943   :  { %v6803_v14 = vpop.eup %6802 }
0x1944   :  { %v4546_v15 = vmul.f32 %v6803_v14, %v6801_v25 }
0x1946   :  { %v4547_v22 = vpack.c.bf16 %v4546_v15, %v4546_v15 }
0x1948   :  { %6209 = vmatmul.mubr.bf16.vlgmr.msra.gmra.mrb[168].mxu0 %v4547_v22  ;;  %4627 = vmatmul.mubr.bf16.vlgmr.msra.gmra.mrb[168].mxu1 %v4547_v22 }
0x1949   :  { %6213 = vmatpush3.bf16.msra.mxu0 %v9088_v55  ;;  %6228 = vmatprep.mubr.msk.bf16.mxu0 %vm6931_vm0, %v9284_v8  ;;  %v9391_v55 = vld [vmem:[#allocation48_spill] sm:$0xff] }
0x194a   :  { %6214 = vmatprep.subr.bf16.mxu0 %v9284_v8  ;;  %6248 = vmatprep.mubr.msk.bf16.mxu1 %vm6931_vm0, %v9284_v8 }
0x194b   :  { %6233 = vmatpush3.bf16.msra.mxu1 %v6688_v44 }
0x194c   :  { %6234 = vmatprep.subr.bf16.mxu1 %v9284_v8 }
0x194d   :  { %6215 = vmatpush3.bf16.msra.mxu0 %v9098_v40  ;;  %v3463_v40 = vadd.f32 %v9391_v55, %v8641_v62 }
0x194e   :  { %6216 = vmatprep.subr.bf16.mxu0 %v9284_v8 }
0x194f   :  { %6235 = vmatpush3.bf16.msra.mxu1 %v6689_v46 }
0x1950   :  { %6236 = vmatprep.subr.bf16.mxu1 %v9284_v8 }
0x1951   :  { %6217 = vmatpush3.bf16.msra.mxu0 %v9104_v53  ;;  %v9392_v53 = vld [vmem:[#allocation30_spill] sm:$0xff] }
0x1952   :  { %6218 = vmatprep.subr.bf16.mxu0 %v9284_v8 }
0x1953   :  { %6237 = vmatpush3.bf16.msra.mxu1 %v6690_v31 }
0x1954   :  { %6238 = vmatprep.subr.bf16.mxu1 %v9284_v8 }
0x1955   :  { %6219 = vmatpush3.bf16.msra.mxu0 %v9110_v6  ;;  %v3465_v6 = vadd.f32 %v9392_v53, %v8623_v47 }
0x1956   :  { %6220 = vmatprep.subr.bf16.mxu0 %v9284_v8 }
0x1957   :  { %6239 = vmatpush3.bf16.msra.mxu1 %v6691_v24 }
0x1958   :  { %6240 = vmatprep.subr.bf16.mxu1 %v9284_v8 }
0x1959   :  { %6221 = vmatpush3.bf16.msra.mxu0 %v9116_v12  ;;  %v9393_v12 = vld [vmem:[#allocation50_spill] sm:$0xff] }
0x195a   :  { %6222 = vmatprep.subr.bf16.mxu0 %v9284_v8 }
0x195b   :  { %6241 = vmatpush3.bf16.msra.mxu1 %v6692_v26 }
0x195c   :  { %6242 = vmatprep.subr.bf16.mxu1 %v9284_v8 }
0x195d   :  { %6223 = vmatpush3.bf16.msra.mxu0 %v9122_v36  ;;  %v3536_v36 = vadd.f32 %v9393_v12, %v8766_v19 }
0x195e   :  { %6224 = vmatprep.subr.bf16.mxu0 %v9284_v8 }
0x195f   :  { %6243 = vmatpush3.bf16.msra.mxu1 %v6693_v57 }
0x1960   :  { %6244 = vmatprep.subr.bf16.mxu1 %v9284_v8 }
0x1961   :  { %6225 = vmatpush3.bf16.msra.mxu0 %v9128_v3 }
0x1962   :  { %6226 = vmatprep.subr.bf16.mxu0 %v9284_v8 }
0x1963   :  { %6245 = vmatpush3.bf16.msra.mxu1 %v6694_v4 }
0x1964   :  { %6246 = vmatprep.subr.bf16.mxu1 %v9284_v8 }
0x1965   :  { %6227 = vmatpush3.bf16.msra.mxu0 %v9134_v37 }
0x1967   :  { %6247 = vmatpush3.bf16.msra.mxu1 %v6695_v5 }
0x1968   :  { %6229 = vmatmul.mubr.bf16.vlgmr.msra.gmra.mrb[172].mxu0 %v4547_v22 }
0x1a1b   :  { %v4586_v3 = vpop.f32.mrb[168].mxu0  ;;  %v4628_v37 = vpop.f32.mrb[168].mxu1 }
0x1a1c   :  { %v4592_v10 = vadd.f32 %v4586_v3, %v3463_v40  ;;  %v4675_v20 = vadd.f32 %v4628_v37, %v3465_v6  ;;  %v6210_v38 = vpop.f32.mrb[169].mxu0  ;;  %v4630_v23 = vpop.f32.mrb[169].mxu1 }
0x1a1d   :  { %v4676_v45 = vadd.f32 %v4630_v23, %v3536_v36  ;;  %v4589_v52 = vpop.f32.mrb[170].mxu0  ;;  %v4632_v18 = vpop.f32.mrb[170].mxu1 }
0x1a1e   :  { %v4989_v8 = vmul.f32 -1.442695, %v4675_v20  ;;  %v6211_v51 = vpop.f32.mrb[171].mxu0  ;;  %v4633_v11 = vpop.f32.mrb[171].mxu1 }
0x1a1f   :  { %v4990_v50 = vmul.f32 -1.442695, %v4676_v45 }
0x1a20   :  { %6804 = vpow2.f32 %v4989_v8 }
0x1a21   :  { %6806 = vpow2.f32 %v4990_v50 }
0x1a22   :  { %6808 = vtanh.f32 %v4592_v10 }
0x1a2a   :  { %v6805_v62 = vpop.eup %6804 }
0x1a2b   :  { %v6807_v47 = vpop.eup %6806  ;;  %v4687_v29 = vadd.f32 1.0, %v6805_v62 }
0x1a2c   :  { %v4688_v19 = vadd.f32 1.0, %v6807_v47  ;;  %v6809_v21 = vpop.eup %6808 }
0x1a2d   :  { %6810 = vrcp.f32 %v4687_v29 }
0x1a2e   :  { %6812 = vrcp.f32 %v4688_v19 }
0x1a37   :  { %v6811_v27 = vpop.eup %6810 }
0x1a38   :  { %v6813_v33 = vpop.eup %6812  ;;  %v4697_v30 = vmul.f32 %v6811_v27, %v6809_v21 }
0x1a39   :  { %v4696_v0 = vmul.f32 %v6813_v33, %v9166_v2 }
0x1a3b   :  { %v4698_v43 = vadd.f32 %v4697_v30, %v4696_v0  ;;  %v4669_v13 = vpop.f32.mrb[172].mxu0 }
0x1a3c   :  { %v4677_v63 = vadd.f32 %v4669_v13, %v3538_v42  ;;  %v6230_v56 = vpop.f32.mrb[173].mxu0 }
0x1a3d   :  { %v4672_v59 = vpop.f32.mrb[174].mxu0 }
0x1a3e   :  { %v4991_v1 = vmul.f32 -1.442695, %v4677_v63  ;;  %v6231_v32 = vpop.f32.mrb[175].mxu0 }
0x1a40   :  { %6814 = vpow2.f32 %v4991_v1 }
0x1a41   :  { %6816 = vtanh.f32 %v4698_v43 }
0x1a4a   :  { %v6815_v54 = vpop.eup %6814 }
0x1a4b   :  { %v4689_v17 = vadd.f32 1.0, %v6815_v54  ;;  %v6817_v28 = vpop.eup %6816 }
0x1a4d   :  { %6818 = vrcp.f32 %v4689_v17 }
0x1a57   :  { %v6819_v39 = vpop.eup %6818 }
0x1a58   :  { %v4700_v60 = vmul.f32 %v6819_v39, %v6817_v28 }
0x1a5a   :  { %v4701_v58 = vpack.c.bf16 %v4700_v60, %v4700_v60 }
0x1a5c   :  { %6249 = vmatmul.mubr.bf16.vlgmr.msra.gmra.mrb[172].mxu1 %v4701_v58 }
0x1b2f   :  { %v4807_v2 = vpop.f32.mrb[172].mxu1 }
0x1b30   :  { %v4808_v7 = vadd.f32 %v4992_v16, %v4807_v2  ;;  %v6250_v61 = vpop.f32.mrb[173].mxu1 }
0x1b31   :  { %v4810_v9 = vpop.f32.mrb[174].mxu1 }
0x1b32   :  { %4813 = vst [vmem:[%s9246_s12] sm:$0xff] %v4808_v7  ;;  %v6251_v48 = vpop.f32.mrb[175].mxu1 }
0x1b33   :  { %4818 = vsyncpa [#allocation10], 1 }
0x1b34   :  { %4819 = vsyncpa [#allocation12], 1 }
0x1b35   :  { %4820 = vsyncmov [#allocation8] }
0x1b38   :  { %s4821_s18 = vpop.sfrf %4820 }
0x1b39   :  { %p5001_p2 = scmp.ne.s32.totalorder %s4821_s18, 0 }
0x1b3b   :  { %4825 = shalt.err (%p5001_p2)  }
0x1b3c   :  { %4827 = vsyncmov [#allocation8 + $0x1] }
0x1b3f   :  { %s4828_s19 = vpop.sfrf %4827 }
0x1b40   :  { %p5002_p3 = scmp.ne.s32.totalorder %s4828_s19, 0 }
0x1b42   :  { %4832 = shalt.err (%p5002_p3)  }
0x1b43   :  { %4834 = vsyncmov [#allocation8 + $0x2] }
0x1b46   :  { %s4835_s11 = vpop.sfrf %4834 }
0x1b47   :  { %p5003_p4 = scmp.ne.s32.totalorder %s4835_s11, 0 }
0x1b49   :  { %4839 = shalt.err (%p5003_p4)  }
0x1b4a   :  { %4841 = vsyncmov [#allocation8 + $0x3] }
0x1b4d   :  { %s4842_s26 = vpop.sfrf %4841 }
0x1b4e   :  { %p5004_p5 = scmp.ne.s32.totalorder %s4842_s26, 0 }
0x1b50   :  { %4846 = shalt.err (%p5004_p5)  }

</bundles_post_ra>
